<compile_context>
chip_gen: v5e
topology: v5e:2x2
jax: 0.10.0
libtpu: 0.0.40
codegen_flags: <defaults>
</compile_context>

<pallas_src>
import jax
import jax.numpy as jnp
from jax import lax
from jax.experimental import pallas as pl
from jax.experimental.pallas import tpu as pltpu


def _recurrent_kernel(
    # inputs
    x_emb_ref, mask_ref,
    wih_cat_ref, bih_cat_ref,                         # concatenated GRU input proj
    g_whh_ref, g_bhh_ref, gx_whh_ref, gx_bhh_ref,     # recurrent weights
    e_w1_ref, e_b1_ref, e_w2_ref, e_b2_ref,           # encoder MLP
    d_w1_ref, d_b1_ref,                               # decoder first linear
    zc_w_ref, zc_b_ref,                               # _z_clipping linear
    std_z_ref,                                        # reparam noise (T*B, L)
    # outputs (all time-major rows: t*B + b)
    enc_out_ref,      # (T*B, 2L)  [z_mean | z_log_sigma]
    zc_out_ref,       # (T*B, 2L)  clipped [z_t_mean | z_t_log_sigma]
    d1_out_ref,       # (T*B, Hid) tanh(z @ d_w1 + d_b1)
    # scratch
    gi_g_scr, gi_x_scr, rnn_scr, rnnx_scr,
):
    T, B, E = x_emb_ref.shape
    H = g_whh_ref.shape[0]        # rnn_size
    H2 = gx_whh_ref.shape[0]      # 2 * latent_size
    L = std_z_ref.shape[1]        # latent_size
    G = 3 * H

    # ---- hoisted input projection for BOTH GRUs: one large matmul ----
    x_flat = x_emb_ref[...].reshape(T * B, E)
    gi_all = jnp.dot(x_flat, wih_cat_ref[...],
                     preferred_element_type=jnp.float32) + bih_cat_ref[...]
    gi_g_scr[...] = gi_all[:, 0:G].reshape(T, B, G)
    gi_x_scr[...] = gi_all[:, G:G + 3 * H2].reshape(T, B, 3 * H2)

    # ---- fused recurrence over both GRUs (PyTorch gate order r, z, n) ----
    g_whh = g_whh_ref[...]
    gx_whh = gx_whh_ref[...]
    g_bhh = jnp.broadcast_to(g_bhh_ref[...], (B, 3 * H))      # hoisted broadcasts
    gx_bhh = jnp.broadcast_to(gx_bhh_ref[...], (B, 3 * H2))

    def gru_cell(gi, gh, h, hd):
        r = jax.nn.sigmoid(gi[:, 0:hd] + gh[:, 0:hd])
        z = jax.nn.sigmoid(gi[:, hd:2 * hd] + gh[:, hd:2 * hd])
        n = jnp.tanh(gi[:, 2 * hd:3 * hd] + r * gh[:, 2 * hd:3 * hd])
        return (1.0 - z) * n + z * h

    def step(t, carry):
        h, hx = carry
        m = mask_ref[t]                                        # (B, 1), 0/1
        gh_g = jnp.dot(h, g_whh, preferred_element_type=jnp.float32) + g_bhh
        gh_x = jnp.dot(hx, gx_whh, preferred_element_type=jnp.float32) + gx_bhh
        hc = gru_cell(gi_g_scr[t], gh_g, h, H)
        hxc = gru_cell(gi_x_scr[t], gh_x, hx, H2)
        # packed-sequence semantics: padded positions output 0, state frozen.
        rnn_scr[t] = m * hc
        rnnx_scr[t] = m * hxc
        h_new = m * hc + (1.0 - m) * h
        hx_new = m * hxc + (1.0 - m) * hx
        return (h_new, hx_new)

    h0 = (jnp.zeros((B, H), jnp.float32), jnp.zeros((B, H2), jnp.float32))
    if T <= 32:
        # full unroll (T is static): gives the scheduler cross-timestep visibility
        carry = h0
        for t in range(T):
            carry = step(t, carry)
    else:
        lax.fori_loop(0, T, step, h0)

    # ---- encoder: Linear -> tanh -> Linear ----
    rnn_out = rnn_scr[...].reshape(T * B, H)
    h1 = jnp.tanh(jnp.dot(rnn_out, e_w1_ref[...],
                          preferred_element_type=jnp.float32) + e_b1_ref[...])
    h_enc = jnp.dot(h1, e_w2_ref[...],
                    preferred_element_type=jnp.float32) + e_b2_ref[...]
    enc_out_ref[...] = h_enc                                   # lane-dense 2L slab

    # ---- sample_latent + decoder first layer ----
    mu = h_enc[:, 0:L]
    log_sigma = h_enc[:, L:2 * L]
    z = mu + jnp.exp(log_sigma) * std_z_ref[...]
    d1_out_ref[...] = jnp.tanh(jnp.dot(z, d_w1_ref[...],
                                       preferred_element_type=jnp.float32)
                               + d_b1_ref[...])

    # ---- z-clipping head: Linear -> threshold(x, 0.001, 0.001) ----
    rx = rnnx_scr[...].reshape(T * B, H2)
    zc = jnp.dot(rx, zc_w_ref[...],
                 preferred_element_type=jnp.float32) + zc_b_ref[...]
    zc_out_ref[...] = jnp.where(zc > 0.001, zc, 0.001)


def _decoder_kernel(d1_ref, w2_ref, b2_ref, out_ref):
    # d1 / w2 arrive as bf16 (MXU-native on v6e/v7x); accumulate in f32.
    out_ref[...] = (jnp.dot(d1_ref[...], w2_ref[...],
                            preferred_element_type=jnp.float32)
                    + b2_ref[...])


class ModelRLD:
    """JAX/Pallas re-implementation of the PyTorch ModelRLD forward pass."""

    def __init__(self, hyper_params, key):
        self.hp = hyper_params
        L = hyper_params['latent_size']
        E = hyper_params['item_embed_size']
        H = hyper_params['rnn_size']
        Hid = hyper_params['hidden_size']
        NI = hyper_params['total_items']
        H2 = 2 * L

        ks = jax.random.split(key, 20)

        def nrm(k, shape, scale=0.1):
            return (scale * jax.random.normal(k, shape)).astype(jnp.float32)

        # nn.Embedding(total_items + 1, item_embed_size)
        self.item_embed = nrm(ks[0], (NI + 1, E))
        # GRUs: weights stored as (in_dim, 3*hidden), gate order (r, z, n)
        self.g_wih = nrm(ks[1], (E, 3 * H))
        self.g_whh = nrm(ks[2], (H, 3 * H))
        self.g_bih = nrm(ks[3], (1, 3 * H))
        self.g_bhh = nrm(ks[4], (1, 3 * H))
        self.gx_wih = nrm(ks[5], (E, 3 * H2))
        self.gx_whh = nrm(ks[6], (H2, 3 * H2))
        self.gx_bih = nrm(ks[7], (1, 3 * H2))
        self.gx_bhh = nrm(ks[8], (1, 3 * H2))
        # encoder (rnn_size -> hidden -> 2*latent), weights as (in, out)
        self.e_w1 = nrm(ks[9], (H, Hid))
        self.e_b1 = nrm(ks[10], (1, Hid))
        self.e_w2 = nrm(ks[11], (Hid, 2 * L))
        self.e_b2 = nrm(ks[12], (1, 2 * L))
        # decoder (latent -> hidden -> total_items)
        self.d_w1 = nrm(ks[13], (L, Hid))
        self.d_b1 = nrm(ks[14], (1, Hid))
        self.d_w2 = nrm(ks[15], (Hid, NI))
        self.d_b2 = nrm(ks[16], (1, NI))
        # _z_clipping linear (2L -> 2L)
        self.zc_w = nrm(ks[17], (2 * L, 2 * L))
        self.zc_b = nrm(ks[18], (1, 2 * L))
        # TODO(synk): torch draws np.random.normal at call time; here noise comes
        # from an explicit per-call JAX key (bitwise match impossible).
        self.noise_key = ks[19]

    def forward(self, x, x_lens, noise_key=None):
        hp = self.hp
        B, T = x.shape
        L = hp['latent_size']
        H = hp['rnn_size']
        Hid = hp['hidden_size']
        NI = hp['total_items']
        H2 = 2 * L
        BT = B * T

        # --- glue: embedding gather, length mask, time-major layout ---
        x_emb = self.item_embed[x]                                # (B, T, E)
        x_emb_tm = jnp.transpose(x_emb, (1, 0, 2))                # (T, B, E)
        mask = (jnp.arange(T)[None, :] < x_lens[:, None]).astype(jnp.float32)
        mask_tm = jnp.transpose(mask)[:, :, None]                 # (T, B, 1)

        if noise_key is None:
            noise_key = self.noise_key
        std_z_tm = jax.random.normal(noise_key, (T * B, L), jnp.float32)

        # concatenate both GRUs' input projections -> one shared big matmul
        wih_cat = jnp.concatenate([self.g_wih, self.gx_wih], axis=1)
        bih_cat = jnp.concatenate([self.g_bih, self.gx_bih], axis=1)

        inputs = (
            x_emb_tm, mask_tm, wih_cat, bih_cat,
            self.g_whh, self.g_bhh, self.gx_whh, self.gx_bhh,
            self.e_w1, self.e_b1, self.e_w2, self.e_b2,
            self.d_w1, self.d_b1, self.zc_w, self.zc_b,
            std_z_tm,
        )
        out_shape = (
            jax.ShapeDtypeStruct((T * B, 2 * L), jnp.float32),   # enc slab
            jax.ShapeDtypeStruct((T * B, 2 * L), jnp.float32),   # z-clip slab
            jax.ShapeDtypeStruct((T * B, Hid), jnp.float32),     # decoder hidden
        )
        vmem = pl.BlockSpec(memory_space=pltpu.MemorySpace.VMEM)

        enc_tm, zc_tm, d1_tm = pl.pallas_call(
            _recurrent_kernel,
            out_shape=out_shape,
            in_specs=[vmem] * len(inputs),
            out_specs=[vmem] * len(out_shape),
            scratch_shapes=[
                pltpu.VMEM((T, B, 3 * H), jnp.float32),    # hoisted gi (gru)
                pltpu.VMEM((T, B, 3 * H2), jnp.float32),   # hoisted gi (gru_x)
                pltpu.VMEM((T, B, H), jnp.float32),        # rnn_out
                pltpu.VMEM((T, B, H2), jnp.float32),       # rnn_z_out
            ],
            compiler_params=pltpu.CompilerParams(
                vmem_limit_bytes=48 * 1024 * 1024),
        )(*inputs)

        # --- glue: reorder SMALL tensors to PyTorch batch-major rows (b*T + t) ---
        def tm_to_bm(a):
            d = a.shape[-1]
            return jnp.transpose(a.reshape(T, B, d), (1, 0, 2)).reshape(BT, d)

        enc_bm = tm_to_bm(enc_tm)
        z_mean, z_log_sigma = enc_bm[:, :L], enc_bm[:, L:]
        zc_bm = tm_to_bm(zc_tm)
        z_t_mean, z_t_log_sigma = zc_bm[:, :L], zc_bm[:, L:]
        d1_bm = tm_to_bm(d1_tm).astype(jnp.bfloat16)

        # --- tiled decoder: dec_out written batch-major directly, grid over NI ---
        tn = NI if NI <= 512 else 512
        grid = (pl.cdiv(NI, tn),)
        dec_bm = pl.pallas_call(
            _decoder_kernel,
            out_shape=jax.ShapeDtypeStruct((BT, NI), jnp.float32),
            grid=grid,
            in_specs=[
                pl.BlockSpec((BT, Hid), lambda j: (0, 0)),
                pl.BlockSpec((Hid, tn), lambda j: (0, j)),
                pl.BlockSpec((1, tn), lambda j: (0, j)),
            ],
            out_specs=pl.BlockSpec((BT, tn), lambda j: (0, j)),
            compiler_params=pltpu.CompilerParams(
                dimension_semantics=("parallel",)),
        )(d1_bm, self.d_w2.astype(jnp.bfloat16), self.d_b2)

        dec_out = dec_bm.reshape(B, T, NI)
        return dec_out, z_mean, z_log_sigma, z_t_mean, z_t_log_sigma


if __name__ == "__main__":
    # Small, self-consistent hyperparameters.
    hp = {
        'latent_size': 16,
        'rnn_size': 32,
        'hidden_size': 32,
        'item_embed_size': 16,
        'total_items': 64,
    }
    B, T = 2, 8

    root = jax.random.PRNGKey(0)
    k_model, k_x, k_noise = jax.random.split(root, 3)

    model = ModelRLD(hp, k_model)

    x = jax.random.randint(k_x, (B, T), 0, hp['total_items'] + 1, dtype=jnp.int32)
    # decreasing lengths, max == T (matches pack/pad_packed semantics)
    x_lens = jnp.array([T, T - 2], dtype=jnp.int32)

    outs = model.forward(x, x_lens, noise_key=k_noise)
    outs = jax.block_until_ready(outs)

    dec_out, z_mean, z_log_sigma, z_t_mean, z_t_log_sigma = outs
    assert dec_out.shape == (B, T, hp['total_items'])
    assert z_mean.shape == (B * T, hp['latent_size'])
    assert z_log_sigma.shape == (B * T, hp['latent_size'])
    assert z_t_mean.shape == (B * T, hp['latent_size'])
    assert z_t_log_sigma.shape == (B * T, hp['latent_size'])
    print("KERNEL_OK")
</pallas_src>

<mosaic_0001>
module attributes {stable_mosaic.version = 11 : i64} {
  func.func @_recurrent_kernel(%arg0: memref<8x2x16xf32, #tpu.memory_space<vmem>>, %arg1: memref<8x2x1xf32, #tpu.memory_space<vmem>>, %arg2: memref<16x192xf32, #tpu.memory_space<vmem>>, %arg3: memref<1x192xf32, #tpu.memory_space<vmem>>, %arg4: memref<32x96xf32, #tpu.memory_space<vmem>>, %arg5: memref<1x96xf32, #tpu.memory_space<vmem>>, %arg6: memref<32x96xf32, #tpu.memory_space<vmem>>, %arg7: memref<1x96xf32, #tpu.memory_space<vmem>>, %arg8: memref<32x32xf32, #tpu.memory_space<vmem>>, %arg9: memref<1x32xf32, #tpu.memory_space<vmem>>, %arg10: memref<32x32xf32, #tpu.memory_space<vmem>>, %arg11: memref<1x32xf32, #tpu.memory_space<vmem>>, %arg12: memref<16x32xf32, #tpu.memory_space<vmem>>, %arg13: memref<1x32xf32, #tpu.memory_space<vmem>>, %arg14: memref<32x32xf32, #tpu.memory_space<vmem>>, %arg15: memref<1x32xf32, #tpu.memory_space<vmem>>, %arg16: memref<16x16xf32, #tpu.memory_space<vmem>>, %arg17: memref<16x32xf32, #tpu.memory_space<vmem>>, %arg18: memref<16x32xf32, #tpu.memory_space<vmem>>, %arg19: memref<16x32xf32, #tpu.memory_space<vmem>>, %arg20: memref<8x2x96xf32, #tpu.memory_space<vmem>>, %arg21: memref<8x2x96xf32, #tpu.memory_space<vmem>>, %arg22: memref<8x2x32xf32, #tpu.memory_space<vmem>>, %arg23: memref<8x2x32xf32, #tpu.memory_space<vmem>>) attributes {dimension_semantics = [], scalar_prefetch = 0 : i64, scratch_operands = 4 : i64, tpu.core_type = #tpu.core_type<tc>} {
    %c0 = arith.constant 0 : index
    %c0_0 = arith.constant 0 : index
    %c0_1 = arith.constant 0 : index
    %0 = vector.load %arg0[%c0, %c0_0, %c0_1] : memref<8x2x16xf32, #tpu.memory_space<vmem>>, vector<8x2x16xf32>
    %1 = vector.shape_cast %0 : vector<8x2x16xf32> to vector<16x16xf32>
    %c0_2 = arith.constant 0 : index
    %c0_3 = arith.constant 0 : index
    %2 = vector.load %arg2[%c0_2, %c0_3] : memref<16x192xf32, #tpu.memory_space<vmem>>, vector<16x192xf32>
    %cst = arith.constant dense<0.000000e+00> : vector<16x192xf32>
    %3 = tpu.matmul %1, %2, %cst {dimension_numbers = #tpu.dot_dimension_numbers<[1], [0], [0], [1], [0, 0, 1, 1], [], []>} : vector<16x16xf32>, vector<16x192xf32>, vector<16x192xf32> -> vector<16x192xf32>
    %c0_4 = arith.constant 0 : index
    %c0_5 = arith.constant 0 : index
    %4 = vector.load %arg3[%c0_4, %c0_5] : memref<1x192xf32, #tpu.memory_space<vmem>>, vector<1x192xf32>
    %5 = vector.broadcast %4 : vector<1x192xf32> to vector<16x192xf32>
    %6 = arith.addf %3, %5 : vector<16x192xf32>
    %7 = vector.extract_strided_slice %6 {offsets = [0, 0], sizes = [16, 96], strides = [1, 1]} : vector<16x192xf32> to vector<16x96xf32>
    %8 = vector.shape_cast %7 : vector<16x96xf32> to vector<8x2x96xf32>
    %c0_6 = arith.constant 0 : index
    %c0_7 = arith.constant 0 : index
    %c0_8 = arith.constant 0 : index
    %9 = vector.load %arg20[%c0_6, %c0_7, %c0_8] : memref<8x2x96xf32, #tpu.memory_space<vmem>>, vector<8x2x96xf32>
    tpu.vector_store %arg20[%c0_6, %c0_7, %c0_8], %8 {strides = array<i32>} : memref<8x2x96xf32, #tpu.memory_space<vmem>>, vector<8x2x96xf32>,
    %10 = vector.extract_strided_slice %6 {offsets = [0, 96], sizes = [16, 96], strides = [1, 1]} : vector<16x192xf32> to vector<16x96xf32>
    %11 = vector.shape_cast %10 : vector<16x96xf32> to vector<8x2x96xf32>
    %c0_9 = arith.constant 0 : index
    %c0_10 = arith.constant 0 : index
    %c0_11 = arith.constant 0 : index
    %12 = vector.load %arg21[%c0_9, %c0_10, %c0_11] : memref<8x2x96xf32, #tpu.memory_space<vmem>>, vector<8x2x96xf32>
    tpu.vector_store %arg21[%c0_9, %c0_10, %c0_11], %11 {strides = array<i32>} : memref<8x2x96xf32, #tpu.memory_space<vmem>>, vector<8x2x96xf32>,
    %c0_12 = arith.constant 0 : index
    %c0_13 = arith.constant 0 : index
    %13 = vector.load %arg4[%c0_12, %c0_13] : memref<32x96xf32, #tpu.memory_space<vmem>>, vector<32x96xf32>
    %c0_14 = arith.constant 0 : index
    %c0_15 = arith.constant 0 : index
    %14 = vector.load %arg6[%c0_14, %c0_15] : memref<32x96xf32, #tpu.memory_space<vmem>>, vector<32x96xf32>
    %c0_16 = arith.constant 0 : index
    %c0_17 = arith.constant 0 : index
    %15 = vector.load %arg5[%c0_16, %c0_17] : memref<1x96xf32, #tpu.memory_space<vmem>>, vector<1x96xf32>
    %16 = vector.shape_cast %15 : vector<1x96xf32> to vector<1x96xf32>
    %17 = vector.broadcast %16 : vector<1x96xf32> to vector<2x96xf32>
    %c0_18 = arith.constant 0 : index
    %c0_19 = arith.constant 0 : index
    %18 = vector.load %arg7[%c0_18, %c0_19] : memref<1x96xf32, #tpu.memory_space<vmem>>, vector<1x96xf32>
    %19 = vector.shape_cast %18 : vector<1x96xf32> to vector<1x96xf32>
    %20 = vector.broadcast %19 : vector<1x96xf32> to vector<2x96xf32>
    %cst_20 = arith.constant 0.000000e+00 : f32
    %21 = vector.broadcast %cst_20 : f32 to vector<2x32xf32>
    %cst_21 = arith.constant 0.000000e+00 : f32
    %22 = vector.broadcast %cst_21 : f32 to vector<2x32xf32>
    %c0_22 = arith.constant 0 : index
    %c0_23 = arith.constant 0 : index
    %c0_24 = arith.constant 0 : index
    %23 = vector.load %arg1[%c0_22, %c0_23, %c0_24] : memref<8x2x1xf32, #tpu.memory_space<vmem>>, vector<1x2x1xf32>
    %24 = vector.shape_cast %23 : vector<1x2x1xf32> to vector<2x1xf32>
    %cst_25 = arith.constant dense<0.000000e+00> : vector<2x96xf32>
    %25 = tpu.matmul %21, %13, %cst_25 {dimension_numbers = #tpu.dot_dimension_numbers<[1], [0], [0], [1], [0, 0, 1, 1], [], []>} : vector<2x32xf32>, vector<32x96xf32>, vector<2x96xf32> -> vector<2x96xf32>
    %26 = arith.addf %25, %17 : vector<2x96xf32>
    %cst_26 = arith.constant dense<0.000000e+00> : vector<2x96xf32>
    %27 = tpu.matmul %22, %14, %cst_26 {dimension_numbers = #tpu.dot_dimension_numbers<[1], [0], [0], [1], [0, 0, 1, 1], [], []>} : vector<2x32xf32>, vector<32x96xf32>, vector<2x96xf32> -> vector<2x96xf32>
    %28 = arith.addf %27, %20 : vector<2x96xf32>
    %c0_27 = arith.constant 0 : index
    %c0_28 = arith.constant 0 : index
    %c0_29 = arith.constant 0 : index
    %29 = vector.load %arg20[%c0_27, %c0_28, %c0_29] : memref<8x2x96xf32, #tpu.memory_space<vmem>>, vector<1x2x96xf32>
    %30 = vector.shape_cast %29 : vector<1x2x96xf32> to vector<2x96xf32>
    %31 = vector.extract_strided_slice %30 {offsets = [0, 0], sizes = [2, 32], strides = [1, 1]} : vector<2x96xf32> to vector<2x32xf32>
    %32 = vector.extract_strided_slice %26 {offsets = [0, 0], sizes = [2, 32], strides = [1, 1]} : vector<2x96xf32> to vector<2x32xf32>
    %33 = arith.addf %31, %32 : vector<2x32xf32>
    %34 = arith.negf %33 : vector<2x32xf32>
    %35 = math.exp %34 : vector<2x32xf32>
    %cst_30 = arith.constant 1.000000e+00 : f32
    %36 = vector.broadcast %cst_30 : f32 to vector<2x32xf32>
    %37 = arith.addf %36, %35 : vector<2x32xf32>
    %38 = arith.divf %36, %37 : vector<2x32xf32>
    %39 = vector.extract_strided_slice %30 {offsets = [0, 32], sizes = [2, 32], strides = [1, 1]} : vector<2x96xf32> to vector<2x32xf32>
    %40 = vector.extract_strided_slice %26 {offsets = [0, 32], sizes = [2, 32], strides = [1, 1]} : vector<2x96xf32> to vector<2x32xf32>
    %41 = arith.addf %39, %40 : vector<2x32xf32>
    %42 = arith.negf %41 : vector<2x32xf32>
    %43 = math.exp %42 : vector<2x32xf32>
    %cst_31 = arith.constant 1.000000e+00 : f32
    %44 = vector.broadcast %cst_31 : f32 to vector<2x32xf32>
    %45 = arith.addf %44, %43 : vector<2x32xf32>
    %46 = arith.divf %44, %45 : vector<2x32xf32>
    %47 = vector.extract_strided_slice %30 {offsets = [0, 64], sizes = [2, 32], strides = [1, 1]} : vector<2x96xf32> to vector<2x32xf32>
    %48 = vector.extract_strided_slice %26 {offsets = [0, 64], sizes = [2, 32], strides = [1, 1]} : vector<2x96xf32> to vector<2x32xf32>
    %49 = arith.mulf %38, %48 : vector<2x32xf32>
    %50 = arith.addf %47, %49 : vector<2x32xf32>
    %51 = math.tanh %50 : vector<2x32xf32>
    %cst_32 = arith.constant 1.000000e+00 : f32
    %52 = vector.broadcast %cst_32 : f32 to vector<2x32xf32>
    %53 = arith.subf %52, %46 : vector<2x32xf32>
    %54 = arith.mulf %53, %51 : vector<2x32xf32>
    %55 = arith.mulf %46, %21 : vector<2x32xf32>
    %56 = arith.addf %54, %55 : vector<2x32xf32>
    %c0_33 = arith.constant 0 : index
    %c0_34 = arith.constant 0 : index
    %c0_35 = arith.constant 0 : index
    %57 = vector.load %arg21[%c0_33, %c0_34, %c0_35] : memref<8x2x96xf32, #tpu.memory_space<vmem>>, vector<1x2x96xf32>
    %58 = vector.shape_cast %57 : vector<1x2x96xf32> to vector<2x96xf32>
    %59 = vector.extract_strided_slice %58 {offsets = [0, 0], sizes = [2, 32], strides = [1, 1]} : vector<2x96xf32> to vector<2x32xf32>
    %60 = vector.extract_strided_slice %28 {offsets = [0, 0], sizes = [2, 32], strides = [1, 1]} : vector<2x96xf32> to vector<2x32xf32>
    %61 = arith.addf %59, %60 : vector<2x32xf32>
    %62 = arith.negf %61 : vector<2x32xf32>
    %63 = math.exp %62 : vector<2x32xf32>
    %cst_36 = arith.constant 1.000000e+00 : f32
    %64 = vector.broadcast %cst_36 : f32 to vector<2x32xf32>
    %65 = arith.addf %64, %63 : vector<2x32xf32>
    %66 = arith.divf %64, %65 : vector<2x32xf32>
    %67 = vector.extract_strided_slice %58 {offsets = [0, 32], sizes = [2, 32], strides = [1, 1]} : vector<2x96xf32> to vector<2x32xf32>
    %68 = vector.extract_strided_slice %28 {offsets = [0, 32], sizes = [2, 32], strides = [1, 1]} : vector<2x96xf32> to vector<2x32xf32>
    %69 = arith.addf %67, %68 : vector<2x32xf32>
    %70 = arith.negf %69 : vector<2x32xf32>
    %71 = math.exp %70 : vector<2x32xf32>
    %cst_37 = arith.constant 1.000000e+00 : f32
    %72 = vector.broadcast %cst_37 : f32 to vector<2x32xf32>
    %73 = arith.addf %72, %71 : vector<2x32xf32>
    %74 = arith.divf %72, %73 : vector<2x32xf32>
    %75 = vector.extract_strided_slice %58 {offsets = [0, 64], sizes = [2, 32], strides = [1, 1]} : vector<2x96xf32> to vector<2x32xf32>
    %76 = vector.extract_strided_slice %28 {offsets = [0, 64], sizes = [2, 32], strides = [1, 1]} : vector<2x96xf32> to vector<2x32xf32>
    %77 = arith.mulf %66, %76 : vector<2x32xf32>
    %78 = arith.addf %75, %77 : vector<2x32xf32>
    %79 = math.tanh %78 : vector<2x32xf32>
    %cst_38 = arith.constant 1.000000e+00 : f32
    %80 = vector.broadcast %cst_38 : f32 to vector<2x32xf32>
    %81 = arith.subf %80, %74 : vector<2x32xf32>
    %82 = arith.mulf %81, %79 : vector<2x32xf32>
    %83 = arith.mulf %74, %22 : vector<2x32xf32>
    %84 = arith.addf %82, %83 : vector<2x32xf32>
    %85 = vector.broadcast %24 : vector<2x1xf32> to vector<2x32xf32>
    %86 = arith.mulf %85, %56 : vector<2x32xf32>
    %c0_39 = arith.constant 0 : index
    %c0_40 = arith.constant 0 : index
    %c0_41 = arith.constant 0 : index
    %87 = vector.load %arg22[%c0_39, %c0_40, %c0_41] : memref<8x2x32xf32, #tpu.memory_space<vmem>>, vector<1x2x32xf32>
    %88 = vector.shape_cast %87 : vector<1x2x32xf32> to vector<2x32xf32>
    %89 = vector.shape_cast %86 : vector<2x32xf32> to vector<1x2x32xf32>
    tpu.vector_store %arg22[%c0_39, %c0_40, %c0_41], %89 {strides = array<i32>} : memref<8x2x32xf32, #tpu.memory_space<vmem>>, vector<1x2x32xf32>,
    %90 = vector.broadcast %24 : vector<2x1xf32> to vector<2x32xf32>
    %91 = arith.mulf %90, %84 : vector<2x32xf32>
    %c0_42 = arith.constant 0 : index
    %c0_43 = arith.constant 0 : index
    %c0_44 = arith.constant 0 : index
    %92 = vector.load %arg23[%c0_42, %c0_43, %c0_44] : memref<8x2x32xf32, #tpu.memory_space<vmem>>, vector<1x2x32xf32>
    %93 = vector.shape_cast %92 : vector<1x2x32xf32> to vector<2x32xf32>
    %94 = vector.shape_cast %91 : vector<2x32xf32> to vector<1x2x32xf32>
    tpu.vector_store %arg23[%c0_42, %c0_43, %c0_44], %94 {strides = array<i32>} : memref<8x2x32xf32, #tpu.memory_space<vmem>>, vector<1x2x32xf32>,
    %95 = vector.broadcast %24 : vector<2x1xf32> to vector<2x32xf32>
    %96 = arith.mulf %95, %56 : vector<2x32xf32>
    %cst_45 = arith.constant 1.000000e+00 : f32
    %97 = vector.broadcast %cst_45 : f32 to vector<2x1xf32>
    %98 = arith.subf %97, %24 : vector<2x1xf32>
    %99 = vector.broadcast %98 : vector<2x1xf32> to vector<2x32xf32>
    %100 = arith.mulf %99, %21 : vector<2x32xf32>
    %101 = arith.addf %96, %100 : vector<2x32xf32>
    %102 = vector.broadcast %24 : vector<2x1xf32> to vector<2x32xf32>
    %103 = arith.mulf %102, %84 : vector<2x32xf32>
    %cst_46 = arith.constant 1.000000e+00 : f32
    %104 = vector.broadcast %cst_46 : f32 to vector<2x1xf32>
    %105 = arith.subf %104, %24 : vector<2x1xf32>
    %106 = vector.broadcast %105 : vector<2x1xf32> to vector<2x32xf32>
    %107 = arith.mulf %106, %22 : vector<2x32xf32>
    %108 = arith.addf %103, %107 : vector<2x32xf32>
    %c1 = arith.constant 1 : index
    %c0_47 = arith.constant 0 : index
    %c0_48 = arith.constant 0 : index
    %109 = vector.load %arg1[%c1, %c0_47, %c0_48] : memref<8x2x1xf32, #tpu.memory_space<vmem>>, vector<1x2x1xf32>
    %110 = vector.shape_cast %109 : vector<1x2x1xf32> to vector<2x1xf32>
    %cst_49 = arith.constant dense<0.000000e+00> : vector<2x96xf32>
    %111 = tpu.matmul %101, %13, %cst_49 {dimension_numbers = #tpu.dot_dimension_numbers<[1], [0], [0], [1], [0, 0, 1, 1], [], []>} : vector<2x32xf32>, vector<32x96xf32>, vector<2x96xf32> -> vector<2x96xf32>
    %112 = arith.addf %111, %17 : vector<2x96xf32>
    %cst_50 = arith.constant dense<0.000000e+00> : vector<2x96xf32>
    %113 = tpu.matmul %108, %14, %cst_50 {dimension_numbers = #tpu.dot_dimension_numbers<[1], [0], [0], [1], [0, 0, 1, 1], [], []>} : vector<2x32xf32>, vector<32x96xf32>, vector<2x96xf32> -> vector<2x96xf32>
    %114 = arith.addf %113, %20 : vector<2x96xf32>
    %c1_51 = arith.constant 1 : index
    %c0_52 = arith.constant 0 : index
    %c0_53 = arith.constant 0 : index
    %115 = vector.load %arg20[%c1_51, %c0_52, %c0_53] : memref<8x2x96xf32, #tpu.memory_space<vmem>>, vector<1x2x96xf32>
    %116 = vector.shape_cast %115 : vector<1x2x96xf32> to vector<2x96xf32>
    %117 = vector.extract_strided_slice %116 {offsets = [0, 0], sizes = [2, 32], strides = [1, 1]} : vector<2x96xf32> to vector<2x32xf32>
    %118 = vector.extract_strided_slice %112 {offsets = [0, 0], sizes = [2, 32], strides = [1, 1]} : vector<2x96xf32> to vector<2x32xf32>
    %119 = arith.addf %117, %118 : vector<2x32xf32>
    %120 = arith.negf %119 : vector<2x32xf32>
    %121 = math.exp %120 : vector<2x32xf32>
    %cst_54 = arith.constant 1.000000e+00 : f32
    %122 = vector.broadcast %cst_54 : f32 to vector<2x32xf32>
    %123 = arith.addf %122, %121 : vector<2x32xf32>
    %124 = arith.divf %122, %123 : vector<2x32xf32>
    %125 = vector.extract_strided_slice %116 {offsets = [0, 32], sizes = [2, 32], strides = [1, 1]} : vector<2x96xf32> to vector<2x32xf32>
    %126 = vector.extract_strided_slice %112 {offsets = [0, 32], sizes = [2, 32], strides = [1, 1]} : vector<2x96xf32> to vector<2x32xf32>
    %127 = arith.addf %125, %126 : vector<2x32xf32>
    %128 = arith.negf %127 : vector<2x32xf32>
    %129 = math.exp %128 : vector<2x32xf32>
    %cst_55 = arith.constant 1.000000e+00 : f32
    %130 = vector.broadcast %cst_55 : f32 to vector<2x32xf32>
    %131 = arith.addf %130, %129 : vector<2x32xf32>
    %132 = arith.divf %130, %131 : vector<2x32xf32>
    %133 = vector.extract_strided_slice %116 {offsets = [0, 64], sizes = [2, 32], strides = [1, 1]} : vector<2x96xf32> to vector<2x32xf32>
    %134 = vector.extract_strided_slice %112 {offsets = [0, 64], sizes = [2, 32], strides = [1, 1]} : vector<2x96xf32> to vector<2x32xf32>
    %135 = arith.mulf %124, %134 : vector<2x32xf32>
    %136 = arith.addf %133, %135 : vector<2x32xf32>
    %137 = math.tanh %136 : vector<2x32xf32>
    %cst_56 = arith.constant 1.000000e+00 : f32
    %138 = vector.broadcast %cst_56 : f32 to vector<2x32xf32>
    %139 = arith.subf %138, %132 : vector<2x32xf32>
    %140 = arith.mulf %139, %137 : vector<2x32xf32>
    %141 = arith.mulf %132, %101 : vector<2x32xf32>
    %142 = arith.addf %140, %141 : vector<2x32xf32>
    %c1_57 = arith.constant 1 : index
    %c0_58 = arith.constant 0 : index
    %c0_59 = arith.constant 0 : index
    %143 = vector.load %arg21[%c1_57, %c0_58, %c0_59] : memref<8x2x96xf32, #tpu.memory_space<vmem>>, vector<1x2x96xf32>
    %144 = vector.shape_cast %143 : vector<1x2x96xf32> to vector<2x96xf32>
    %145 = vector.extract_strided_slice %144 {offsets = [0, 0], sizes = [2, 32], strides = [1, 1]} : vector<2x96xf32> to vector<2x32xf32>
    %146 = vector.extract_strided_slice %114 {offsets = [0, 0], sizes = [2, 32], strides = [1, 1]} : vector<2x96xf32> to vector<2x32xf32>
    %147 = arith.addf %145, %146 : vector<2x32xf32>
    %148 = arith.negf %147 : vector<2x32xf32>
    %149 = math.exp %148 : vector<2x32xf32>
    %cst_60 = arith.constant 1.000000e+00 : f32
    %150 = vector.broadcast %cst_60 : f32 to vector<2x32xf32>
    %151 = arith.addf %150, %149 : vector<2x32xf32>
    %152 = arith.divf %150, %151 : vector<2x32xf32>
    %153 = vector.extract_strided_slice %144 {offsets = [0, 32], sizes = [2, 32], strides = [1, 1]} : vector<2x96xf32> to vector<2x32xf32>
    %154 = vector.extract_strided_slice %114 {offsets = [0, 32], sizes = [2, 32], strides = [1, 1]} : vector<2x96xf32> to vector<2x32xf32>
    %155 = arith.addf %153, %154 : vector<2x32xf32>
    %156 = arith.negf %155 : vector<2x32xf32>
    %157 = math.exp %156 : vector<2x32xf32>
    %cst_61 = arith.constant 1.000000e+00 : f32
    %158 = vector.broadcast %cst_61 : f32 to vector<2x32xf32>
    %159 = arith.addf %158, %157 : vector<2x32xf32>
    %160 = arith.divf %158, %159 : vector<2x32xf32>
    %161 = vector.extract_strided_slice %144 {offsets = [0, 64], sizes = [2, 32], strides = [1, 1]} : vector<2x96xf32> to vector<2x32xf32>
    %162 = vector.extract_strided_slice %114 {offsets = [0, 64], sizes = [2, 32], strides = [1, 1]} : vector<2x96xf32> to vector<2x32xf32>
    %163 = arith.mulf %152, %162 : vector<2x32xf32>
    %164 = arith.addf %161, %163 : vector<2x32xf32>
    %165 = math.tanh %164 : vector<2x32xf32>
    %cst_62 = arith.constant 1.000000e+00 : f32
    %166 = vector.broadcast %cst_62 : f32 to vector<2x32xf32>
    %167 = arith.subf %166, %160 : vector<2x32xf32>
    %168 = arith.mulf %167, %165 : vector<2x32xf32>
    %169 = arith.mulf %160, %108 : vector<2x32xf32>
    %170 = arith.addf %168, %169 : vector<2x32xf32>
    %171 = vector.broadcast %110 : vector<2x1xf32> to vector<2x32xf32>
    %172 = arith.mulf %171, %142 : vector<2x32xf32>
    %c1_63 = arith.constant 1 : index
    %c0_64 = arith.constant 0 : index
    %c0_65 = arith.constant 0 : index
    %173 = vector.load %arg22[%c1_63, %c0_64, %c0_65] : memref<8x2x32xf32, #tpu.memory_space<vmem>>, vector<1x2x32xf32>
    %174 = vector.shape_cast %173 : vector<1x2x32xf32> to vector<2x32xf32>
    %175 = vector.shape_cast %172 : vector<2x32xf32> to vector<1x2x32xf32>
    tpu.vector_store %arg22[%c1_63, %c0_64, %c0_65], %175 {strides = array<i32>} : memref<8x2x32xf32, #tpu.memory_space<vmem>>, vector<1x2x32xf32>,
    %176 = vector.broadcast %110 : vector<2x1xf32> to vector<2x32xf32>
    %177 = arith.mulf %176, %170 : vector<2x32xf32>
    %c1_66 = arith.constant 1 : index
    %c0_67 = arith.constant 0 : index
    %c0_68 = arith.constant 0 : index
    %178 = vector.load %arg23[%c1_66, %c0_67, %c0_68] : memref<8x2x32xf32, #tpu.memory_space<vmem>>, vector<1x2x32xf32>
    %179 = vector.shape_cast %178 : vector<1x2x32xf32> to vector<2x32xf32>
    %180 = vector.shape_cast %177 : vector<2x32xf32> to vector<1x2x32xf32>
    tpu.vector_store %arg23[%c1_66, %c0_67, %c0_68], %180 {strides = array<i32>} : memref<8x2x32xf32, #tpu.memory_space<vmem>>, vector<1x2x32xf32>,
    %181 = vector.broadcast %110 : vector<2x1xf32> to vector<2x32xf32>
    %182 = arith.mulf %181, %142 : vector<2x32xf32>
    %cst_69 = arith.constant 1.000000e+00 : f32
    %183 = vector.broadcast %cst_69 : f32 to vector<2x1xf32>
    %184 = arith.subf %183, %110 : vector<2x1xf32>
    %185 = vector.broadcast %184 : vector<2x1xf32> to vector<2x32xf32>
    %186 = arith.mulf %185, %101 : vector<2x32xf32>
    %187 = arith.addf %182, %186 : vector<2x32xf32>
    %188 = vector.broadcast %110 : vector<2x1xf32> to vector<2x32xf32>
    %189 = arith.mulf %188, %170 : vector<2x32xf32>
    %cst_70 = arith.constant 1.000000e+00 : f32
    %190 = vector.broadcast %cst_70 : f32 to vector<2x1xf32>
    %191 = arith.subf %190, %110 : vector<2x1xf32>
    %192 = vector.broadcast %191 : vector<2x1xf32> to vector<2x32xf32>
    %193 = arith.mulf %192, %108 : vector<2x32xf32>
    %194 = arith.addf %189, %193 : vector<2x32xf32>
    %c2 = arith.constant 2 : index
    %c0_71 = arith.constant 0 : index
    %c0_72 = arith.constant 0 : index
    %195 = vector.load %arg1[%c2, %c0_71, %c0_72] : memref<8x2x1xf32, #tpu.memory_space<vmem>>, vector<1x2x1xf32>
    %196 = vector.shape_cast %195 : vector<1x2x1xf32> to vector<2x1xf32>
    %cst_73 = arith.constant dense<0.000000e+00> : vector<2x96xf32>
    %197 = tpu.matmul %187, %13, %cst_73 {dimension_numbers = #tpu.dot_dimension_numbers<[1], [0], [0], [1], [0, 0, 1, 1], [], []>} : vector<2x32xf32>, vector<32x96xf32>, vector<2x96xf32> -> vector<2x96xf32>
    %198 = arith.addf %197, %17 : vector<2x96xf32>
    %cst_74 = arith.constant dense<0.000000e+00> : vector<2x96xf32>
    %199 = tpu.matmul %194, %14, %cst_74 {dimension_numbers = #tpu.dot_dimension_numbers<[1], [0], [0], [1], [0, 0, 1, 1], [], []>} : vector<2x32xf32>, vector<32x96xf32>, vector<2x96xf32> -> vector<2x96xf32>
    %200 = arith.addf %199, %20 : vector<2x96xf32>
    %c2_75 = arith.constant 2 : index
    %c0_76 = arith.constant 0 : index
    %c0_77 = arith.constant 0 : index
    %201 = vector.load %arg20[%c2_75, %c0_76, %c0_77] : memref<8x2x96xf32, #tpu.memory_space<vmem>>, vector<1x2x96xf32>
    %202 = vector.shape_cast %201 : vector<1x2x96xf32> to vector<2x96xf32>
    %203 = vector.extract_strided_slice %202 {offsets = [0, 0], sizes = [2, 32], strides = [1, 1]} : vector<2x96xf32> to vector<2x32xf32>
    %204 = vector.extract_strided_slice %198 {offsets = [0, 0], sizes = [2, 32], strides = [1, 1]} : vector<2x96xf32> to vector<2x32xf32>
    %205 = arith.addf %203, %204 : vector<2x32xf32>
    %206 = arith.negf %205 : vector<2x32xf32>
    %207 = math.exp %206 : vector<2x32xf32>
    %cst_78 = arith.constant 1.000000e+00 : f32
    %208 = vector.broadcast %cst_78 : f32 to vector<2x32xf32>
    %209 = arith.addf %208, %207 : vector<2x32xf32>
    %210 = arith.divf %208, %209 : vector<2x32xf32>
    %211 = vector.extract_strided_slice %202 {offsets = [0, 32], sizes = [2, 32], strides = [1, 1]} : vector<2x96xf32> to vector<2x32xf32>
    %212 = vector.extract_strided_slice %198 {offsets = [0, 32], sizes = [2, 32], strides = [1, 1]} : vector<2x96xf32> to vector<2x32xf32>
    %213 = arith.addf %211, %212 : vector<2x32xf32>
    %214 = arith.negf %213 : vector<2x32xf32>
    %215 = math.exp %214 : vector<2x32xf32>
    %cst_79 = arith.constant 1.000000e+00 : f32
    %216 = vector.broadcast %cst_79 : f32 to vector<2x32xf32>
    %217 = arith.addf %216, %215 : vector<2x32xf32>
    %218 = arith.divf %216, %217 : vector<2x32xf32>
    %219 = vector.extract_strided_slice %202 {offsets = [0, 64], sizes = [2, 32], strides = [1, 1]} : vector<2x96xf32> to vector<2x32xf32>
    %220 = vector.extract_strided_slice %198 {offsets = [0, 64], sizes = [2, 32], strides = [1, 1]} : vector<2x96xf32> to vector<2x32xf32>
    %221 = arith.mulf %210, %220 : vector<2x32xf32>
    %222 = arith.addf %219, %221 : vector<2x32xf32>
    %223 = math.tanh %222 : vector<2x32xf32>
    %cst_80 = arith.constant 1.000000e+00 : f32
    %224 = vector.broadcast %cst_80 : f32 to vector<2x32xf32>
    %225 = arith.subf %224, %218 : vector<2x32xf32>
    %226 = arith.mulf %225, %223 : vector<2x32xf32>
    %227 = arith.mulf %218, %187 : vector<2x32xf32>
    %228 = arith.addf %226, %227 : vector<2x32xf32>
    %c2_81 = arith.constant 2 : index
    %c0_82 = arith.constant 0 : index
    %c0_83 = arith.constant 0 : index
    %229 = vector.load %arg21[%c2_81, %c0_82, %c0_83] : memref<8x2x96xf32, #tpu.memory_space<vmem>>, vector<1x2x96xf32>
    %230 = vector.shape_cast %229 : vector<1x2x96xf32> to vector<2x96xf32>
    %231 = vector.extract_strided_slice %230 {offsets = [0, 0], sizes = [2, 32], strides = [1, 1]} : vector<2x96xf32> to vector<2x32xf32>
    %232 = vector.extract_strided_slice %200 {offsets = [0, 0], sizes = [2, 32], strides = [1, 1]} : vector<2x96xf32> to vector<2x32xf32>
    %233 = arith.addf %231, %232 : vector<2x32xf32>
    %234 = arith.negf %233 : vector<2x32xf32>
    %235 = math.exp %234 : vector<2x32xf32>
    %cst_84 = arith.constant 1.000000e+00 : f32
    %236 = vector.broadcast %cst_84 : f32 to vector<2x32xf32>
    %237 = arith.addf %236, %235 : vector<2x32xf32>
    %238 = arith.divf %236, %237 : vector<2x32xf32>
    %239 = vector.extract_strided_slice %230 {offsets = [0, 32], sizes = [2, 32], strides = [1, 1]} : vector<2x96xf32> to vector<2x32xf32>
    %240 = vector.extract_strided_slice %200 {offsets = [0, 32], sizes = [2, 32], strides = [1, 1]} : vector<2x96xf32> to vector<2x32xf32>
    %241 = arith.addf %239, %240 : vector<2x32xf32>
    %242 = arith.negf %241 : vector<2x32xf32>
    %243 = math.exp %242 : vector<2x32xf32>
    %cst_85 = arith.constant 1.000000e+00 : f32
    %244 = vector.broadcast %cst_85 : f32 to vector<2x32xf32>
    %245 = arith.addf %244, %243 : vector<2x32xf32>
    %246 = arith.divf %244, %245 : vector<2x32xf32>
    %247 = vector.extract_strided_slice %230 {offsets = [0, 64], sizes = [2, 32], strides = [1, 1]} : vector<2x96xf32> to vector<2x32xf32>
    %248 = vector.extract_strided_slice %200 {offsets = [0, 64], sizes = [2, 32], strides = [1, 1]} : vector<2x96xf32> to vector<2x32xf32>
    %249 = arith.mulf %238, %248 : vector<2x32xf32>
    %250 = arith.addf %247, %249 : vector<2x32xf32>
    %251 = math.tanh %250 : vector<2x32xf32>
    %cst_86 = arith.constant 1.000000e+00 : f32
    %252 = vector.broadcast %cst_86 : f32 to vector<2x32xf32>
    %253 = arith.subf %252, %246 : vector<2x32xf32>
    %254 = arith.mulf %253, %251 : vector<2x32xf32>
    %255 = arith.mulf %246, %194 : vector<2x32xf32>
    %256 = arith.addf %254, %255 : vector<2x32xf32>
    %257 = vector.broadcast %196 : vector<2x1xf32> to vector<2x32xf32>
    %258 = arith.mulf %257, %228 : vector<2x32xf32>
    %c2_87 = arith.constant 2 : index
    %c0_88 = arith.constant 0 : index
    %c0_89 = arith.constant 0 : index
    %259 = vector.load %arg22[%c2_87, %c0_88, %c0_89] : memref<8x2x32xf32, #tpu.memory_space<vmem>>, vector<1x2x32xf32>
    %260 = vector.shape_cast %259 : vector<1x2x32xf32> to vector<2x32xf32>
    %261 = vector.shape_cast %258 : vector<2x32xf32> to vector<1x2x32xf32>
    tpu.vector_store %arg22[%c2_87, %c0_88, %c0_89], %261 {strides = array<i32>} : memref<8x2x32xf32, #tpu.memory_space<vmem>>, vector<1x2x32xf32>,
    %262 = vector.broadcast %196 : vector<2x1xf32> to vector<2x32xf32>
    %263 = arith.mulf %262, %256 : vector<2x32xf32>
    %c2_90 = arith.constant 2 : index
    %c0_91 = arith.constant 0 : index
    %c0_92 = arith.constant 0 : index
    %264 = vector.load %arg23[%c2_90, %c0_91, %c0_92] : memref<8x2x32xf32, #tpu.memory_space<vmem>>, vector<1x2x32xf32>
    %265 = vector.shape_cast %264 : vector<1x2x32xf32> to vector<2x32xf32>
    %266 = vector.shape_cast %263 : vector<2x32xf32> to vector<1x2x32xf32>
    tpu.vector_store %arg23[%c2_90, %c0_91, %c0_92], %266 {strides = array<i32>} : memref<8x2x32xf32, #tpu.memory_space<vmem>>, vector<1x2x32xf32>,
    %267 = vector.broadcast %196 : vector<2x1xf32> to vector<2x32xf32>
    %268 = arith.mulf %267, %228 : vector<2x32xf32>
    %cst_93 = arith.constant 1.000000e+00 : f32
    %269 = vector.broadcast %cst_93 : f32 to vector<2x1xf32>
    %270 = arith.subf %269, %196 : vector<2x1xf32>
    %271 = vector.broadcast %270 : vector<2x1xf32> to vector<2x32xf32>
    %272 = arith.mulf %271, %187 : vector<2x32xf32>
    %273 = arith.addf %268, %272 : vector<2x32xf32>
    %274 = vector.broadcast %196 : vector<2x1xf32> to vector<2x32xf32>
    %275 = arith.mulf %274, %256 : vector<2x32xf32>
    %cst_94 = arith.constant 1.000000e+00 : f32
    %276 = vector.broadcast %cst_94 : f32 to vector<2x1xf32>
    %277 = arith.subf %276, %196 : vector<2x1xf32>
    %278 = vector.broadcast %277 : vector<2x1xf32> to vector<2x32xf32>
    %279 = arith.mulf %278, %194 : vector<2x32xf32>
    %280 = arith.addf %275, %279 : vector<2x32xf32>
    %c3 = arith.constant 3 : index
    %c0_95 = arith.constant 0 : index
    %c0_96 = arith.constant 0 : index
    %281 = vector.load %arg1[%c3, %c0_95, %c0_96] : memref<8x2x1xf32, #tpu.memory_space<vmem>>, vector<1x2x1xf32>
    %282 = vector.shape_cast %281 : vector<1x2x1xf32> to vector<2x1xf32>
    %cst_97 = arith.constant dense<0.000000e+00> : vector<2x96xf32>
    %283 = tpu.matmul %273, %13, %cst_97 {dimension_numbers = #tpu.dot_dimension_numbers<[1], [0], [0], [1], [0, 0, 1, 1], [], []>} : vector<2x32xf32>, vector<32x96xf32>, vector<2x96xf32> -> vector<2x96xf32>
    %284 = arith.addf %283, %17 : vector<2x96xf32>
    %cst_98 = arith.constant dense<0.000000e+00> : vector<2x96xf32>
    %285 = tpu.matmul %280, %14, %cst_98 {dimension_numbers = #tpu.dot_dimension_numbers<[1], [0], [0], [1], [0, 0, 1, 1], [], []>} : vector<2x32xf32>, vector<32x96xf32>, vector<2x96xf32> -> vector<2x96xf32>
    %286 = arith.addf %285, %20 : vector<2x96xf32>
    %c3_99 = arith.constant 3 : index
    %c0_100 = arith.constant 0 : index
    %c0_101 = arith.constant 0 : index
    %287 = vector.load %arg20[%c3_99, %c0_100, %c0_101] : memref<8x2x96xf32, #tpu.memory_space<vmem>>, vector<1x2x96xf32>
    %288 = vector.shape_cast %287 : vector<1x2x96xf32> to vector<2x96xf32>
    %289 = vector.extract_strided_slice %288 {offsets = [0, 0], sizes = [2, 32], strides = [1, 1]} : vector<2x96xf32> to vector<2x32xf32>
    %290 = vector.extract_strided_slice %284 {offsets = [0, 0], sizes = [2, 32], strides = [1, 1]} : vector<2x96xf32> to vector<2x32xf32>
    %291 = arith.addf %289, %290 : vector<2x32xf32>
    %292 = arith.negf %291 : vector<2x32xf32>
    %293 = math.exp %292 : vector<2x32xf32>
    %cst_102 = arith.constant 1.000000e+00 : f32
    %294 = vector.broadcast %cst_102 : f32 to vector<2x32xf32>
    %295 = arith.addf %294, %293 : vector<2x32xf32>
    %296 = arith.divf %294, %295 : vector<2x32xf32>
    %297 = vector.extract_strided_slice %288 {offsets = [0, 32], sizes = [2, 32], strides = [1, 1]} : vector<2x96xf32> to vector<2x32xf32>
    %298 = vector.extract_strided_slice %284 {offsets = [0, 32], sizes = [2, 32], strides = [1, 1]} : vector<2x96xf32> to vector<2x32xf32>
    %299 = arith.addf %297, %298 : vector<2x32xf32>
    %300 = arith.negf %299 : vector<2x32xf32>
    %301 = math.exp %300 : vector<2x32xf32>
    %cst_103 = arith.constant 1.000000e+00 : f32
    %302 = vector.broadcast %cst_103 : f32 to vector<2x32xf32>
    %303 = arith.addf %302, %301 : vector<2x32xf32>
    %304 = arith.divf %302, %303 : vector<2x32xf32>
    %305 = vector.extract_strided_slice %288 {offsets = [0, 64], sizes = [2, 32], strides = [1, 1]} : vector<2x96xf32> to vector<2x32xf32>
    %306 = vector.extract_strided_slice %284 {offsets = [0, 64], sizes = [2, 32], strides = [1, 1]} : vector<2x96xf32> to vector<2x32xf32>
    %307 = arith.mulf %296, %306 : vector<2x32xf32>
    %308 = arith.addf %305, %307 : vector<2x32xf32>
    %309 = math.tanh %308 : vector<2x32xf32>
    %cst_104 = arith.constant 1.000000e+00 : f32
    %310 = vector.broadcast %cst_104 : f32 to vector<2x32xf32>
    %311 = arith.subf %310, %304 : vector<2x32xf32>
    %312 = arith.mulf %311, %309 : vector<2x32xf32>
    %313 = arith.mulf %304, %273 : vector<2x32xf32>
    %314 = arith.addf %312, %313 : vector<2x32xf32>
    %c3_105 = arith.constant 3 : index
    %c0_106 = arith.constant 0 : index
    %c0_107 = arith.constant 0 : index
    %315 = vector.load %arg21[%c3_105, %c0_106, %c0_107] : memref<8x2x96xf32, #tpu.memory_space<vmem>>, vector<1x2x96xf32>
    %316 = vector.shape_cast %315 : vector<1x2x96xf32> to vector<2x96xf32>
    %317 = vector.extract_strided_slice %316 {offsets = [0, 0], sizes = [2, 32], strides = [1, 1]} : vector<2x96xf32> to vector<2x32xf32>
    %318 = vector.extract_strided_slice %286 {offsets = [0, 0], sizes = [2, 32], strides = [1, 1]} : vector<2x96xf32> to vector<2x32xf32>
    %319 = arith.addf %317, %318 : vector<2x32xf32>
    %320 = arith.negf %319 : vector<2x32xf32>
    %321 = math.exp %320 : vector<2x32xf32>
    %cst_108 = arith.constant 1.000000e+00 : f32
    %322 = vector.broadcast %cst_108 : f32 to vector<2x32xf32>
    %323 = arith.addf %322, %321 : vector<2x32xf32>
    %324 = arith.divf %322, %323 : vector<2x32xf32>
    %325 = vector.extract_strided_slice %316 {offsets = [0, 32], sizes = [2, 32], strides = [1, 1]} : vector<2x96xf32> to vector<2x32xf32>
    %326 = vector.extract_strided_slice %286 {offsets = [0, 32], sizes = [2, 32], strides = [1, 1]} : vector<2x96xf32> to vector<2x32xf32>
    %327 = arith.addf %325, %326 : vector<2x32xf32>
    %328 = arith.negf %327 : vector<2x32xf32>
    %329 = math.exp %328 : vector<2x32xf32>
    %cst_109 = arith.constant 1.000000e+00 : f32
    %330 = vector.broadcast %cst_109 : f32 to vector<2x32xf32>
    %331 = arith.addf %330, %329 : vector<2x32xf32>
    %332 = arith.divf %330, %331 : vector<2x32xf32>
    %333 = vector.extract_strided_slice %316 {offsets = [0, 64], sizes = [2, 32], strides = [1, 1]} : vector<2x96xf32> to vector<2x32xf32>
    %334 = vector.extract_strided_slice %286 {offsets = [0, 64], sizes = [2, 32], strides = [1, 1]} : vector<2x96xf32> to vector<2x32xf32>
    %335 = arith.mulf %324, %334 : vector<2x32xf32>
    %336 = arith.addf %333, %335 : vector<2x32xf32>
    %337 = math.tanh %336 : vector<2x32xf32>
    %cst_110 = arith.constant 1.000000e+00 : f32
    %338 = vector.broadcast %cst_110 : f32 to vector<2x32xf32>
    %339 = arith.subf %338, %332 : vector<2x32xf32>
    %340 = arith.mulf %339, %337 : vector<2x32xf32>
    %341 = arith.mulf %332, %280 : vector<2x32xf32>
    %342 = arith.addf %340, %341 : vector<2x32xf32>
    %343 = vector.broadcast %282 : vector<2x1xf32> to vector<2x32xf32>
    %344 = arith.mulf %343, %314 : vector<2x32xf32>
    %c3_111 = arith.constant 3 : index
    %c0_112 = arith.constant 0 : index
    %c0_113 = arith.constant 0 : index
    %345 = vector.load %arg22[%c3_111, %c0_112, %c0_113] : memref<8x2x32xf32, #tpu.memory_space<vmem>>, vector<1x2x32xf32>
    %346 = vector.shape_cast %345 : vector<1x2x32xf32> to vector<2x32xf32>
    %347 = vector.shape_cast %344 : vector<2x32xf32> to vector<1x2x32xf32>
    tpu.vector_store %arg22[%c3_111, %c0_112, %c0_113], %347 {strides = array<i32>} : memref<8x2x32xf32, #tpu.memory_space<vmem>>, vector<1x2x32xf32>,
    %348 = vector.broadcast %282 : vector<2x1xf32> to vector<2x32xf32>
    %349 = arith.mulf %348, %342 : vector<2x32xf32>
    %c3_114 = arith.constant 3 : index
    %c0_115 = arith.constant 0 : index
    %c0_116 = arith.constant 0 : index
    %350 = vector.load %arg23[%c3_114, %c0_115, %c0_116] : memref<8x2x32xf32, #tpu.memory_space<vmem>>, vector<1x2x32xf32>
    %351 = vector.shape_cast %350 : vector<1x2x32xf32> to vector<2x32xf32>
    %352 = vector.shape_cast %349 : vector<2x32xf32> to vector<1x2x32xf32>
    tpu.vector_store %arg23[%c3_114, %c0_115, %c0_116], %352 {strides = array<i32>} : memref<8x2x32xf32, #tpu.memory_space<vmem>>, vector<1x2x32xf32>,
    %353 = vector.broadcast %282 : vector<2x1xf32> to vector<2x32xf32>
    %354 = arith.mulf %353, %314 : vector<2x32xf32>
    %cst_117 = arith.constant 1.000000e+00 : f32
    %355 = vector.broadcast %cst_117 : f32 to vector<2x1xf32>
    %356 = arith.subf %355, %282 : vector<2x1xf32>
    %357 = vector.broadcast %356 : vector<2x1xf32> to vector<2x32xf32>
    %358 = arith.mulf %357, %273 : vector<2x32xf32>
    %359 = arith.addf %354, %358 : vector<2x32xf32>
    %360 = vector.broadcast %282 : vector<2x1xf32> to vector<2x32xf32>
    %361 = arith.mulf %360, %342 : vector<2x32xf32>
    %cst_118 = arith.constant 1.000000e+00 : f32
    %362 = vector.broadcast %cst_118 : f32 to vector<2x1xf32>
    %363 = arith.subf %362, %282 : vector<2x1xf32>
    %364 = vector.broadcast %363 : vector<2x1xf32> to vector<2x32xf32>
    %365 = arith.mulf %364, %280 : vector<2x32xf32>
    %366 = arith.addf %361, %365 : vector<2x32xf32>
    %c4 = arith.constant 4 : index
    %c0_119 = arith.constant 0 : index
    %c0_120 = arith.constant 0 : index
    %367 = vector.load %arg1[%c4, %c0_119, %c0_120] : memref<8x2x1xf32, #tpu.memory_space<vmem>>, vector<1x2x1xf32>
    %368 = vector.shape_cast %367 : vector<1x2x1xf32> to vector<2x1xf32>
    %cst_121 = arith.constant dense<0.000000e+00> : vector<2x96xf32>
    %369 = tpu.matmul %359, %13, %cst_121 {dimension_numbers = #tpu.dot_dimension_numbers<[1], [0], [0], [1], [0, 0, 1, 1], [], []>} : vector<2x32xf32>, vector<32x96xf32>, vector<2x96xf32> -> vector<2x96xf32>
    %370 = arith.addf %369, %17 : vector<2x96xf32>
    %cst_122 = arith.constant dense<0.000000e+00> : vector<2x96xf32>
    %371 = tpu.matmul %366, %14, %cst_122 {dimension_numbers = #tpu.dot_dimension_numbers<[1], [0], [0], [1], [0, 0, 1, 1], [], []>} : vector<2x32xf32>, vector<32x96xf32>, vector<2x96xf32> -> vector<2x96xf32>
    %372 = arith.addf %371, %20 : vector<2x96xf32>
    %c4_123 = arith.constant 4 : index
    %c0_124 = arith.constant 0 : index
    %c0_125 = arith.constant 0 : index
    %373 = vector.load %arg20[%c4_123, %c0_124, %c0_125] : memref<8x2x96xf32, #tpu.memory_space<vmem>>, vector<1x2x96xf32>
    %374 = vector.shape_cast %373 : vector<1x2x96xf32> to vector<2x96xf32>
    %375 = vector.extract_strided_slice %374 {offsets = [0, 0], sizes = [2, 32], strides = [1, 1]} : vector<2x96xf32> to vector<2x32xf32>
    %376 = vector.extract_strided_slice %370 {offsets = [0, 0], sizes = [2, 32], strides = [1, 1]} : vector<2x96xf32> to vector<2x32xf32>
    %377 = arith.addf %375, %376 : vector<2x32xf32>
    %378 = arith.negf %377 : vector<2x32xf32>
    %379 = math.exp %378 : vector<2x32xf32>
    %cst_126 = arith.constant 1.000000e+00 : f32
    %380 = vector.broadcast %cst_126 : f32 to vector<2x32xf32>
    %381 = arith.addf %380, %379 : vector<2x32xf32>
    %382 = arith.divf %380, %381 : vector<2x32xf32>
    %383 = vector.extract_strided_slice %374 {offsets = [0, 32], sizes = [2, 32], strides = [1, 1]} : vector<2x96xf32> to vector<2x32xf32>
    %384 = vector.extract_strided_slice %370 {offsets = [0, 32], sizes = [2, 32], strides = [1, 1]} : vector<2x96xf32> to vector<2x32xf32>
    %385 = arith.addf %383, %384 : vector<2x32xf32>
    %386 = arith.negf %385 : vector<2x32xf32>
    %387 = math.exp %386 : vector<2x32xf32>
    %cst_127 = arith.constant 1.000000e+00 : f32
    %388 = vector.broadcast %cst_127 : f32 to vector<2x32xf32>
    %389 = arith.addf %388, %387 : vector<2x32xf32>
    %390 = arith.divf %388, %389 : vector<2x32xf32>
    %391 = vector.extract_strided_slice %374 {offsets = [0, 64], sizes = [2, 32], strides = [1, 1]} : vector<2x96xf32> to vector<2x32xf32>
    %392 = vector.extract_strided_slice %370 {offsets = [0, 64], sizes = [2, 32], strides = [1, 1]} : vector<2x96xf32> to vector<2x32xf32>
    %393 = arith.mulf %382, %392 : vector<2x32xf32>
    %394 = arith.addf %391, %393 : vector<2x32xf32>
    %395 = math.tanh %394 : vector<2x32xf32>
    %cst_128 = arith.constant 1.000000e+00 : f32
    %396 = vector.broadcast %cst_128 : f32 to vector<2x32xf32>
    %397 = arith.subf %396, %390 : vector<2x32xf32>
    %398 = arith.mulf %397, %395 : vector<2x32xf32>
    %399 = arith.mulf %390, %359 : vector<2x32xf32>
    %400 = arith.addf %398, %399 : vector<2x32xf32>
    %c4_129 = arith.constant 4 : index
    %c0_130 = arith.constant 0 : index
    %c0_131 = arith.constant 0 : index
    %401 = vector.load %arg21[%c4_129, %c0_130, %c0_131] : memref<8x2x96xf32, #tpu.memory_space<vmem>>, vector<1x2x96xf32>
    %402 = vector.shape_cast %401 : vector<1x2x96xf32> to vector<2x96xf32>
    %403 = vector.extract_strided_slice %402 {offsets = [0, 0], sizes = [2, 32], strides = [1, 1]} : vector<2x96xf32> to vector<2x32xf32>
    %404 = vector.extract_strided_slice %372 {offsets = [0, 0], sizes = [2, 32], strides = [1, 1]} : vector<2x96xf32> to vector<2x32xf32>
    %405 = arith.addf %403, %404 : vector<2x32xf32>
    %406 = arith.negf %405 : vector<2x32xf32>
    %407 = math.exp %406 : vector<2x32xf32>
    %cst_132 = arith.constant 1.000000e+00 : f32
    %408 = vector.broadcast %cst_132 : f32 to vector<2x32xf32>
    %409 = arith.addf %408, %407 : vector<2x32xf32>
    %410 = arith.divf %408, %409 : vector<2x32xf32>
    %411 = vector.extract_strided_slice %402 {offsets = [0, 32], sizes = [2, 32], strides = [1, 1]} : vector<2x96xf32> to vector<2x32xf32>
    %412 = vector.extract_strided_slice %372 {offsets = [0, 32], sizes = [2, 32], strides = [1, 1]} : vector<2x96xf32> to vector<2x32xf32>
    %413 = arith.addf %411, %412 : vector<2x32xf32>
    %414 = arith.negf %413 : vector<2x32xf32>
    %415 = math.exp %414 : vector<2x32xf32>
    %cst_133 = arith.constant 1.000000e+00 : f32
    %416 = vector.broadcast %cst_133 : f32 to vector<2x32xf32>
    %417 = arith.addf %416, %415 : vector<2x32xf32>
    %418 = arith.divf %416, %417 : vector<2x32xf32>
    %419 = vector.extract_strided_slice %402 {offsets = [0, 64], sizes = [2, 32], strides = [1, 1]} : vector<2x96xf32> to vector<2x32xf32>
    %420 = vector.extract_strided_slice %372 {offsets = [0, 64], sizes = [2, 32], strides = [1, 1]} : vector<2x96xf32> to vector<2x32xf32>
    %421 = arith.mulf %410, %420 : vector<2x32xf32>
    %422 = arith.addf %419, %421 : vector<2x32xf32>
    %423 = math.tanh %422 : vector<2x32xf32>
    %cst_134 = arith.constant 1.000000e+00 : f32
    %424 = vector.broadcast %cst_134 : f32 to vector<2x32xf32>
    %425 = arith.subf %424, %418 : vector<2x32xf32>
    %426 = arith.mulf %425, %423 : vector<2x32xf32>
    %427 = arith.mulf %418, %366 : vector<2x32xf32>
    %428 = arith.addf %426, %427 : vector<2x32xf32>
    %429 = vector.broadcast %368 : vector<2x1xf32> to vector<2x32xf32>
    %430 = arith.mulf %429, %400 : vector<2x32xf32>
    %c4_135 = arith.constant 4 : index
    %c0_136 = arith.constant 0 : index
    %c0_137 = arith.constant 0 : index
    %431 = vector.load %arg22[%c4_135, %c0_136, %c0_137] : memref<8x2x32xf32, #tpu.memory_space<vmem>>, vector<1x2x32xf32>
    %432 = vector.shape_cast %431 : vector<1x2x32xf32> to vector<2x32xf32>
    %433 = vector.shape_cast %430 : vector<2x32xf32> to vector<1x2x32xf32>
    tpu.vector_store %arg22[%c4_135, %c0_136, %c0_137], %433 {strides = array<i32>} : memref<8x2x32xf32, #tpu.memory_space<vmem>>, vector<1x2x32xf32>,
    %434 = vector.broadcast %368 : vector<2x1xf32> to vector<2x32xf32>
    %435 = arith.mulf %434, %428 : vector<2x32xf32>
    %c4_138 = arith.constant 4 : index
    %c0_139 = arith.constant 0 : index
    %c0_140 = arith.constant 0 : index
    %436 = vector.load %arg23[%c4_138, %c0_139, %c0_140] : memref<8x2x32xf32, #tpu.memory_space<vmem>>, vector<1x2x32xf32>
    %437 = vector.shape_cast %436 : vector<1x2x32xf32> to vector<2x32xf32>
    %438 = vector.shape_cast %435 : vector<2x32xf32> to vector<1x2x32xf32>
    tpu.vector_store %arg23[%c4_138, %c0_139, %c0_140], %438 {strides = array<i32>} : memref<8x2x32xf32, #tpu.memory_space<vmem>>, vector<1x2x32xf32>,
    %439 = vector.broadcast %368 : vector<2x1xf32> to vector<2x32xf32>
    %440 = arith.mulf %439, %400 : vector<2x32xf32>
    %cst_141 = arith.constant 1.000000e+00 : f32
    %441 = vector.broadcast %cst_141 : f32 to vector<2x1xf32>
    %442 = arith.subf %441, %368 : vector<2x1xf32>
    %443 = vector.broadcast %442 : vector<2x1xf32> to vector<2x32xf32>
    %444 = arith.mulf %443, %359 : vector<2x32xf32>
    %445 = arith.addf %440, %444 : vector<2x32xf32>
    %446 = vector.broadcast %368 : vector<2x1xf32> to vector<2x32xf32>
    %447 = arith.mulf %446, %428 : vector<2x32xf32>
    %cst_142 = arith.constant 1.000000e+00 : f32
    %448 = vector.broadcast %cst_142 : f32 to vector<2x1xf32>
    %449 = arith.subf %448, %368 : vector<2x1xf32>
    %450 = vector.broadcast %449 : vector<2x1xf32> to vector<2x32xf32>
    %451 = arith.mulf %450, %366 : vector<2x32xf32>
    %452 = arith.addf %447, %451 : vector<2x32xf32>
    %c5 = arith.constant 5 : index
    %c0_143 = arith.constant 0 : index
    %c0_144 = arith.constant 0 : index
    %453 = vector.load %arg1[%c5, %c0_143, %c0_144] : memref<8x2x1xf32, #tpu.memory_space<vmem>>, vector<1x2x1xf32>
    %454 = vector.shape_cast %453 : vector<1x2x1xf32> to vector<2x1xf32>
    %cst_145 = arith.constant dense<0.000000e+00> : vector<2x96xf32>
    %455 = tpu.matmul %445, %13, %cst_145 {dimension_numbers = #tpu.dot_dimension_numbers<[1], [0], [0], [1], [0, 0, 1, 1], [], []>} : vector<2x32xf32>, vector<32x96xf32>, vector<2x96xf32> -> vector<2x96xf32>
    %456 = arith.addf %455, %17 : vector<2x96xf32>
    %cst_146 = arith.constant dense<0.000000e+00> : vector<2x96xf32>
    %457 = tpu.matmul %452, %14, %cst_146 {dimension_numbers = #tpu.dot_dimension_numbers<[1], [0], [0], [1], [0, 0, 1, 1], [], []>} : vector<2x32xf32>, vector<32x96xf32>, vector<2x96xf32> -> vector<2x96xf32>
    %458 = arith.addf %457, %20 : vector<2x96xf32>
    %c5_147 = arith.constant 5 : index
    %c0_148 = arith.constant 0 : index
    %c0_149 = arith.constant 0 : index
    %459 = vector.load %arg20[%c5_147, %c0_148, %c0_149] : memref<8x2x96xf32, #tpu.memory_space<vmem>>, vector<1x2x96xf32>
    %460 = vector.shape_cast %459 : vector<1x2x96xf32> to vector<2x96xf32>
    %461 = vector.extract_strided_slice %460 {offsets = [0, 0], sizes = [2, 32], strides = [1, 1]} : vector<2x96xf32> to vector<2x32xf32>
    %462 = vector.extract_strided_slice %456 {offsets = [0, 0], sizes = [2, 32], strides = [1, 1]} : vector<2x96xf32> to vector<2x32xf32>
    %463 = arith.addf %461, %462 : vector<2x32xf32>
    %464 = arith.negf %463 : vector<2x32xf32>
    %465 = math.exp %464 : vector<2x32xf32>
    %cst_150 = arith.constant 1.000000e+00 : f32
    %466 = vector.broadcast %cst_150 : f32 to vector<2x32xf32>
    %467 = arith.addf %466, %465 : vector<2x32xf32>
    %468 = arith.divf %466, %467 : vector<2x32xf32>
    %469 = vector.extract_strided_slice %460 {offsets = [0, 32], sizes = [2, 32], strides = [1, 1]} : vector<2x96xf32> to vector<2x32xf32>
    %470 = vector.extract_strided_slice %456 {offsets = [0, 32], sizes = [2, 32], strides = [1, 1]} : vector<2x96xf32> to vector<2x32xf32>
    %471 = arith.addf %469, %470 : vector<2x32xf32>
    %472 = arith.negf %471 : vector<2x32xf32>
    %473 = math.exp %472 : vector<2x32xf32>
    %cst_151 = arith.constant 1.000000e+00 : f32
    %474 = vector.broadcast %cst_151 : f32 to vector<2x32xf32>
    %475 = arith.addf %474, %473 : vector<2x32xf32>
    %476 = arith.divf %474, %475 : vector<2x32xf32>
    %477 = vector.extract_strided_slice %460 {offsets = [0, 64], sizes = [2, 32], strides = [1, 1]} : vector<2x96xf32> to vector<2x32xf32>
    %478 = vector.extract_strided_slice %456 {offsets = [0, 64], sizes = [2, 32], strides = [1, 1]} : vector<2x96xf32> to vector<2x32xf32>
    %479 = arith.mulf %468, %478 : vector<2x32xf32>
    %480 = arith.addf %477, %479 : vector<2x32xf32>
    %481 = math.tanh %480 : vector<2x32xf32>
    %cst_152 = arith.constant 1.000000e+00 : f32
    %482 = vector.broadcast %cst_152 : f32 to vector<2x32xf32>
    %483 = arith.subf %482, %476 : vector<2x32xf32>
    %484 = arith.mulf %483, %481 : vector<2x32xf32>
    %485 = arith.mulf %476, %445 : vector<2x32xf32>
    %486 = arith.addf %484, %485 : vector<2x32xf32>
    %c5_153 = arith.constant 5 : index
    %c0_154 = arith.constant 0 : index
    %c0_155 = arith.constant 0 : index
    %487 = vector.load %arg21[%c5_153, %c0_154, %c0_155] : memref<8x2x96xf32, #tpu.memory_space<vmem>>, vector<1x2x96xf32>
    %488 = vector.shape_cast %487 : vector<1x2x96xf32> to vector<2x96xf32>
    %489 = vector.extract_strided_slice %488 {offsets = [0, 0], sizes = [2, 32], strides = [1, 1]} : vector<2x96xf32> to vector<2x32xf32>
    %490 = vector.extract_strided_slice %458 {offsets = [0, 0], sizes = [2, 32], strides = [1, 1]} : vector<2x96xf32> to vector<2x32xf32>
    %491 = arith.addf %489, %490 : vector<2x32xf32>
    %492 = arith.negf %491 : vector<2x32xf32>
    %493 = math.exp %492 : vector<2x32xf32>
    %cst_156 = arith.constant 1.000000e+00 : f32
    %494 = vector.broadcast %cst_156 : f32 to vector<2x32xf32>
    %495 = arith.addf %494, %493 : vector<2x32xf32>
    %496 = arith.divf %494, %495 : vector<2x32xf32>
    %497 = vector.extract_strided_slice %488 {offsets = [0, 32], sizes = [2, 32], strides = [1, 1]} : vector<2x96xf32> to vector<2x32xf32>
    %498 = vector.extract_strided_slice %458 {offsets = [0, 32], sizes = [2, 32], strides = [1, 1]} : vector<2x96xf32> to vector<2x32xf32>
    %499 = arith.addf %497, %498 : vector<2x32xf32>
    %500 = arith.negf %499 : vector<2x32xf32>
    %501 = math.exp %500 : vector<2x32xf32>
    %cst_157 = arith.constant 1.000000e+00 : f32
    %502 = vector.broadcast %cst_157 : f32 to vector<2x32xf32>
    %503 = arith.addf %502, %501 : vector<2x32xf32>
    %504 = arith.divf %502, %503 : vector<2x32xf32>
    %505 = vector.extract_strided_slice %488 {offsets = [0, 64], sizes = [2, 32], strides = [1, 1]} : vector<2x96xf32> to vector<2x32xf32>
    %506 = vector.extract_strided_slice %458 {offsets = [0, 64], sizes = [2, 32], strides = [1, 1]} : vector<2x96xf32> to vector<2x32xf32>
    %507 = arith.mulf %496, %506 : vector<2x32xf32>
    %508 = arith.addf %505, %507 : vector<2x32xf32>
    %509 = math.tanh %508 : vector<2x32xf32>
    %cst_158 = arith.constant 1.000000e+00 : f32
    %510 = vector.broadcast %cst_158 : f32 to vector<2x32xf32>
    %511 = arith.subf %510, %504 : vector<2x32xf32>
    %512 = arith.mulf %511, %509 : vector<2x32xf32>
    %513 = arith.mulf %504, %452 : vector<2x32xf32>
    %514 = arith.addf %512, %513 : vector<2x32xf32>
    %515 = vector.broadcast %454 : vector<2x1xf32> to vector<2x32xf32>
    %516 = arith.mulf %515, %486 : vector<2x32xf32>
    %c5_159 = arith.constant 5 : index
    %c0_160 = arith.constant 0 : index
    %c0_161 = arith.constant 0 : index
    %517 = vector.load %arg22[%c5_159, %c0_160, %c0_161] : memref<8x2x32xf32, #tpu.memory_space<vmem>>, vector<1x2x32xf32>
    %518 = vector.shape_cast %517 : vector<1x2x32xf32> to vector<2x32xf32>
    %519 = vector.shape_cast %516 : vector<2x32xf32> to vector<1x2x32xf32>
    tpu.vector_store %arg22[%c5_159, %c0_160, %c0_161], %519 {strides = array<i32>} : memref<8x2x32xf32, #tpu.memory_space<vmem>>, vector<1x2x32xf32>,
    %520 = vector.broadcast %454 : vector<2x1xf32> to vector<2x32xf32>
    %521 = arith.mulf %520, %514 : vector<2x32xf32>
    %c5_162 = arith.constant 5 : index
    %c0_163 = arith.constant 0 : index
    %c0_164 = arith.constant 0 : index
    %522 = vector.load %arg23[%c5_162, %c0_163, %c0_164] : memref<8x2x32xf32, #tpu.memory_space<vmem>>, vector<1x2x32xf32>
    %523 = vector.shape_cast %522 : vector<1x2x32xf32> to vector<2x32xf32>
    %524 = vector.shape_cast %521 : vector<2x32xf32> to vector<1x2x32xf32>
    tpu.vector_store %arg23[%c5_162, %c0_163, %c0_164], %524 {strides = array<i32>} : memref<8x2x32xf32, #tpu.memory_space<vmem>>, vector<1x2x32xf32>,
    %525 = vector.broadcast %454 : vector<2x1xf32> to vector<2x32xf32>
    %526 = arith.mulf %525, %486 : vector<2x32xf32>
    %cst_165 = arith.constant 1.000000e+00 : f32
    %527 = vector.broadcast %cst_165 : f32 to vector<2x1xf32>
    %528 = arith.subf %527, %454 : vector<2x1xf32>
    %529 = vector.broadcast %528 : vector<2x1xf32> to vector<2x32xf32>
    %530 = arith.mulf %529, %445 : vector<2x32xf32>
    %531 = arith.addf %526, %530 : vector<2x32xf32>
    %532 = vector.broadcast %454 : vector<2x1xf32> to vector<2x32xf32>
    %533 = arith.mulf %532, %514 : vector<2x32xf32>
    %cst_166 = arith.constant 1.000000e+00 : f32
    %534 = vector.broadcast %cst_166 : f32 to vector<2x1xf32>
    %535 = arith.subf %534, %454 : vector<2x1xf32>
    %536 = vector.broadcast %535 : vector<2x1xf32> to vector<2x32xf32>
    %537 = arith.mulf %536, %452 : vector<2x32xf32>
    %538 = arith.addf %533, %537 : vector<2x32xf32>
    %c6 = arith.constant 6 : index
    %c0_167 = arith.constant 0 : index
    %c0_168 = arith.constant 0 : index
    %539 = vector.load %arg1[%c6, %c0_167, %c0_168] : memref<8x2x1xf32, #tpu.memory_space<vmem>>, vector<1x2x1xf32>
    %540 = vector.shape_cast %539 : vector<1x2x1xf32> to vector<2x1xf32>
    %cst_169 = arith.constant dense<0.000000e+00> : vector<2x96xf32>
    %541 = tpu.matmul %531, %13, %cst_169 {dimension_numbers = #tpu.dot_dimension_numbers<[1], [0], [0], [1], [0, 0, 1, 1], [], []>} : vector<2x32xf32>, vector<32x96xf32>, vector<2x96xf32> -> vector<2x96xf32>
    %542 = arith.addf %541, %17 : vector<2x96xf32>
    %cst_170 = arith.constant dense<0.000000e+00> : vector<2x96xf32>
    %543 = tpu.matmul %538, %14, %cst_170 {dimension_numbers = #tpu.dot_dimension_numbers<[1], [0], [0], [1], [0, 0, 1, 1], [], []>} : vector<2x32xf32>, vector<32x96xf32>, vector<2x96xf32> -> vector<2x96xf32>
    %544 = arith.addf %543, %20 : vector<2x96xf32>
    %c6_171 = arith.constant 6 : index
    %c0_172 = arith.constant 0 : index
    %c0_173 = arith.constant 0 : index
    %545 = vector.load %arg20[%c6_171, %c0_172, %c0_173] : memref<8x2x96xf32, #tpu.memory_space<vmem>>, vector<1x2x96xf32>
    %546 = vector.shape_cast %545 : vector<1x2x96xf32> to vector<2x96xf32>
    %547 = vector.extract_strided_slice %546 {offsets = [0, 0], sizes = [2, 32], strides = [1, 1]} : vector<2x96xf32> to vector<2x32xf32>
    %548 = vector.extract_strided_slice %542 {offsets = [0, 0], sizes = [2, 32], strides = [1, 1]} : vector<2x96xf32> to vector<2x32xf32>
    %549 = arith.addf %547, %548 : vector<2x32xf32>
    %550 = arith.negf %549 : vector<2x32xf32>
    %551 = math.exp %550 : vector<2x32xf32>
    %cst_174 = arith.constant 1.000000e+00 : f32
    %552 = vector.broadcast %cst_174 : f32 to vector<2x32xf32>
    %553 = arith.addf %552, %551 : vector<2x32xf32>
    %554 = arith.divf %552, %553 : vector<2x32xf32>
    %555 = vector.extract_strided_slice %546 {offsets = [0, 32], sizes = [2, 32], strides = [1, 1]} : vector<2x96xf32> to vector<2x32xf32>
    %556 = vector.extract_strided_slice %542 {offsets = [0, 32], sizes = [2, 32], strides = [1, 1]} : vector<2x96xf32> to vector<2x32xf32>
    %557 = arith.addf %555, %556 : vector<2x32xf32>
    %558 = arith.negf %557 : vector<2x32xf32>
    %559 = math.exp %558 : vector<2x32xf32>
    %cst_175 = arith.constant 1.000000e+00 : f32
    %560 = vector.broadcast %cst_175 : f32 to vector<2x32xf32>
    %561 = arith.addf %560, %559 : vector<2x32xf32>
    %562 = arith.divf %560, %561 : vector<2x32xf32>
    %563 = vector.extract_strided_slice %546 {offsets = [0, 64], sizes = [2, 32], strides = [1, 1]} : vector<2x96xf32> to vector<2x32xf32>
    %564 = vector.extract_strided_slice %542 {offsets = [0, 64], sizes = [2, 32], strides = [1, 1]} : vector<2x96xf32> to vector<2x32xf32>
    %565 = arith.mulf %554, %564 : vector<2x32xf32>
    %566 = arith.addf %563, %565 : vector<2x32xf32>
    %567 = math.tanh %566 : vector<2x32xf32>
    %cst_176 = arith.constant 1.000000e+00 : f32
    %568 = vector.broadcast %cst_176 : f32 to vector<2x32xf32>
    %569 = arith.subf %568, %562 : vector<2x32xf32>
    %570 = arith.mulf %569, %567 : vector<2x32xf32>
    %571 = arith.mulf %562, %531 : vector<2x32xf32>
    %572 = arith.addf %570, %571 : vector<2x32xf32>
    %c6_177 = arith.constant 6 : index
    %c0_178 = arith.constant 0 : index
    %c0_179 = arith.constant 0 : index
    %573 = vector.load %arg21[%c6_177, %c0_178, %c0_179] : memref<8x2x96xf32, #tpu.memory_space<vmem>>, vector<1x2x96xf32>
    %574 = vector.shape_cast %573 : vector<1x2x96xf32> to vector<2x96xf32>
    %575 = vector.extract_strided_slice %574 {offsets = [0, 0], sizes = [2, 32], strides = [1, 1]} : vector<2x96xf32> to vector<2x32xf32>
    %576 = vector.extract_strided_slice %544 {offsets = [0, 0], sizes = [2, 32], strides = [1, 1]} : vector<2x96xf32> to vector<2x32xf32>
    %577 = arith.addf %575, %576 : vector<2x32xf32>
    %578 = arith.negf %577 : vector<2x32xf32>
    %579 = math.exp %578 : vector<2x32xf32>
    %cst_180 = arith.constant 1.000000e+00 : f32
    %580 = vector.broadcast %cst_180 : f32 to vector<2x32xf32>
    %581 = arith.addf %580, %579 : vector<2x32xf32>
    %582 = arith.divf %580, %581 : vector<2x32xf32>
    %583 = vector.extract_strided_slice %574 {offsets = [0, 32], sizes = [2, 32], strides = [1, 1]} : vector<2x96xf32> to vector<2x32xf32>
    %584 = vector.extract_strided_slice %544 {offsets = [0, 32], sizes = [2, 32], strides = [1, 1]} : vector<2x96xf32> to vector<2x32xf32>
    %585 = arith.addf %583, %584 : vector<2x32xf32>
    %586 = arith.negf %585 : vector<2x32xf32>
    %587 = math.exp %586 : vector<2x32xf32>
    %cst_181 = arith.constant 1.000000e+00 : f32
    %588 = vector.broadcast %cst_181 : f32 to vector<2x32xf32>
    %589 = arith.addf %588, %587 : vector<2x32xf32>
    %590 = arith.divf %588, %589 : vector<2x32xf32>
    %591 = vector.extract_strided_slice %574 {offsets = [0, 64], sizes = [2, 32], strides = [1, 1]} : vector<2x96xf32> to vector<2x32xf32>
    %592 = vector.extract_strided_slice %544 {offsets = [0, 64], sizes = [2, 32], strides = [1, 1]} : vector<2x96xf32> to vector<2x32xf32>
    %593 = arith.mulf %582, %592 : vector<2x32xf32>
    %594 = arith.addf %591, %593 : vector<2x32xf32>
    %595 = math.tanh %594 : vector<2x32xf32>
    %cst_182 = arith.constant 1.000000e+00 : f32
    %596 = vector.broadcast %cst_182 : f32 to vector<2x32xf32>
    %597 = arith.subf %596, %590 : vector<2x32xf32>
    %598 = arith.mulf %597, %595 : vector<2x32xf32>
    %599 = arith.mulf %590, %538 : vector<2x32xf32>
    %600 = arith.addf %598, %599 : vector<2x32xf32>
    %601 = vector.broadcast %540 : vector<2x1xf32> to vector<2x32xf32>
    %602 = arith.mulf %601, %572 : vector<2x32xf32>
    %c6_183 = arith.constant 6 : index
    %c0_184 = arith.constant 0 : index
    %c0_185 = arith.constant 0 : index
    %603 = vector.load %arg22[%c6_183, %c0_184, %c0_185] : memref<8x2x32xf32, #tpu.memory_space<vmem>>, vector<1x2x32xf32>
    %604 = vector.shape_cast %603 : vector<1x2x32xf32> to vector<2x32xf32>
    %605 = vector.shape_cast %602 : vector<2x32xf32> to vector<1x2x32xf32>
    tpu.vector_store %arg22[%c6_183, %c0_184, %c0_185], %605 {strides = array<i32>} : memref<8x2x32xf32, #tpu.memory_space<vmem>>, vector<1x2x32xf32>,
    %606 = vector.broadcast %540 : vector<2x1xf32> to vector<2x32xf32>
    %607 = arith.mulf %606, %600 : vector<2x32xf32>
    %c6_186 = arith.constant 6 : index
    %c0_187 = arith.constant 0 : index
    %c0_188 = arith.constant 0 : index
    %608 = vector.load %arg23[%c6_186, %c0_187, %c0_188] : memref<8x2x32xf32, #tpu.memory_space<vmem>>, vector<1x2x32xf32>
    %609 = vector.shape_cast %608 : vector<1x2x32xf32> to vector<2x32xf32>
    %610 = vector.shape_cast %607 : vector<2x32xf32> to vector<1x2x32xf32>
    tpu.vector_store %arg23[%c6_186, %c0_187, %c0_188], %610 {strides = array<i32>} : memref<8x2x32xf32, #tpu.memory_space<vmem>>, vector<1x2x32xf32>,
    %611 = vector.broadcast %540 : vector<2x1xf32> to vector<2x32xf32>
    %612 = arith.mulf %611, %572 : vector<2x32xf32>
    %cst_189 = arith.constant 1.000000e+00 : f32
    %613 = vector.broadcast %cst_189 : f32 to vector<2x1xf32>
    %614 = arith.subf %613, %540 : vector<2x1xf32>
    %615 = vector.broadcast %614 : vector<2x1xf32> to vector<2x32xf32>
    %616 = arith.mulf %615, %531 : vector<2x32xf32>
    %617 = arith.addf %612, %616 : vector<2x32xf32>
    %618 = vector.broadcast %540 : vector<2x1xf32> to vector<2x32xf32>
    %619 = arith.mulf %618, %600 : vector<2x32xf32>
    %cst_190 = arith.constant 1.000000e+00 : f32
    %620 = vector.broadcast %cst_190 : f32 to vector<2x1xf32>
    %621 = arith.subf %620, %540 : vector<2x1xf32>
    %622 = vector.broadcast %621 : vector<2x1xf32> to vector<2x32xf32>
    %623 = arith.mulf %622, %538 : vector<2x32xf32>
    %624 = arith.addf %619, %623 : vector<2x32xf32>
    %c7 = arith.constant 7 : index
    %c0_191 = arith.constant 0 : index
    %c0_192 = arith.constant 0 : index
    %625 = vector.load %arg1[%c7, %c0_191, %c0_192] : memref<8x2x1xf32, #tpu.memory_space<vmem>>, vector<1x2x1xf32>
    %626 = vector.shape_cast %625 : vector<1x2x1xf32> to vector<2x1xf32>
    %cst_193 = arith.constant dense<0.000000e+00> : vector<2x96xf32>
    %627 = tpu.matmul %617, %13, %cst_193 {dimension_numbers = #tpu.dot_dimension_numbers<[1], [0], [0], [1], [0, 0, 1, 1], [], []>} : vector<2x32xf32>, vector<32x96xf32>, vector<2x96xf32> -> vector<2x96xf32>
    %628 = arith.addf %627, %17 : vector<2x96xf32>
    %cst_194 = arith.constant dense<0.000000e+00> : vector<2x96xf32>
    %629 = tpu.matmul %624, %14, %cst_194 {dimension_numbers = #tpu.dot_dimension_numbers<[1], [0], [0], [1], [0, 0, 1, 1], [], []>} : vector<2x32xf32>, vector<32x96xf32>, vector<2x96xf32> -> vector<2x96xf32>
    %630 = arith.addf %629, %20 : vector<2x96xf32>
    %c7_195 = arith.constant 7 : index
    %c0_196 = arith.constant 0 : index
    %c0_197 = arith.constant 0 : index
    %631 = vector.load %arg20[%c7_195, %c0_196, %c0_197] : memref<8x2x96xf32, #tpu.memory_space<vmem>>, vector<1x2x96xf32>
    %632 = vector.shape_cast %631 : vector<1x2x96xf32> to vector<2x96xf32>
    %633 = vector.extract_strided_slice %632 {offsets = [0, 0], sizes = [2, 32], strides = [1, 1]} : vector<2x96xf32> to vector<2x32xf32>
    %634 = vector.extract_strided_slice %628 {offsets = [0, 0], sizes = [2, 32], strides = [1, 1]} : vector<2x96xf32> to vector<2x32xf32>
    %635 = arith.addf %633, %634 : vector<2x32xf32>
    %636 = arith.negf %635 : vector<2x32xf32>
    %637 = math.exp %636 : vector<2x32xf32>
    %cst_198 = arith.constant 1.000000e+00 : f32
    %638 = vector.broadcast %cst_198 : f32 to vector<2x32xf32>
    %639 = arith.addf %638, %637 : vector<2x32xf32>
    %640 = arith.divf %638, %639 : vector<2x32xf32>
    %641 = vector.extract_strided_slice %632 {offsets = [0, 32], sizes = [2, 32], strides = [1, 1]} : vector<2x96xf32> to vector<2x32xf32>
    %642 = vector.extract_strided_slice %628 {offsets = [0, 32], sizes = [2, 32], strides = [1, 1]} : vector<2x96xf32> to vector<2x32xf32>
    %643 = arith.addf %641, %642 : vector<2x32xf32>
    %644 = arith.negf %643 : vector<2x32xf32>
    %645 = math.exp %644 : vector<2x32xf32>
    %cst_199 = arith.constant 1.000000e+00 : f32
    %646 = vector.broadcast %cst_199 : f32 to vector<2x32xf32>
    %647 = arith.addf %646, %645 : vector<2x32xf32>
    %648 = arith.divf %646, %647 : vector<2x32xf32>
    %649 = vector.extract_strided_slice %632 {offsets = [0, 64], sizes = [2, 32], strides = [1, 1]} : vector<2x96xf32> to vector<2x32xf32>
    %650 = vector.extract_strided_slice %628 {offsets = [0, 64], sizes = [2, 32], strides = [1, 1]} : vector<2x96xf32> to vector<2x32xf32>
    %651 = arith.mulf %640, %650 : vector<2x32xf32>
    %652 = arith.addf %649, %651 : vector<2x32xf32>
    %653 = math.tanh %652 : vector<2x32xf32>
    %cst_200 = arith.constant 1.000000e+00 : f32
    %654 = vector.broadcast %cst_200 : f32 to vector<2x32xf32>
    %655 = arith.subf %654, %648 : vector<2x32xf32>
    %656 = arith.mulf %655, %653 : vector<2x32xf32>
    %657 = arith.mulf %648, %617 : vector<2x32xf32>
    %658 = arith.addf %656, %657 : vector<2x32xf32>
    %c7_201 = arith.constant 7 : index
    %c0_202 = arith.constant 0 : index
    %c0_203 = arith.constant 0 : index
    %659 = vector.load %arg21[%c7_201, %c0_202, %c0_203] : memref<8x2x96xf32, #tpu.memory_space<vmem>>, vector<1x2x96xf32>
    %660 = vector.shape_cast %659 : vector<1x2x96xf32> to vector<2x96xf32>
    %661 = vector.extract_strided_slice %660 {offsets = [0, 0], sizes = [2, 32], strides = [1, 1]} : vector<2x96xf32> to vector<2x32xf32>
    %662 = vector.extract_strided_slice %630 {offsets = [0, 0], sizes = [2, 32], strides = [1, 1]} : vector<2x96xf32> to vector<2x32xf32>
    %663 = arith.addf %661, %662 : vector<2x32xf32>
    %664 = arith.negf %663 : vector<2x32xf32>
    %665 = math.exp %664 : vector<2x32xf32>
    %cst_204 = arith.constant 1.000000e+00 : f32
    %666 = vector.broadcast %cst_204 : f32 to vector<2x32xf32>
    %667 = arith.addf %666, %665 : vector<2x32xf32>
    %668 = arith.divf %666, %667 : vector<2x32xf32>
    %669 = vector.extract_strided_slice %660 {offsets = [0, 32], sizes = [2, 32], strides = [1, 1]} : vector<2x96xf32> to vector<2x32xf32>
    %670 = vector.extract_strided_slice %630 {offsets = [0, 32], sizes = [2, 32], strides = [1, 1]} : vector<2x96xf32> to vector<2x32xf32>
    %671 = arith.addf %669, %670 : vector<2x32xf32>
    %672 = arith.negf %671 : vector<2x32xf32>
    %673 = math.exp %672 : vector<2x32xf32>
    %cst_205 = arith.constant 1.000000e+00 : f32
    %674 = vector.broadcast %cst_205 : f32 to vector<2x32xf32>
    %675 = arith.addf %674, %673 : vector<2x32xf32>
    %676 = arith.divf %674, %675 : vector<2x32xf32>
    %677 = vector.extract_strided_slice %660 {offsets = [0, 64], sizes = [2, 32], strides = [1, 1]} : vector<2x96xf32> to vector<2x32xf32>
    %678 = vector.extract_strided_slice %630 {offsets = [0, 64], sizes = [2, 32], strides = [1, 1]} : vector<2x96xf32> to vector<2x32xf32>
    %679 = arith.mulf %668, %678 : vector<2x32xf32>
    %680 = arith.addf %677, %679 : vector<2x32xf32>
    %681 = math.tanh %680 : vector<2x32xf32>
    %cst_206 = arith.constant 1.000000e+00 : f32
    %682 = vector.broadcast %cst_206 : f32 to vector<2x32xf32>
    %683 = arith.subf %682, %676 : vector<2x32xf32>
    %684 = arith.mulf %683, %681 : vector<2x32xf32>
    %685 = arith.mulf %676, %624 : vector<2x32xf32>
    %686 = arith.addf %684, %685 : vector<2x32xf32>
    %687 = vector.broadcast %626 : vector<2x1xf32> to vector<2x32xf32>
    %688 = arith.mulf %687, %658 : vector<2x32xf32>
    %c7_207 = arith.constant 7 : index
    %c0_208 = arith.constant 0 : index
    %c0_209 = arith.constant 0 : index
    %689 = vector.load %arg22[%c7_207, %c0_208, %c0_209] : memref<8x2x32xf32, #tpu.memory_space<vmem>>, vector<1x2x32xf32>
    %690 = vector.shape_cast %689 : vector<1x2x32xf32> to vector<2x32xf32>
    %691 = vector.shape_cast %688 : vector<2x32xf32> to vector<1x2x32xf32>
    tpu.vector_store %arg22[%c7_207, %c0_208, %c0_209], %691 {strides = array<i32>} : memref<8x2x32xf32, #tpu.memory_space<vmem>>, vector<1x2x32xf32>,
    %692 = vector.broadcast %626 : vector<2x1xf32> to vector<2x32xf32>
    %693 = arith.mulf %692, %686 : vector<2x32xf32>
    %c7_210 = arith.constant 7 : index
    %c0_211 = arith.constant 0 : index
    %c0_212 = arith.constant 0 : index
    %694 = vector.load %arg23[%c7_210, %c0_211, %c0_212] : memref<8x2x32xf32, #tpu.memory_space<vmem>>, vector<1x2x32xf32>
    %695 = vector.shape_cast %694 : vector<1x2x32xf32> to vector<2x32xf32>
    %696 = vector.shape_cast %693 : vector<2x32xf32> to vector<1x2x32xf32>
    tpu.vector_store %arg23[%c7_210, %c0_211, %c0_212], %696 {strides = array<i32>} : memref<8x2x32xf32, #tpu.memory_space<vmem>>, vector<1x2x32xf32>,
    %c0_213 = arith.constant 0 : index
    %c0_214 = arith.constant 0 : index
    %c0_215 = arith.constant 0 : index
    %697 = vector.load %arg22[%c0_213, %c0_214, %c0_215] : memref<8x2x32xf32, #tpu.memory_space<vmem>>, vector<8x2x32xf32>
    %698 = vector.shape_cast %697 : vector<8x2x32xf32> to vector<16x32xf32>
    %c0_216 = arith.constant 0 : index
    %c0_217 = arith.constant 0 : index
    %699 = vector.load %arg8[%c0_216, %c0_217] : memref<32x32xf32, #tpu.memory_space<vmem>>, vector<32x32xf32>
    %cst_218 = arith.constant dense<0.000000e+00> : vector<16x32xf32>
    %700 = tpu.matmul %698, %699, %cst_218 {dimension_numbers = #tpu.dot_dimension_numbers<[1], [0], [0], [1], [0, 0, 1, 1], [], []>} : vector<16x32xf32>, vector<32x32xf32>, vector<16x32xf32> -> vector<16x32xf32>
    %c0_219 = arith.constant 0 : index
    %c0_220 = arith.constant 0 : index
    %701 = vector.load %arg9[%c0_219, %c0_220] : memref<1x32xf32, #tpu.memory_space<vmem>>, vector<1x32xf32>
    %702 = vector.broadcast %701 : vector<1x32xf32> to vector<16x32xf32>
    %703 = arith.addf %700, %702 : vector<16x32xf32>
    %704 = math.tanh %703 : vector<16x32xf32>
    %c0_221 = arith.constant 0 : index
    %c0_222 = arith.constant 0 : index
    %705 = vector.load %arg10[%c0_221, %c0_222] : memref<32x32xf32, #tpu.memory_space<vmem>>, vector<32x32xf32>
    %cst_223 = arith.constant dense<0.000000e+00> : vector<16x32xf32>
    %706 = tpu.matmul %704, %705, %cst_223 {dimension_numbers = #tpu.dot_dimension_numbers<[1], [0], [0], [1], [0, 0, 1, 1], [], []>} : vector<16x32xf32>, vector<32x32xf32>, vector<16x32xf32> -> vector<16x32xf32>
    %c0_224 = arith.constant 0 : index
    %c0_225 = arith.constant 0 : index
    %707 = vector.load %arg11[%c0_224, %c0_225] : memref<1x32xf32, #tpu.memory_space<vmem>>, vector<1x32xf32>
    %708 = vector.broadcast %707 : vector<1x32xf32> to vector<16x32xf32>
    %709 = arith.addf %706, %708 : vector<16x32xf32>
    %c0_226 = arith.constant 0 : index
    %c0_227 = arith.constant 0 : index
    %710 = vector.load %arg17[%c0_226, %c0_227] : memref<16x32xf32, #tpu.memory_space<vmem>>, vector<16x32xf32>
    tpu.vector_store %arg17[%c0_226, %c0_227], %709 {strides = array<i32>} : memref<16x32xf32, #tpu.memory_space<vmem>>, vector<16x32xf32>,
    %711 = vector.extract_strided_slice %709 {offsets = [0, 0], sizes = [16, 16], strides = [1, 1]} : vector<16x32xf32> to vector<16x16xf32>
    %712 = vector.extract_strided_slice %709 {offsets = [0, 16], sizes = [16, 16], strides = [1, 1]} : vector<16x32xf32> to vector<16x16xf32>
    %713 = math.exp %712 : vector<16x16xf32>
    %c0_228 = arith.constant 0 : index
    %c0_229 = arith.constant 0 : index
    %714 = vector.load %arg16[%c0_228, %c0_229] : memref<16x16xf32, #tpu.memory_space<vmem>>, vector<16x16xf32>
    %715 = arith.mulf %713, %714 : vector<16x16xf32>
    %716 = arith.addf %711, %715 : vector<16x16xf32>
    %c0_230 = arith.constant 0 : index
    %c0_231 = arith.constant 0 : index
    %717 = vector.load %arg12[%c0_230, %c0_231] : memref<16x32xf32, #tpu.memory_space<vmem>>, vector<16x32xf32>
    %cst_232 = arith.constant dense<0.000000e+00> : vector<16x32xf32>
    %718 = tpu.matmul %716, %717, %cst_232 {dimension_numbers = #tpu.dot_dimension_numbers<[1], [0], [0], [1], [0, 0, 1, 1], [], []>} : vector<16x16xf32>, vector<16x32xf32>, vector<16x32xf32> -> vector<16x32xf32>
    %c0_233 = arith.constant 0 : index
    %c0_234 = arith.constant 0 : index
    %719 = vector.load %arg13[%c0_233, %c0_234] : memref<1x32xf32, #tpu.memory_space<vmem>>, vector<1x32xf32>
    %720 = vector.broadcast %719 : vector<1x32xf32> to vector<16x32xf32>
    %721 = arith.addf %718, %720 : vector<16x32xf32>
    %722 = math.tanh %721 : vector<16x32xf32>
    %c0_235 = arith.constant 0 : index
    %c0_236 = arith.constant 0 : index
    %723 = vector.load %arg19[%c0_235, %c0_236] : memref<16x32xf32, #tpu.memory_space<vmem>>, vector<16x32xf32>
    tpu.vector_store %arg19[%c0_235, %c0_236], %722 {strides = array<i32>} : memref<16x32xf32, #tpu.memory_space<vmem>>, vector<16x32xf32>,
    %c0_237 = arith.constant 0 : index
    %c0_238 = arith.constant 0 : index
    %c0_239 = arith.constant 0 : index
    %724 = vector.load %arg23[%c0_237, %c0_238, %c0_239] : memref<8x2x32xf32, #tpu.memory_space<vmem>>, vector<8x2x32xf32>
    %725 = vector.shape_cast %724 : vector<8x2x32xf32> to vector<16x32xf32>
    %c0_240 = arith.constant 0 : index
    %c0_241 = arith.constant 0 : index
    %726 = vector.load %arg14[%c0_240, %c0_241] : memref<32x32xf32, #tpu.memory_space<vmem>>, vector<32x32xf32>
    %cst_242 = arith.constant dense<0.000000e+00> : vector<16x32xf32>
    %727 = tpu.matmul %725, %726, %cst_242 {dimension_numbers = #tpu.dot_dimension_numbers<[1], [0], [0], [1], [0, 0, 1, 1], [], []>} : vector<16x32xf32>, vector<32x32xf32>, vector<16x32xf32> -> vector<16x32xf32>
    %c0_243 = arith.constant 0 : index
    %c0_244 = arith.constant 0 : index
    %728 = vector.load %arg15[%c0_243, %c0_244] : memref<1x32xf32, #tpu.memory_space<vmem>>, vector<1x32xf32>
    %729 = vector.broadcast %728 : vector<1x32xf32> to vector<16x32xf32>
    %730 = arith.addf %727, %729 : vector<16x32xf32>
    %cst_245 = arith.constant 1.000000e-03 : f32
    %731 = vector.broadcast %cst_245 : f32 to vector<16x32xf32>
    %732 = arith.cmpf ogt, %730, %731 : vector<16x32xf32>
    %cst_246 = arith.constant 1.000000e-03 : f32
    %733 = vector.broadcast %cst_246 : f32 to vector<16x32xf32>
    %734 = arith.select %732, %730, %733 : vector<16x32xi1>, vector<16x32xf32>
    %c0_247 = arith.constant 0 : index
    %c0_248 = arith.constant 0 : index
    %735 = vector.load %arg18[%c0_247, %c0_248] : memref<16x32xf32, #tpu.memory_space<vmem>>, vector<16x32xf32>
    tpu.vector_store %arg18[%c0_247, %c0_248], %734 {strides = array<i32>} : memref<16x32xf32, #tpu.memory_space<vmem>>, vector<16x32xf32>,
    return
  }
}

</mosaic_0001>

<bundles_post_ra>
// kernel: tpu_custom_call.1
= control target key start
LH: loop header
LB: loop body
LE: loop exit
PB: predicated region body
PF: predicated region fallthrough
CT: control target
= control target key end

     0   :  { %s3499_s0 = inlined_call_operand.vmem [shape: f32[8,2,16], index: 0, kind: input, shape index: {}]   ;;  %s3500_s1 = inlined_call_operand.vmem [shape: f32[8,2,1], index: 1, kind: input, shape index: {}]   ;;  %s3501_s2 = inlined_call_operand.hbm [shape: f32[16,192], index: 2, kind: input, shape index: {}]   ;;  %s3502_s3 = inlined_call_operand.hbm [shape: f32[1,192], index: 3, kind: input, shape index: {}]   ;;  %s3503_s4 = inlined_call_operand.hbm [shape: f32[32,96], index: 4, kind: input, shape index: {}]   ;;  %s3504_s5 = inlined_call_operand.hbm [shape: f32[1,96], index: 5, kind: input, shape index: {}]   ;;  %s3505_s6 = inlined_call_operand.hbm [shape: f32[32,96], index: 6, kind: input, shape index: {}]   ;;  %s3506_s7 = inlined_call_operand.hbm [shape: f32[1,96], index: 7, kind: input, shape index: {}]   ;;  %s3507_s8 = inlined_call_operand.hbm [shape: f32[32,32], index: 8, kind: input, shape index: {}]   ;;  %s3508_s9 = inlined_call_operand.hbm [shape: f32[1,32], index: 9, kind: input, shape index: {}]   ;;  %s3509_s10 = inlined_call_operand.hbm [shape: f32[32,32], index: 10, kind: input, shape index: {}]   ;;  %s3510_s11 = inlined_call_operand.hbm [shape: f32[1,32], index: 11, kind: input, shape index: {}]   ;;  %s3511_s12 = inlined_call_operand.hbm [shape: f32[16,32], index: 12, kind: input, shape index: {}]   ;;  %s3512_s13 = inlined_call_operand.hbm [shape: f32[1,32], index: 13, kind: input, shape index: {}]   ;;  %s3513_s14 = inlined_call_operand.hbm [shape: f32[32,32], index: 14, kind: input, shape index: {}]   ;;  %s3514_s15 = inlined_call_operand.hbm [shape: f32[1,32], index: 15, kind: input, shape index: {}]   ;;  %s3515_s16 = inlined_call_operand.vmem [shape: f32[16,16], index: 16, kind: input, shape index: {}]   ;;  %s3516_s17 = inlined_call_operand.hbm [shape: f32[16,32], index: 17, kind: output, shape index: {0}]   ;;  %s3517_s18 = inlined_call_operand.hbm [shape: f32[16,32], index: 18, kind: output, shape index: {1}]   ;;  %s3518_s19 = inlined_call_operand.hbm [shape: f32[16,32], index: 19, kind: output, shape index: {2}]  }
   0x1   :  { %3521 = sst [smem:[#allocation43_spill]] %s3499_s0 }
   0x2   :  { %3522 = sst [smem:[#allocation44_spill]] %s3500_s1 }
   0x3   :  { %3523 = sst [smem:[#allocation45_spill]] %s3501_s2 }
   0x4   :  { %3524 = sst [smem:[#allocation46_spill]] %s3502_s3 }
   0x5   :  { %25 = vsyncpa [#allocation7], 0 }
   0x6   :  { %26 = vsyncpa [#allocation10], 0 }
   0x7   :  { %27 = vsyncpa [#allocation13], 0 }
   0x8   :  { %28 = vsyncpa [#allocation16], 0 }
   0x9   :  { %29 = vsyncpa [#allocation19], 0 }
   0xa   :  { %30 = vsyncpa [#allocation22], 0 }
   0xb   :  { %31 = vsyncpa [#allocation25], 0 }
   0xc   :  { %32 = vsyncpa [#allocation28], 0 }
   0xd   :  { %33 = vsyncpa [#allocation8], 0  ;;  %s3525_s20 = sld [smem:[#allocation46_spill]] }
  0x13   :  { %s57_s21 = sshll.u32 %s3525_s20, 4  ;;  %s58_s21 = int_to_ptr.hbm [resolvable:$true] %s57_s21 }
  0x14   :  { %34 = vsyncpa [#allocation31], 0  ;;  %s2716_s1 = smov [#allocation9]   ;;  %s81_s24 = sshll.u32 %s3504_s5, 4  ;;  %s82_s24 = int_to_ptr.hbm [resolvable:$true] %s81_s24 }
  0x15   :  { %s59_s22 = sshll.u32 %s2716_s1, 4  ;;  %s2717_s25 = smov [#allocation12]   ;;  %s60_s22 = int_to_ptr.vmem [resolvable:$true] %s59_s22 }
  0x16   :  { %62 = dma.hbm_to_vmem [thread:$0]  %s58_s21, 32, %s60_s22, [#allocation10]  }
  0x17   :  { %s83_s3 = sshll.u32 %s2717_s25, 4  ;;  %s105_s28 = sshll.u32 %s3506_s7, 4  ;;  %s84_s3 = int_to_ptr.vmem [resolvable:$true] %s83_s3  ;;  %s106_s28 = int_to_ptr.hbm [resolvable:$true] %s105_s28 }
  0x18   :  { %86 = dma.hbm_to_vmem [thread:$0]  %s82_s24, 16, %s84_s3, [#allocation13]  }
  0x19   :  { %s129_s30 = sshll.u32 %s3508_s9, 4  ;;  %s2718_s20 = smov [#allocation15]   ;;  %s130_s30 = int_to_ptr.hbm [resolvable:$true] %s129_s30 }
  0x1a   :  { %s107_s1 = sshll.u32 %s2718_s20, 4  ;;  %s2719_s5 = smov [#allocation18]   ;;  %s108_s1 = int_to_ptr.vmem [resolvable:$true] %s107_s1 }
  0x1b   :  { %110 = dma.hbm_to_vmem [thread:$0]  %s106_s28, 16, %s108_s1, [#allocation16]  }
  0x1c   :  { %s131_s21 = sshll.u32 %s2719_s5, 4  ;;  %s153_s23 = sshll.u32 %s3510_s11, 4  ;;  %s132_s21 = int_to_ptr.vmem [resolvable:$true] %s131_s21  ;;  %s154_s23 = int_to_ptr.hbm [resolvable:$true] %s153_s23 }
  0x1d   :  { %134 = dma.hbm_to_vmem [thread:$0]  %s130_s30, 16, %s132_s21, [#allocation19]  }
  0x1e   :  { %s177_s25 = sshll.u32 %s3512_s13, 4  ;;  %s2720_s3 = smov [#allocation21]   ;;  %s178_s25 = int_to_ptr.hbm [resolvable:$true] %s177_s25 }
  0x1f   :  { %s155_s9 = sshll.u32 %s2720_s3, 4  ;;  %s2721_s26 = smov [#allocation24]   ;;  %s156_s9 = int_to_ptr.vmem [resolvable:$true] %s155_s9 }
  0x20   :  { %158 = dma.hbm_to_vmem [thread:$0]  %s154_s23, 16, %s156_s9, [#allocation22]  }
  0x21   :  { %s179_s27 = sshll.u32 %s2721_s26, 4  ;;  %s3526_s0 = sld [smem:[#allocation45_spill]]  ;;  %s180_s27 = int_to_ptr.vmem [resolvable:$true] %s179_s27 }
  0x22   :  { %182 = dma.hbm_to_vmem [thread:$0]  %s178_s25, 16, %s180_s27, [#allocation25]  }
  0x23   :  { %s2722_s11 = smov [#allocation6]   ;;  %s67_s13 = sshll.u32 %s3503_s4, 4  ;;  %s68_s13 = int_to_ptr.hbm [resolvable:$true] %s67_s13 }
  0x24   :  { %s45_s30 = sshll.u32 %s2722_s11, 4  ;;  %s2723_s21 = smov 256   ;;  %s46_s30 = int_to_ptr.vmem [resolvable:$true] %s45_s30 }
  0x25   :  { %s2724_s22 = smov 16   ;;  %s2725_s2 = smov [#allocation11]  }
  0x26   :  { %s69_s23 = sshll.u32 %s2725_s2, 4  ;;  %s2726_s7 = smov 128   ;;  %s70_s23 = int_to_ptr.vmem [resolvable:$true] %s69_s23 }
  0x27   :  { %s43_s20 = sshll.u32 %s3526_s0, 4  ;;  %s2727_s24 = smov 8   ;;  %s44_s20 = int_to_ptr.hbm [resolvable:$true] %s43_s20 }
  0x28   :  { %51 = dma.hbm_to_vmem [thread:$0]  %s44_s20, 512, %s46_s30, [#allocation7], %s2723_s21, %s2723_s21, %s2724_s22  }
  0x29   :  { %75 = dma.hbm_to_vmem [thread:$0]  %s68_s13, 512, %s70_s23, [#allocation10], %s2726_s7, %s2726_s7, %s2727_s24  }
  0x2a   :  { %s91_s9 = sshll.u32 %s3505_s6, 4  ;;  %s2728_s4 = smov [#allocation14]   ;;  %s92_s9 = int_to_ptr.hbm [resolvable:$true] %s91_s9 }
  0x2b   :  { %s93_s26 = sshll.u32 %s2728_s4, 4  ;;  %s115_s29 = sshll.u32 %s3507_s8, 4  ;;  %s94_s26 = int_to_ptr.vmem [resolvable:$true] %s93_s26  ;;  %s116_s29 = int_to_ptr.hbm [resolvable:$true] %s115_s29 }
  0x2c   :  { %99 = dma.hbm_to_vmem [thread:$0]  %s92_s9, 512, %s94_s26, [#allocation13], %s2726_s7, %s2726_s7, %s2727_s24  }
  0x2d   :  { %s2729_s0 = smov [#allocation17]   ;;  %s139_s1 = sshll.u32 %s3509_s10, 4  ;;  %s140_s1 = int_to_ptr.hbm [resolvable:$true] %s139_s1 }
  0x2e   :  { %s117_s20 = sshll.u32 %s2729_s0, 4  ;;  %s163_s8 = sshll.u32 %s3511_s12, 4  ;;  %s118_s20 = int_to_ptr.vmem [resolvable:$true] %s117_s20  ;;  %s164_s8 = int_to_ptr.hbm [resolvable:$true] %s163_s8 }
  0x2f   :  { %123 = dma.hbm_to_vmem [thread:$0]  %s116_s29, 512, %s118_s20, [#allocation16], %s2726_s7, %s2726_s7, %s2727_s24  }
  0x30   :  { %s2730_s13 = smov [#allocation20]   ;;  %s2731_s2 = smov [#allocation23]  }
  0x31   :  { %s141_s21 = sshll.u32 %s2730_s13, 4  ;;  %s165_s10 = sshll.u32 %s2731_s2, 4  ;;  %s142_s21 = int_to_ptr.vmem [resolvable:$true] %s141_s21  ;;  %s166_s10 = int_to_ptr.vmem [resolvable:$true] %s165_s10 }
  0x32   :  { %147 = dma.hbm_to_vmem [thread:$0]  %s140_s1, 512, %s142_s21, [#allocation19], %s2726_s7, %s2726_s7, %s2727_s24  }
  0x33   :  { %s187_s3 = sshll.u32 %s3513_s14, 4  ;;  %s201_s4 = sshll.u32 %s3514_s15, 4  ;;  %s188_s3 = int_to_ptr.hbm [resolvable:$true] %s187_s3  ;;  %s202_s4 = int_to_ptr.hbm [resolvable:$true] %s201_s4 }
  0x34   :  { %171 = dma.hbm_to_vmem [thread:$0]  %s164_s8, 256, %s166_s10, [#allocation22], %s2726_s7, %s2726_s7, %s2727_s24  }
  0x35   :  { %s2732_s26 = smov [#allocation26]   ;;  %s2733_s28 = smov [#allocation27]  }
  0x36   :  { %s189_s27 = sshll.u32 %s2732_s26, 4  ;;  %s203_s14 = sshll.u32 %s2733_s28, 4  ;;  %s190_s27 = int_to_ptr.vmem [resolvable:$true] %s189_s27  ;;  %s204_s14 = int_to_ptr.vmem [resolvable:$true] %s203_s14 }
  0x37   :  { %195 = dma.hbm_to_vmem [thread:$0]  %s188_s3, 512, %s190_s27, [#allocation25], %s2726_s7, %s2726_s7, %s2727_s24  }
  0x38   :  { %206 = dma.hbm_to_vmem [thread:$0]  %s202_s4, 16, %s204_s14, [#allocation28]  }
  0x39   :  { %2696 = dma.done.wait [#allocation7], 512  }
  0x3a   :  { %2697 = vsyncadd [#allocation7], 4294966784 }
  0x3b   :  { %2698 = dma.done.wait [#allocation10], 544  }
  0x3c   :  { %2699 = vsyncadd [#allocation10], 4294966752 }
  0x3d   :  { %2700 = dma.done.wait [#allocation13], 528  }
  0x3e   :  { %2701 = vsyncadd [#allocation13], 4294966768 }
  0x3f   :  { %2702 = dma.done.wait [#allocation16], 528  }
  0x40   :  { %2703 = vsyncadd [#allocation16], 4294966768 }
  0x41   :  { %2704 = dma.done.wait [#allocation19], 528  }
  0x42   :  { %2705 = vsyncadd [#allocation19], 4294966768 }
  0x43   :  { %2706 = dma.done.wait [#allocation22], 272  }
  0x44   :  { %2707 = vsyncadd [#allocation22], 4294967024 }
  0x45   :  { %2708 = dma.done.wait [#allocation25], 528  }
  0x46   :  { %2709 = vsyncadd [#allocation25], 4294966768 }
  0x47   :  { %2710 = dma.done.wait [#allocation28], 16  }
  0x48   :  { %2711 = vsyncadd [#allocation28], 4294967280  ;;  %v2904_v0 = vld [vmem:[#allocation11 + $0x18] sm:$0xff]  ;;  %v2906_v1 = vld [vmem:[#allocation11 + $0x10] sm:$0xff]  ;;  %s3527_s0 = sld [smem:[#allocation43_spill]]  ;;  %v2734_v12 = vmov 0.0  }
  0x49   :  { %518 = vmatpush.msra.mxu2 %v2904_v0  ;;  %v2909_v2 = vld [vmem:[#allocation11 + $0x8] sm:$0xff]  ;;  %v273_v4 = vld [vmem:[#allocation6] sm:$0xff]  ;;  %v276_v9 = vld [vmem:[#allocation6 + $0x18] sm:$0xff]  ;;  %vm308_vm0 = vcmask 130048   ;;  %vm373_vm1 = vcmask 779264   ;;  %vm386_vm2 = vcmask 1041408  }
  0x4a   :  { %v275_v3 = vld [vmem:[#allocation6 + $0x10] sm:$0xff]  ;;  %v274_v10 = vld [vmem:[#allocation6 + $0x8] sm:$0xff]  ;;  %350 = vmatpush.msra.mxu1 %v276_v9  ;;  %v2959_v18 = vld [vmem:[#allocation9] sm:$0x3]  ;;  %s2735_s12 = smov 64   ;;  %vm388_vm3 = vcmask 1043458  }
  0x4b   :  { %327 = vmatpush.msra.mxu0 %v275_v3  ;;  %519 = vmatpush.msra.mxu2 %v2906_v1  ;;  %v2924_v11 = vld [vmem:[#allocation11] sm:$0xff]  ;;  %v279_v19 = vperm.slane %v2959_v18, 0  ;;  %v280_v21 = vperm.slane %v2959_v18, 1  ;;  %vm391_vm4 = vcmask 1045508   ;;  %vm394_vm5 = vcmask 1045504   ;;  %v2989_v51 = vld [vmem:[#allocation14 + $0x10] sm:$0xff] }
  0x4c   :  { %351 = vmatpush.msra.mxu1 %v274_v10  ;;  %v2962_v20 = vld [vmem:[#allocation12] ss:$0 sm:$0xff]  ;;  %v2993_v53 = vld [vmem:[#allocation14 + $0x8] sm:$0xff]  ;;  %v2997_v54 = vld [vmem:[#allocation14] sm:$0xff]  ;;  %s2736_s9 = smov 32   ;;  %s3528_s27 = sld [smem:[#allocation44_spill]] }
  0x4d   :  { %328 = vmatpush.msra.mxu0 %v273_v4  ;;  %520 = vmatpush.msra.mxu2 %v2909_v2  ;;  %v2987_v50 = vld [vmem:[#allocation14 + $0x18] sm:$0xff]  ;;  %v2737_v4 = vmov 0   ;;  %s2738_s28 = smov 96   ;;  %vm461_vm10 = vcmask 261120   ;;  %s2038_s26 = sshll.u32 %s3516_s17, 4  ;;  %s2039_s26 = int_to_ptr.hbm [resolvable:$true] %s2038_s26 }
  0x4e   :  { %v265_v5 = vld [vmem:[%s3527_s0] sm:$0x3]  ;;  %v266_v6 = vld [vmem:[%s3527_s0 + $0x2] sm:$0x3]  ;;  %v267_v7 = vld [vmem:[%s3527_s0 + $0x4] sm:$0x3]  ;;  %538 = vmatpush.msra.mxu3 %v2987_v50  ;;  %860 = vmatpush.msrb.mxu1 %v2987_v50 }
  0x4f   :  { %v268_v8 = vld [vmem:[%s3527_s0 + $0x6] sm:$0x3]  ;;  %291 = vst [vmem:[#allocation1] ss:$4 sm:$0xff] %v265_v5  ;;  %835 = vmatpush.msrb.mxu0 %v2904_v0  ;;  %521 = vmatpush.msra.mxu2 %v2924_v11  ;;  %v269_v14 = vld [vmem:[%s3527_s0 + $0x8] sm:$0x3] }
  0x50   :  { %293 = vst [vmem:[#allocation1 + $0x1] ss:$4 sm:$0xff] %v266_v6  ;;  %522 = vmatmul.f32.vlgmr.msra.gmra.mxu2 %v2734_v12  ;;  %v270_v15 = vld [vmem:[%s3527_s0 + $0xa] sm:$0x3]  ;;  %v271_v16 = vld [vmem:[%s3527_s0 + $0xc] sm:$0x3]  ;;  %539 = vmatpush.msra.mxu3 %v2989_v51 }
  0x51   :  { %295 = vst [vmem:[#allocation1 + $0x2] ss:$4 sm:$0xff] %v267_v7  ;;  %836 = vmatpush.msrb.mxu0 %v2906_v1  ;;  %672 = vmatpush.msrb.mxu2 %v2904_v0  ;;  %v272_v17 = vld [vmem:[%s3527_s0 + $0xe] sm:$0x3]  ;;  %v3021_v7 = vld [vmem:[#allocation15] ss:$0 sm:$0xff] }
  0x52   :  { %297 = vst [vmem:[#allocation1 + $0x3] ss:$4 sm:$0xff] %v268_v8  ;;  %861 = vmatpush.msrb.mxu1 %v2989_v51  ;;  %540 = vmatpush.msra.mxu3 %v2993_v53  ;;  %v502_v5 = vld [vmem:[%s3528_s27] sm:$0x3]  ;;  %s2741_s17 = smov [#allocation30]   ;;  %s2051_s15 = sshll.u32 %s3517_s18, 4  ;;  %s2052_s15 = int_to_ptr.hbm [resolvable:$true] %s2051_s15 }
  0x53   :  { %837 = vmatpush.msrb.mxu0 %v2909_v2  ;;  %673 = vmatpush.msrb.mxu2 %v2906_v1  ;;  %299 = vst [vmem:[#allocation1 + $0x20] ss:$4 sm:$0xff] %v269_v14  ;;  %v644_v6 = vsub.f32 1.0, %v502_v5  ;;  %s2742_s29 = smov [#allocation32]   ;;  %s2064_s30 = sshll.u32 %s3518_s19, 4  ;;  %s2065_s30 = int_to_ptr.hbm [resolvable:$true] %s2064_s30 }
  0x54   :  { %301 = vst [vmem:[#allocation1 + $0x21] ss:$4 sm:$0xff] %v270_v15  ;;  %862 = vmatpush.msrb.mxu1 %v2993_v53  ;;  %541 = vmatpush.msra.mxu3 %v2997_v54  ;;  %s2062_s0 = sshll.u32 %s2742_s29, 4  ;;  %s2063_s0 = int_to_ptr.vmem [resolvable:$true] %s2062_s0 }
  0x55   :  { %838 = vmatpush.msrb.mxu0 %v2924_v11  ;;  %674 = vmatpush.msrb.mxu2 %v2909_v2  ;;  %303 = vst [vmem:[#allocation1 + $0x22] ss:$4 sm:$0xff] %v271_v16 }
  0x56   :  { %305 = vst [vmem:[#allocation1 + $0x23] ss:$4 sm:$0xff] %v272_v17  ;;  %863 = vmatpush.msrb.mxu1 %v2997_v54  ;;  %542 = vmatmul.f32.vlgmr.msra.gmra.mxu3 %v2734_v12 }
  0x57   :  { %675 = vmatpush.msrb.mxu2 %v2924_v11  ;;  %697 = vmatpush.msrb.mxu3 %v2987_v50 }
  0x58   :  { %2169 = vset.pattern.permute.xlu1 %v2737_v4  ;;  %2170 = vset.pattern.permute.xlu2 %v2737_v4 }
  0x59   :  { %v306_v13 = vld.sshfl [vmem:[#allocation1] sm:$0xff pattern:$0x73625140]  ;;  %998 = vmatpush.msra.mxu2 %v2904_v0  ;;  %698 = vmatpush.msrb.mxu3 %v2989_v51 }
  0x5a   :  { %2093 = vmatmul.msk.f32.vlgmr.msra.gmra.mxu0 %vm308_vm0, %v306_v13  ;;  %2095 = vmatmul.msk.f32.vlgmr.msra.gmra.mxu1 %vm308_vm0, %v306_v13 }
  0x5b   :  { %1161 = vmatpush.msra.mxu0 %v2904_v0  ;;  %999 = vmatpush.msra.mxu2 %v2906_v1 }
  0x5c   :  { %1186 = vmatpush.msra.mxu1 %v2987_v50  ;;  %699 = vmatpush.msrb.mxu3 %v2993_v53 }
  0x5d   :  { %1162 = vmatpush.msra.mxu0 %v2906_v1  ;;  %1000 = vmatpush.msra.mxu2 %v2909_v2  ;;  %v307_v31 = vld.sshfl [vmem:[#allocation1 + $0x20] sm:$0xff pattern:$0x73625140] }
  0x5e   :  { %1187 = vmatpush.msra.mxu1 %v2989_v51  ;;  %700 = vmatpush.msrb.mxu3 %v2997_v54 }
  0x5f   :  { %1163 = vmatpush.msra.mxu0 %v2909_v2  ;;  %1001 = vmatpush.msra.mxu2 %v2924_v11 }
  0x60   :  { %1188 = vmatpush.msra.mxu1 %v2993_v53  ;;  %1023 = vmatpush.msra.mxu3 %v2987_v50 }
  0x61   :  { %1164 = vmatpush.msra.mxu0 %v2924_v11  ;;  %2171 = vset.pattern.permute.xlu0 %v2737_v4 }
  0x62   :  { %2096 = vmatmul.msk.f32.gmra.mxu1 %vm308_vm0, %v307_v31  ;;  %2094 = vmatmul.msk.f32.gmra.mxu0 %vm308_vm0, %v307_v31 }
  0x63   :  { %1189 = vmatpush.msra.mxu1 %v2997_v54  ;;  %1024 = vmatpush.msra.mxu3 %v2989_v51 }
  0x64   :  { %647 = vperm.xlu2 %2170, %v644_v6  }
  0x65   :  { %1025 = vmatpush.msra.mxu3 %v2993_v53 }
  0x67   :  { %1026 = vmatpush.msra.mxu3 %v2997_v54 }
  0xbe   :  { %v648_v17 = vpop.permute.xlu2 %647 }
  0xd3   :  { %v523_v23 = vpop.f32.mrf.mxu2 }
  0xd4   :  { %v524_v25 = vadd.f32 %v2962_v20, %v523_v23 }
  0xd6   :  { %568 = vrot.lane.b32.xlu0 %v524_v25, %s2735_s12 }
  0xd7   :  { %v330_v22 = vpop.f32.mrf.mxu0  ;;  %v353_v26 = vpop.f32.mrf.mxu1 }
  0xd8   :  { %v331_v24 = vadd.f32 %v330_v22, %v279_v19  ;;  %v354_v27 = vadd.f32 %v353_v26, %v280_v21 }
  0xd9   :  { %v543_v10 = vpop.f32.mrf.mxu3 }
  0xda   :  { %v361_v28 = vrot.slane %v331_v24, 2  ;;  %v362_v29 = vrot.slane %v331_v24, 4  ;;  %v363_v30 = vrot.slane %v331_v24, 6  ;;  %374 = vst.msk [vmem:[#allocation2] sm:$0x3] %vm373_vm1, %v331_v24  ;;  %v384_v32 = vrot.slane %v354_v27, 6 }
  0xdb   :  { %v544_v12 = vadd.f32 %v3021_v7, %v543_v10 }
  0xdc   :  { %375 = vst.msk [vmem:[#allocation2 + $0x2] sm:$0x3] %vm373_vm1, %v361_v28  ;;  %v387_v33 = vsel %vm386_vm2, %v331_v24, %v384_v32  ;;  %v389_v34 = vsel %vm388_vm3, %v331_v24, %v384_v32  ;;  %v392_v36 = vsel %vm391_vm4, %v331_v24, %v384_v32  ;;  %v395_v37 = vsel %vm394_vm5, %v384_v32, %v331_v24 }
  0xdd   :  { %376 = vst.msk [vmem:[#allocation2 + $0x4] sm:$0x3] %vm373_vm1, %v362_v29  ;;  %v390_v35 = vrot.slane %v389_v34, 2  ;;  %v393_v38 = vrot.slane %v392_v36, 4  ;;  %v396_v39 = vrot.slane %v395_v37, 6  ;;  %v3028_v24 = vmul.f32 0.0, %v648_v17 }
  0xde   :  { %377 = vst.msk [vmem:[#allocation2 + $0x6] sm:$0x3] %vm373_vm1, %v363_v30 }
  0xdf   :  { %404 = vst [vmem:[#allocation1] ss:$4 sm:$0xff] %v387_v33 }
  0xe0   :  { %408 = vst [vmem:[#allocation1 + $0x20] ss:$4 sm:$0xff] %v390_v35 }
  0xe1   :  { %v546_v44 = vld [vmem:[#allocation2] sm:$0x3] }
  0xe2   :  { %v547_v45 = vadd.f32 %v546_v44, %v524_v25 }
  0xe4   :  { %v2097_v46 = vmul.f32 -1.442695, %v547_v45 }
  0xe6   :  { %v405_v40 = vld.sshfl [vmem:[#allocation1] sm:$0xff pattern:$0x73625140]  ;;  %v2981_v41 = vld.sshfl [vmem:[#allocation1 + $0x8] sm:$0xff pattern:$0x73625140]  ;;  %2178 = vpow2.f32 %v2097_v46 }
  0xe7   :  { %v2983_v42 = vld.sshfl [vmem:[#allocation1 + $0x20] sm:$0xff pattern:$0x73625140]  ;;  %v2985_v43 = vld.sshfl [vmem:[#allocation1 + $0x28] sm:$0xff pattern:$0x73625140] }
  0xe8   :  { %411 = vst [vmem:[#allocation1] ss:$4 sm:$0xff] %v393_v38 }
  0xe9   :  { %414 = vst [vmem:[#allocation1 + $0x20] ss:$4 sm:$0xff] %v396_v39 }
  0xec   :  { %v2179_v47 = vpop.eup %2178 }
  0xed   :  { %v551_v48 = vadd.f32 1.0, %v2179_v47 }
  0xef   :  { %2180 = vrcp.f32 %v551_v48  ;;  %v563_v58 = vand.u32 2147483648, %v551_v48  ;;  %vm557_vm7 = vweird.f32 %v551_v48  ;;  %v561_v59 = vand.u32 2147483647, %v551_v48 }
  0xf1   :  { %v564_v61 = vor.u32 1.1754944e-38, %v563_v58  ;;  %vm562_vm9 = vcmp.eq.f32.partialorder %v561_v59, 8.507059e+37  ;;  %v706_v59 = vld [vmem:[#allocation2 + $0x2] sm:$0x3] }
  0xf5   :  { %v2181_v49 = vpop.eup %2180 }
  0xf6   :  { %v553_v52 = vmul.f32 %v2181_v49, %v551_v48  ;;  %vm558_vm6 = vweird.f32 %v2181_v49 }
  0xf7   :  { %vm559_vm8 = vmor %vm557_vm7, %vm558_vm6 }
  0xf8   :  { %v554_v55 = vsub.f32 1.0, %v553_v52 }
  0xfa   :  { %v555_v56 = vmul.f32 %v2181_v49, %v554_v55 }
  0xfc   :  { %v556_v57 = vadd.f32 %v2181_v49, %v555_v56 }
  0xfe   :  { %v560_v60 = vsel %vm559_vm8, %v2181_v49, %v556_v57  ;;  %v2099_v57 = vld [vmem:[%s3528_s27 + $0x2] sm:$0x3] }
  0xff   :  { %v565_v63 = vsel %vm562_vm9, %v564_v61, %v560_v60  ;;  %v806_v58 = vsub.f32 1.0, %v2099_v57 }
 0x100   :  { %v578_v15 = vsub.f32 1.0, %v565_v63  ;;  %v584_v22 = vmul.f32 0.0, %v565_v63 }
 0x148   :  { %v569_v62 = vpop.permute.xlu0 %568 }
 0x149   :  { %v571_v3 = vmul.f32 %v569_v62, %v565_v63 }
 0x14b   :  { %573 = vrot.lane.b32.xlu0 %v571_v3, %s2735_s12 }
 0x153   :  { %429 = vrot.lane.b32.xlu0 %v405_v40, %s2736_s9 }
 0x15b   :  { %608 = vrot.lane.b32.xlu0 %v544_v12, %s2735_s12 }
 0x1bd   :  { %v574_v8 = vpop.permute.xlu0 %573 }
 0x1be   :  { %v576_v9 = vadd.f32 %v574_v8, %v546_v44 }
 0x1c0   :  { %2182 = vtanh.f32 %v576_v9 }
 0x1c5   :  { %v430_v28 = vpop.permute.xlu0 %429 }
 0x1c6   :  { %v2183_v13 = vpop.eup %2182 }
 0x1c7   :  { %580 = vrot.lane.b32.xlu1 %v2183_v13, %s2738_s28 }
 0x1cd   :  { %v609_v55 = vpop.permute.xlu0 %608 }
 0x1cf   :  { %628 = vperm.xlu1 %2169, %v502_v5  }
 0x1d7   :  { %431 = vrot.lane.b32.xlu1 %v2981_v41, %s2736_s9 }
 0x239   :  { %v581_v14 = vpop.permute.xlu1 %580 }
 0x23a   :  { %v583_v16 = vmul.f32 %v581_v14, %v578_v15 }
 0x23c   :  { %v585_v23 = vadd.f32 %v584_v22, %v583_v16 }
 0x241   :  { %v3030_v25 = vpop.permute.xlu1 %628 }
 0x242   :  { %v3033_v26 = vmul.f32 %v3030_v25, %v585_v23 }
 0x244   :  { %v3037_v27 = vadd.f32 %v3028_v24, %v3033_v26 }
 0x246   :  { %656 = vrot.lane.b32.xlu2 %v3037_v27, %s2738_s28 }
 0x249   :  { %v432_v29 = vpop.permute.xlu1 %431 }
 0x24a   :  { %v462_v30 = vsel %vm461_vm10, %v430_v28, %v432_v29 }
 0x24b   :  { %478 = vst.msk [vmem:[#allocation3] sm:$0x3] %vm373_vm1, %v462_v30 }
 0x252   :  { %v586_v32 = vld [vmem:[#allocation3] sm:$0x3] }
 0x253   :  { %v587_v33 = vadd.f32 %v586_v32, %v544_v12 }
 0x255   :  { %v2098_v34 = vmul.f32 -1.442695, %v587_v33 }
 0x257   :  { %2184 = vpow2.f32 %v2098_v34 }
 0x25d   :  { %v2185_v35 = vpop.eup %2184 }
 0x25e   :  { %v591_v36 = vadd.f32 1.0, %v2185_v35 }
 0x260   :  { %2186 = vrcp.f32 %v591_v36  ;;  %v603_v44 = vand.u32 2147483648, %v591_v36  ;;  %vm597_vm12 = vweird.f32 %v591_v36  ;;  %v601_v46 = vand.u32 2147483647, %v591_v36 }
 0x262   :  { %v604_v49 = vor.u32 1.1754944e-38, %v603_v44  ;;  %vm602_vm14 = vcmp.eq.f32.partialorder %v601_v46, 8.507059e+37 }
 0x266   :  { %v2187_v37 = vpop.eup %2186 }
 0x267   :  { %v593_v38 = vmul.f32 %v2187_v37, %v591_v36  ;;  %vm598_vm11 = vweird.f32 %v2187_v37 }
 0x268   :  { %vm599_vm13 = vmor %vm597_vm12, %vm598_vm11 }
 0x269   :  { %v594_v39 = vsub.f32 1.0, %v593_v38 }
 0x26b   :  { %v595_v40 = vmul.f32 %v2187_v37, %v594_v39 }
 0x26d   :  { %v596_v41 = vadd.f32 %v2187_v37, %v595_v40 }
 0x26f   :  { %v600_v48 = vsel %vm599_vm13, %v2187_v37, %v596_v41 }
 0x270   :  { %v605_v52 = vsel %vm602_vm14, %v604_v49, %v600_v48  ;;  %v356_v48 = vpop.f32.mrf.mxu1  ;;  %v333_v49 = vpop.f32.mrf.mxu0 }
 0x271   :  { %v611_v56 = vmul.f32 %v609_v55, %v605_v52  ;;  %v618_v40 = vsub.f32 1.0, %v605_v52  ;;  %v624_v44 = vmul.f32 0.0, %v605_v52  ;;  %v357_v52 = vadd.f32 %v356_v48, %v280_v21  ;;  %v3095_v21 = vld.sshfl [vmem:[#allocation1] sm:$0xff pattern:$0x73625140] }
 0x272   :  { %v334_v55 = vadd.f32 %v333_v49, %v279_v19 }
 0x274   :  { %378 = vst.msk [vmem:[#allocation2 + $0x8] sm:$0x3] %vm373_vm1, %v334_v55 }
 0x2a0   :  { %v657_v31 = vpop.permute.xlu2 %656 }
 0x2a1   :  { %2100 = vmatmul.msk.f32.vlgmr.msrb.gmra.mxu2 %vm461_vm10, %v657_v31 }
 0x2a2   :  { %1324 = vmatpush.msrb.mxu2 %v2904_v0 }
 0x2a4   :  { %1325 = vmatpush.msrb.mxu2 %v2906_v1 }
 0x2a6   :  { %1326 = vmatpush.msrb.mxu2 %v2909_v2 }
 0x2a8   :  { %1327 = vmatpush.msrb.mxu2 %v2924_v11 }
 0x324   :  { %v677_v45 = vpop.f32.mrf.mxu2 }
 0x325   :  { %v678_v47 = vadd.f32 %v2962_v20, %v677_v45 }
 0x327   :  { %728 = vrot.lane.b32.xlu2 %v678_v47, %s2735_s12  ;;  %v707_v60 = vadd.f32 %v706_v59, %v678_v47 }
 0x329   :  { %v2102_v61 = vmul.f32 -1.442695, %v707_v60 }
 0x32b   :  { %2188 = vpow2.f32 %v2102_v61  ;;  %v3098_v61 = vld.sshfl [vmem:[#allocation1 + $0x8] sm:$0xff pattern:$0x73625140] }
 0x32f   :  { %613 = vrot.lane.b32.xlu2 %v611_v56, %s2735_s12  ;;  %v364_v56 = vrot.slane %v334_v55, 2 }
 0x331   :  { %v2189_v62 = vpop.eup %2188  ;;  %379 = vst.msk [vmem:[#allocation2 + $0xa] sm:$0x3] %vm373_vm1, %v364_v56 }
 0x332   :  { %v711_v63 = vadd.f32 1.0, %v2189_v62  ;;  %v3102_v62 = vld.sshfl [vmem:[#allocation1 + $0x20] sm:$0xff pattern:$0x73625140] }
 0x334   :  { %2190 = vrcp.f32 %v711_v63  ;;  %v723_v9 = vand.u32 2147483648, %v711_v63  ;;  %vm717_vm6 = vweird.f32 %v711_v63  ;;  %v721_v10 = vand.u32 2147483647, %v711_v63 }
 0x336   :  { %v724_v13 = vor.u32 1.1754944e-38, %v723_v9  ;;  %vm722_vm8 = vcmp.eq.f32.partialorder %v721_v10, 8.507059e+37 }
 0x337   :  { %809 = vperm.xlu2 %2170, %v806_v58   ;;  %v366_v58 = vrot.slane %v334_v55, 6 }
 0x339   :  { %381 = vst.msk [vmem:[#allocation2 + $0xe] sm:$0x3] %vm373_vm1, %v366_v58 }
 0x33a   :  { %v2191_v3 = vpop.eup %2190 }
 0x33b   :  { %v713_v4 = vmul.f32 %v2191_v3, %v711_v63  ;;  %vm718_vm15 = vweird.f32 %v2191_v3  ;;  %v3104_v63 = vld.sshfl [vmem:[#allocation1 + $0x28] sm:$0xff pattern:$0x73625140] }
 0x33c   :  { %vm719_vm7 = vmor %vm717_vm6, %vm718_vm15 }
 0x33d   :  { %v714_v5 = vsub.f32 1.0, %v713_v4 }
 0x33f   :  { %v715_v6 = vmul.f32 %v2191_v3, %v714_v5 }
 0x341   :  { %v716_v8 = vadd.f32 %v2191_v3, %v715_v6 }
 0x343   :  { %v720_v12 = vsel %vm719_vm7, %v2191_v3, %v716_v8 }
 0x344   :  { %v725_v15 = vsel %vm722_vm8, %v724_v13, %v720_v12 }
 0x345   :  { %v738_v31 = vsub.f32 1.0, %v725_v15  ;;  %v744_v34 = vmul.f32 %v725_v15, %v3037_v27 }
 0x381   :  { %v729_v14 = vpop.permute.xlu2 %728 }
 0x382   :  { %v731_v16 = vmul.f32 %v729_v14, %v725_v15 }
 0x384   :  { %733 = vrot.lane.b32.xlu1 %v731_v16, %s2735_s12 }
 0x389   :  { %v614_v23 = vpop.permute.xlu2 %613 }
 0x38a   :  { %v616_v28 = vadd.f32 %v614_v23, %v586_v32  ;;  %v869_v23 = vld [vmem:[#allocation2 + $0x4] sm:$0x3] }
 0x38c   :  { %789 = vperm.xlu1 %2169, %v2099_v57   ;;  %v365_v57 = vrot.slane %v334_v55, 4 }
 0x38e   :  { %380 = vst.msk [vmem:[#allocation2 + $0xc] sm:$0x3] %vm373_vm1, %v365_v57 }
 0x391   :  { %v3060_v36 = vpop.permute.xlu2 %809 }
 0x392   :  { %v812_v32 = vmul.f32 %v3060_v36, %v3037_v27 }
 0x3f6   :  { %v734_v17 = vpop.permute.xlu1 %733 }
 0x3f7   :  { %v736_v22 = vadd.f32 %v734_v17, %v706_v59 }
 0x3f9   :  { %2192 = vtanh.f32 %v736_v22 }
 0x3fa   :  { %2194 = vtanh.f32 %v616_v28 }
 0x3fe   :  { %v3062_v38 = vpop.permute.xlu1 %789 }
 0x3ff   :  { %v2193_v29 = vpop.eup %2192 }
 0x400   :  { %740 = vrot.lane.b32.xlu0 %v2193_v29, %s2738_s28  ;;  %v2195_v30 = vpop.eup %2194 }
 0x408   :  { %620 = vrot.lane.b32.xlu0 %v2195_v30, %s2738_s28 }
 0x410   :  { %433 = vrot.lane.b32.xlu0 %v2983_v42, %s2736_s9 }
 0x472   :  { %v741_v33 = vpop.permute.xlu0 %740 }
 0x473   :  { %v743_v35 = vmul.f32 %v741_v33, %v738_v31 }
 0x475   :  { %v745_v37 = vadd.f32 %v744_v34, %v743_v35 }
 0x477   :  { %v3067_v39 = vmul.f32 %v3062_v38, %v745_v37 }
 0x479   :  { %v3070_v41 = vadd.f32 %v812_v32, %v3067_v39 }
 0x47a   :  { %v621_v42 = vpop.permute.xlu0 %620 }
 0x47b   :  { %v623_v45 = vmul.f32 %v621_v42, %v618_v40  ;;  %819 = vrot.lane.b32.xlu1 %v3070_v41, %s2738_s28 }
 0x47d   :  { %v625_v46 = vadd.f32 %v624_v44, %v623_v45 }
 0x47f   :  { %v3075_v47 = vmul.f32 %v3030_v25, %v625_v46  ;;  %v385_v25 = vrot.slane %v357_v52, 6 }
 0x481   :  { %v3079_v27 = vadd.f32 %v3028_v24, %v3075_v47  ;;  %v397_v24 = vsel %vm386_vm2, %v334_v55, %v385_v25  ;;  %v398_v59 = vsel %vm388_vm3, %v334_v55, %v385_v25  ;;  %v402_v60 = vsel %vm394_vm5, %v385_v25, %v334_v55 }
 0x482   :  { %v399_v19 = vrot.slane %v398_v59, 2  ;;  %417 = vst [vmem:[#allocation1] ss:$4 sm:$0xff] %v397_v24  ;;  %v434_v4 = vpop.permute.xlu0 %433  ;;  %v403_v9 = vrot.slane %v402_v60, 6 }
 0x483   :  { %681 = vrot.lane.b32.xlu2 %v3079_v27, %s2738_s28  ;;  %435 = vrot.lane.b32.xlu1 %v2985_v43, %s2736_s9  ;;  %v400_v43 = vsel %vm391_vm4, %v334_v55, %v385_v25 }
 0x484   :  { %420 = vst [vmem:[#allocation1 + $0x20] ss:$4 sm:$0xff] %v399_v19  ;;  %v401_v8 = vrot.slane %v400_v43, 4 }
 0x489   :  { %v3117_v10 = vld.sshfl [vmem:[#allocation1] sm:$0xff pattern:$0x73625140]  ;;  %v3119_v12 = vld.sshfl [vmem:[#allocation1 + $0x8] sm:$0xff pattern:$0x73625140] }
 0x48a   :  { %423 = vst [vmem:[#allocation1] ss:$4 sm:$0xff] %v401_v8 }
 0x48b   :  { %v3121_v13 = vld.sshfl [vmem:[#allocation1 + $0x20] sm:$0xff pattern:$0x73625140]  ;;  %v3123_v14 = vld.sshfl [vmem:[#allocation1 + $0x28] sm:$0xff pattern:$0x73625140] }
 0x48c   :  { %426 = vst [vmem:[#allocation1 + $0x20] ss:$4 sm:$0xff] %v403_v9 }
 0x4dd   :  { %v682_v18 = vpop.permute.xlu2 %681 }
 0x4de   :  { %2101 = vmatmul.msk.f32.vlgmr.msrb.gmra.mxu3 %vm461_vm10, %v682_v18  ;;  %v2104_v18 = vld [vmem:[%s3528_s27 + $0x4] sm:$0x3] }
 0x4df   :  { %1349 = vmatpush.msrb.mxu3 %v2987_v50 }
 0x4e1   :  { %1350 = vmatpush.msrb.mxu3 %v2989_v51 }
 0x4e3   :  { %1351 = vmatpush.msrb.mxu3 %v2993_v53 }
 0x4e5   :  { %1352 = vmatpush.msrb.mxu3 %v2997_v54 }
 0x4ed   :  { %v820_v3 = vpop.permute.xlu1 %819 }
 0x4ee   :  { %2105 = vmatmul.msk.f32.vlgmr.msrb.gmra.mxu0 %vm461_vm10, %v820_v3 }
 0x4ef   :  { %1487 = vmatpush.msrb.mxu0 %v2904_v0 }
 0x4f1   :  { %1488 = vmatpush.msrb.mxu0 %v2906_v1 }
 0x4f3   :  { %1489 = vmatpush.msrb.mxu0 %v2909_v2 }
 0x4f5   :  { %v436_v5 = vpop.permute.xlu1 %435  ;;  %1490 = vmatpush.msrb.mxu0 %v2924_v11 }
 0x4f6   :  { %v463_v6 = vsel %vm461_vm10, %v434_v4, %v436_v5 }
 0x4f7   :  { %479 = vst.msk [vmem:[#allocation3 + $0x2] sm:$0x3] %vm373_vm1, %v463_v6 }
 0x4fe   :  { %v747_v30 = vld [vmem:[#allocation3 + $0x2] sm:$0x3] }
 0x561   :  { %v702_v15 = vpop.f32.mrf.mxu3 }
 0x562   :  { %v703_v16 = vadd.f32 %v3021_v7, %v702_v15  ;;  %v969_v15 = vsub.f32 1.0, %v2104_v18 }
 0x564   :  { %769 = vrot.lane.b32.xlu0 %v703_v16, %s2735_s12  ;;  %v748_v33 = vadd.f32 %v747_v30, %v703_v16 }
 0x566   :  { %v2103_v35 = vmul.f32 -1.442695, %v748_v33 }
 0x56b   :  { %v840_v17 = vpop.f32.mrf.mxu0 }
 0x56c   :  { %v841_v22 = vadd.f32 %v2962_v20, %v840_v17 }
 0x56e   :  { %891 = vrot.lane.b32.xlu2 %v841_v22, %s2735_s12  ;;  %v870_v28 = vadd.f32 %v869_v23, %v841_v22 }
 0x570   :  { %v2107_v29 = vmul.f32 -1.442695, %v870_v28 }
 0x572   :  { %2196 = vpow2.f32 %v2107_v29 }
 0x578   :  { %v2197_v31 = vpop.eup %2196 }
 0x579   :  { %v874_v34 = vadd.f32 1.0, %v2197_v31 }
 0x57b   :  { %2198 = vrcp.f32 %v874_v34  ;;  %v886_v49 = vand.u32 2147483648, %v874_v34  ;;  %vm880_vm3 = vweird.f32 %v874_v34  ;;  %v884_v52 = vand.u32 2147483647, %v874_v34 }
 0x57c   :  { %2200 = vpow2.f32 %v2103_v35 }
 0x57d   :  { %v887_v56 = vor.u32 1.1754944e-38, %v886_v49  ;;  %vm885_vm5 = vcmp.eq.f32.partialorder %v884_v52, 8.507059e+37 }
 0x581   :  { %v2199_v37 = vpop.eup %2198 }
 0x582   :  { %v2201_v32 = vpop.eup %2200  ;;  %v876_v40 = vmul.f32 %v2199_v37, %v874_v34  ;;  %vm881_vm2 = vweird.f32 %v2199_v37 }
 0x583   :  { %v752_v42 = vadd.f32 1.0, %v2201_v32  ;;  %vm882_vm4 = vmor %vm880_vm3, %vm881_vm2 }
 0x584   :  { %v877_v44 = vsub.f32 1.0, %v876_v40 }
 0x585   :  { %2202 = vrcp.f32 %v752_v42  ;;  %v764_v19 = vand.u32 2147483648, %v752_v42  ;;  %vm758_vm11 = vweird.f32 %v752_v42  ;;  %v762_v3 = vand.u32 2147483647, %v752_v42 }
 0x586   :  { %v878_v45 = vmul.f32 %v2199_v37, %v877_v44 }
 0x587   :  { %v765_v5 = vor.u32 1.1754944e-38, %v764_v19  ;;  %vm763_vm13 = vcmp.eq.f32.partialorder %v762_v3, 8.507059e+37 }
 0x588   :  { %v879_v48 = vadd.f32 %v2199_v37, %v878_v45 }
 0x58a   :  { %v883_v25 = vsel %vm882_vm4, %v2199_v37, %v879_v48 }
 0x58b   :  { %v2203_v46 = vpop.eup %2202  ;;  %v888_v24 = vsel %vm885_vm5, %v887_v56, %v883_v25 }
 0x58c   :  { %v754_v55 = vmul.f32 %v2203_v46, %v752_v42  ;;  %vm759_vm9 = vweird.f32 %v2203_v46  ;;  %v901_v33 = vsub.f32 1.0, %v888_v24  ;;  %v907_v35 = vmul.f32 %v888_v24, %v3070_v41 }
 0x58d   :  { %vm760_vm12 = vmor %vm758_vm11, %vm759_vm9 }
 0x58e   :  { %v755_v57 = vsub.f32 1.0, %v754_v55 }
 0x590   :  { %v756_v43 = vmul.f32 %v2203_v46, %v755_v57 }
 0x592   :  { %v757_v60 = vadd.f32 %v2203_v46, %v756_v43 }
 0x594   :  { %v761_v4 = vsel %vm760_vm12, %v2203_v46, %v757_v60 }
 0x595   :  { %v766_v8 = vsel %vm763_vm13, %v765_v5, %v761_v4 }
 0x596   :  { %v779_v44 = vsub.f32 1.0, %v766_v8  ;;  %v785_v46 = vmul.f32 %v766_v8, %v3079_v27 }
 0x5c8   :  { %v892_v58 = vpop.permute.xlu2 %891 }
 0x5c9   :  { %v894_v59 = vmul.f32 %v892_v58, %v888_v24 }
 0x5cb   :  { %896 = vrot.lane.b32.xlu1 %v894_v59, %s2735_s12 }
 0x5d3   :  { %952 = vperm.xlu1 %2169, %v2104_v18  }
 0x5d6   :  { %v770_v6 = vpop.permute.xlu0 %769 }
 0x5d7   :  { %v772_v9 = vmul.f32 %v770_v6, %v766_v8 }
 0x5d9   :  { %774 = vrot.lane.b32.xlu2 %v772_v9, %s2735_s12 }
 0x5e1   :  { %972 = vperm.xlu2 %2170, %v969_v15  }
 0x633   :  { %v775_v22 = vpop.permute.xlu2 %774 }
 0x634   :  { %v777_v28 = vadd.f32 %v775_v22, %v747_v30 }
 0x63b   :  { %v3139_v32 = vpop.permute.xlu2 %972 }
 0x63c   :  { %v975_v30 = vmul.f32 %v3139_v32, %v3070_v41  ;;  %v814_v41 = vmul.f32 %v3060_v36, %v3079_v27 }
 0x63d   :  { %v897_v16 = vpop.permute.xlu1 %896 }
 0x63e   :  { %v899_v17 = vadd.f32 %v897_v16, %v869_v23 }
 0x640   :  { %2204 = vtanh.f32 %v899_v17 }
 0x641   :  { %2206 = vtanh.f32 %v777_v28 }
 0x645   :  { %v3141_v40 = vpop.permute.xlu1 %952 }
 0x646   :  { %v2205_v29 = vpop.eup %2204 }
 0x647   :  { %903 = vrot.lane.b32.xlu0 %v2205_v29, %s2738_s28  ;;  %v2207_v31 = vpop.eup %2206 }
 0x64f   :  { %781 = vrot.lane.b32.xlu0 %v2207_v31, %s2738_s28 }
 0x657   :  { %437 = vrot.lane.b32.xlu0 %v3095_v21, %s2736_s9 }
 0x6b9   :  { %v904_v34 = vpop.permute.xlu0 %903 }
 0x6ba   :  { %v906_v37 = vmul.f32 %v904_v34, %v901_v33 }
 0x6bc   :  { %v908_v23 = vadd.f32 %v907_v35, %v906_v37 }
 0x6be   :  { %v3146_v42 = vmul.f32 %v3141_v40, %v908_v23 }
 0x6c0   :  { %v3149_v45 = vadd.f32 %v975_v30, %v3146_v42 }
 0x6c1   :  { %v782_v21 = vpop.permute.xlu0 %781 }
 0x6c2   :  { %v784_v48 = vmul.f32 %v782_v21, %v779_v44  ;;  %982 = vrot.lane.b32.xlu1 %v3149_v45, %s2738_s28 }
 0x6c4   :  { %v786_v49 = vadd.f32 %v785_v46, %v784_v48 }
 0x6c6   :  { %v3155_v52 = vmul.f32 %v3062_v38, %v786_v49 }
 0x6c8   :  { %v3160_v55 = vadd.f32 %v814_v41, %v3155_v52 }
 0x6c9   :  { %v438_v38 = vpop.permute.xlu0 %437 }
 0x6ca   :  { %844 = vrot.lane.b32.xlu2 %v3160_v55, %s2738_s28  ;;  %439 = vrot.lane.b32.xlu1 %v3098_v61, %s2736_s9 }
 0x724   :  { %v845_v25 = vpop.permute.xlu2 %844 }
 0x725   :  { %2106 = vmatmul.msk.f32.vlgmr.msrb.gmra.mxu1 %vm461_vm10, %v845_v25  ;;  %v2109_v25 = vld [vmem:[%s3528_s27 + $0x6] sm:$0x3] }
 0x726   :  { %1512 = vmatpush.msrb.mxu1 %v2987_v50 }
 0x728   :  { %1513 = vmatpush.msrb.mxu1 %v2989_v51 }
 0x72a   :  { %1514 = vmatpush.msrb.mxu1 %v2993_v53 }
 0x72c   :  { %1515 = vmatpush.msrb.mxu1 %v2997_v54 }
 0x734   :  { %v983_v36 = vpop.permute.xlu1 %982 }
 0x735   :  { %2110 = vmatmul.msk.f32.vlgmr.msra.gmra.mxu2 %vm461_vm10, %v983_v36  ;;  %v1132_v36 = vsub.f32 1.0, %v2109_v25 }
 0x736   :  { %1650 = vmatpush.msra.mxu2 %v2904_v0 }
 0x738   :  { %1651 = vmatpush.msra.mxu2 %v2906_v1  ;;  %v1032_v1 = vld [vmem:[#allocation2 + $0x6] sm:$0x3] }
 0x73a   :  { %1652 = vmatpush.msra.mxu2 %v2909_v2 }
 0x73c   :  { %v440_v27 = vpop.permute.xlu1 %439  ;;  %1653 = vmatpush.msra.mxu2 %v2924_v11 }
 0x73d   :  { %v464_v61 = vsel %vm461_vm10, %v438_v38, %v440_v27 }
 0x73e   :  { %480 = vst.msk [vmem:[#allocation3 + $0x4] sm:$0x3] %vm373_vm1, %v464_v61 }
 0x745   :  { %v910_v24 = vld [vmem:[#allocation3 + $0x4] sm:$0x3] }
 0x7a2   :  { %v865_v56 = vpop.f32.mrf.mxu1 }
 0x7a3   :  { %v866_v57 = vadd.f32 %v3021_v7, %v865_v56 }
 0x7a5   :  { %932 = vrot.lane.b32.xlu0 %v866_v57, %s2735_s12  ;;  %v911_v59 = vadd.f32 %v910_v24, %v866_v57 }
 0x7a7   :  { %v2108_v11 = vmul.f32 -1.442695, %v911_v59 }
 0x7b8   :  { %v1003_v58 = vpop.f32.mrf.mxu2 }
 0x7b9   :  { %v1004_v0 = vadd.f32 %v2962_v20, %v1003_v58 }
 0x7bb   :  { %1054 = vrot.lane.b32.xlu2 %v1004_v0, %s2735_s12  ;;  %v1033_v2 = vadd.f32 %v1032_v1, %v1004_v0 }
 0x7bd   :  { %v2112_v43 = vmul.f32 -1.442695, %v1033_v2 }
 0x7bf   :  { %2208 = vpow2.f32 %v2112_v43 }
 0x7c0   :  { %2210 = vpow2.f32 %v2108_v11 }
 0x7c5   :  { %v2209_v60 = vpop.eup %2208 }
 0x7c6   :  { %v2211_v18 = vpop.eup %2210  ;;  %v1037_v19 = vadd.f32 1.0, %v2209_v60 }
 0x7c7   :  { %v915_v3 = vadd.f32 1.0, %v2211_v18 }
 0x7c8   :  { %2212 = vrcp.f32 %v1037_v19  ;;  %v1049_v28 = vand.u32 2147483648, %v1037_v19  ;;  %vm1043_vm15 = vweird.f32 %v1037_v19  ;;  %v1047_v29 = vand.u32 2147483647, %v1037_v19 }
 0x7c9   :  { %2214 = vrcp.f32 %v915_v3  ;;  %v927_v33 = vand.u32 2147483648, %v915_v3  ;;  %vm921_vm8 = vweird.f32 %v915_v3  ;;  %v925_v35 = vand.u32 2147483647, %v915_v3 }
 0x7ca   :  { %v1050_v37 = vor.u32 1.1754944e-38, %v1049_v28  ;;  %vm1048_vm3 = vcmp.eq.f32.partialorder %v1047_v29, 8.507059e+37 }
 0x7cb   :  { %v928_v21 = vor.u32 1.1754944e-38, %v927_v33  ;;  %vm926_vm4 = vcmp.eq.f32.partialorder %v925_v35, 8.507059e+37 }
 0x7ce   :  { %v2213_v4 = vpop.eup %2212 }
 0x7cf   :  { %v2215_v5 = vpop.eup %2214  ;;  %v1039_v6 = vmul.f32 %v2213_v4, %v1037_v19  ;;  %vm1044_vm14 = vweird.f32 %v2213_v4 }
 0x7d0   :  { %v917_v8 = vmul.f32 %v2215_v5, %v915_v3  ;;  %vm922_vm6 = vweird.f32 %v2215_v5  ;;  %vm1045_vm7 = vmor %vm1043_vm15, %vm1044_vm14 }
 0x7d1   :  { %v1040_v9 = vsub.f32 1.0, %v1039_v6  ;;  %vm923_vm2 = vmor %vm921_vm8, %vm922_vm6 }
 0x7d2   :  { %v918_v15 = vsub.f32 1.0, %v917_v8 }
 0x7d3   :  { %v1041_v16 = vmul.f32 %v2213_v4, %v1040_v9 }
 0x7d4   :  { %v919_v17 = vmul.f32 %v2215_v5, %v918_v15 }
 0x7d5   :  { %v1042_v22 = vadd.f32 %v2213_v4, %v1041_v16 }
 0x7d6   :  { %v920_v31 = vadd.f32 %v2215_v5, %v919_v17 }
 0x7d7   :  { %v1046_v34 = vsel %vm1045_vm7, %v2213_v4, %v1042_v22 }
 0x7d8   :  { %v924_v23 = vsel %vm923_vm2, %v2215_v5, %v920_v31  ;;  %v1051_v44 = vsel %vm1048_vm3, %v1050_v37, %v1046_v34 }
 0x7d9   :  { %v929_v49 = vsel %vm926_vm4, %v928_v21, %v924_v23  ;;  %v1064_v0 = vsub.f32 1.0, %v1051_v44  ;;  %v1070_v59 = vmul.f32 %v1051_v44, %v3149_v45 }
 0x7da   :  { %v942_v19 = vsub.f32 1.0, %v929_v49  ;;  %v948_v4 = vmul.f32 %v929_v49, %v3160_v55 }
 0x815   :  { %v1055_v30 = vpop.permute.xlu2 %1054 }
 0x816   :  { %v1057_v46 = vmul.f32 %v1055_v30, %v1051_v44 }
 0x817   :  { %v933_v48 = vpop.permute.xlu0 %932 }
 0x818   :  { %v935_v41 = vmul.f32 %v933_v48, %v929_v49  ;;  %1059 = vrot.lane.b32.xlu1 %v1057_v46, %s2735_s12 }
 0x81a   :  { %937 = vrot.lane.b32.xlu2 %v935_v41, %s2735_s12 }
 0x820   :  { %1115 = vperm.xlu1 %2169, %v2109_v25  }
 0x822   :  { %1135 = vperm.xlu2 %2170, %v1132_v36  }
 0x874   :  { %v938_v61 = vpop.permute.xlu2 %937 }
 0x875   :  { %v940_v56 = vadd.f32 %v938_v61, %v910_v24 }
 0x87c   :  { %v3192_v11 = vpop.permute.xlu2 %1135 }
 0x87d   :  { %v1138_v24 = vmul.f32 %v3192_v11, %v3149_v45  ;;  %v977_v45 = vmul.f32 %v3139_v32, %v3160_v55 }
 0x88a   :  { %v1060_v38 = vpop.permute.xlu1 %1059 }
 0x88b   :  { %v1062_v27 = vadd.f32 %v1060_v38, %v1032_v1 }
 0x88d   :  { %2216 = vtanh.f32 %v1062_v27 }
 0x88e   :  { %2218 = vtanh.f32 %v940_v56 }
 0x892   :  { %v3194_v60 = vpop.permute.xlu1 %1115 }
 0x893   :  { %v2217_v57 = vpop.eup %2216 }
 0x894   :  { %1066 = vrot.lane.b32.xlu0 %v2217_v57, %s2738_s28  ;;  %v2219_v58 = vpop.eup %2218 }
 0x89c   :  { %944 = vrot.lane.b32.xlu0 %v2219_v58, %s2738_s28 }
 0x8a4   :  { %441 = vrot.lane.b32.xlu0 %v3102_v62, %s2736_s9 }
 0x906   :  { %v1067_v2 = vpop.permute.xlu0 %1066 }
 0x907   :  { %v1069_v43 = vmul.f32 %v1067_v2, %v1064_v0  ;;  %v2114_v0 = vld [vmem:[%s3528_s27 + $0x8] sm:$0x3] }
 0x909   :  { %v1071_v1 = vadd.f32 %v1070_v59, %v1069_v43 }
 0x90b   :  { %v3199_v18 = vmul.f32 %v3194_v60, %v1071_v1 }
 0x90d   :  { %v3202_v3 = vadd.f32 %v1138_v24, %v3199_v18 }
 0x90e   :  { %v945_v62 = vpop.permute.xlu0 %944 }
 0x90f   :  { %v947_v5 = vmul.f32 %v945_v62, %v942_v19  ;;  %1145 = vrot.lane.b32.xlu1 %v3202_v3, %s2738_s28 }
 0x911   :  { %v949_v6 = vadd.f32 %v948_v4, %v947_v5  ;;  %v1295_v4 = vsub.f32 1.0, %v2114_v0 }
 0x913   :  { %v3208_v8 = vmul.f32 %v3141_v40, %v949_v6 }
 0x915   :  { %v3213_v9 = vadd.f32 %v977_v45, %v3208_v8 }
 0x916   :  { %v442_v40 = vpop.permute.xlu0 %441 }
 0x917   :  { %1007 = vrot.lane.b32.xlu2 %v3213_v9, %s2738_s28  ;;  %443 = vrot.lane.b32.xlu1 %v3104_v63, %s2736_s9 }
 0x971   :  { %v1008_v15 = vpop.permute.xlu2 %1007 }
 0x972   :  { %2111 = vmatmul.msk.f32.vlgmr.msra.gmra.mxu3 %vm461_vm10, %v1008_v15 }
 0x973   :  { %1675 = vmatpush.msra.mxu3 %v2987_v50 }
 0x975   :  { %1676 = vmatpush.msra.mxu3 %v2989_v51 }
 0x977   :  { %1677 = vmatpush.msra.mxu3 %v2993_v53  ;;  %v1195_v53 = vld [vmem:[#allocation2 + $0x8] sm:$0x3] }
 0x979   :  { %1678 = vmatpush.msra.mxu3 %v2997_v54 }
 0x981   :  { %v1146_v32 = vpop.permute.xlu1 %1145 }
 0x982   :  { %2115 = vmatmul.msk.f32.vlgmr.msra.gmra.mxu0 %vm461_vm10, %v1146_v32 }
 0x989   :  { %v444_v55 = vpop.permute.xlu1 %443 }
 0x98a   :  { %v465_v16 = vsel %vm461_vm10, %v442_v40, %v444_v55 }
 0x98b   :  { %481 = vst.msk [vmem:[#allocation3 + $0x6] sm:$0x3] %vm373_vm1, %v465_v16 }
 0x992   :  { %v1073_v28 = vld [vmem:[#allocation3 + $0x6] sm:$0x3] }
 0x9f5   :  { %v1028_v63 = vpop.f32.mrf.mxu3 }
 0x9f6   :  { %v1029_v17 = vadd.f32 %v3021_v7, %v1028_v63 }
 0x9f8   :  { %1095 = vrot.lane.b32.xlu0 %v1029_v17, %s2735_s12  ;;  %v1074_v31 = vadd.f32 %v1073_v28, %v1029_v17 }
 0x9fa   :  { %v2113_v34 = vmul.f32 -1.442695, %v1074_v31 }
 0x9ff   :  { %v1166_v50 = vpop.f32.mrf.mxu0 }
 0xa00   :  { %v1167_v51 = vadd.f32 %v2962_v20, %v1166_v50 }
 0xa02   :  { %1217 = vrot.lane.b32.xlu2 %v1167_v51, %s2735_s12  ;;  %v1196_v54 = vadd.f32 %v1195_v53, %v1167_v51 }
 0xa04   :  { %v2117_v22 = vmul.f32 -1.442695, %v1196_v54 }
 0xa06   :  { %2220 = vpow2.f32 %v2117_v22 }
 0xa0c   :  { %v2221_v29 = vpop.eup %2220 }
 0xa0d   :  { %v1200_v33 = vadd.f32 1.0, %v2221_v29 }
 0xa0f   :  { %2222 = vrcp.f32 %v1200_v33  ;;  %v1212_v48 = vand.u32 2147483648, %v1200_v33  ;;  %vm1206_vm9 = vweird.f32 %v1200_v33  ;;  %v1210_v49 = vand.u32 2147483647, %v1200_v33 }
 0xa10   :  { %2224 = vpow2.f32 %v2113_v34 }
 0xa11   :  { %v1213_v36 = vor.u32 1.1754944e-38, %v1212_v48  ;;  %vm1211_vm12 = vcmp.eq.f32.partialorder %v1210_v49, 8.507059e+37  ;;  %v1358_v48 = vld [vmem:[#allocation2 + $0xa] sm:$0x3] }
 0xa15   :  { %v2223_v35 = vpop.eup %2222 }
 0xa16   :  { %v2225_v37 = vpop.eup %2224  ;;  %v1202_v23 = vmul.f32 %v2223_v35, %v1200_v33  ;;  %vm1207_vm5 = vweird.f32 %v2223_v35 }
 0xa17   :  { %v1078_v30 = vadd.f32 1.0, %v2225_v37  ;;  %vm1208_vm11 = vmor %vm1206_vm9, %vm1207_vm5 }
 0xa18   :  { %v1203_v44 = vsub.f32 1.0, %v1202_v23 }
 0xa19   :  { %2226 = vrcp.f32 %v1078_v30  ;;  %v1090_v2 = vand.u32 2147483648, %v1078_v30  ;;  %vm1084_vm14 = vweird.f32 %v1078_v30  ;;  %v1088_v59 = vand.u32 2147483647, %v1078_v30 }
 0xa1a   :  { %v1204_v20 = vmul.f32 %v2223_v35, %v1203_v44 }
 0xa1b   :  { %v1091_v1 = vor.u32 1.1754944e-38, %v1090_v2  ;;  %vm1089_vm6 = vcmp.eq.f32.partialorder %v1088_v59, 8.507059e+37 }
 0xa1c   :  { %v1205_v46 = vadd.f32 %v2223_v35, %v1204_v20 }
 0xa1e   :  { %v1209_v25 = vsel %vm1208_vm11, %v2223_v35, %v1205_v46  ;;  %v3274_v46 = vld [vmem:[#allocation12] ss:$0 sm:$0xff] }
 0xa1f   :  { %v2227_v21 = vpop.eup %2226  ;;  %v1214_v61 = vsel %vm1211_vm12, %v1213_v36, %v1209_v25 }
 0xa20   :  { %v1080_v41 = vmul.f32 %v2227_v21, %v1078_v30  ;;  %vm1085_vm13 = vweird.f32 %v2227_v21  ;;  %v1227_v55 = vsub.f32 1.0, %v1214_v61  ;;  %v1233_v63 = vmul.f32 %v1214_v61, %v3202_v3 }
 0xa21   :  { %vm1086_vm15 = vmor %vm1084_vm14, %vm1085_vm13 }
 0xa22   :  { %v1081_v38 = vsub.f32 1.0, %v1080_v41 }
 0xa24   :  { %v1082_v57 = vmul.f32 %v2227_v21, %v1081_v38 }
 0xa26   :  { %v1083_v58 = vadd.f32 %v2227_v21, %v1082_v57 }
 0xa28   :  { %v1087_v43 = vsel %vm1086_vm15, %v2227_v21, %v1083_v58 }
 0xa29   :  { %v1092_v19 = vsel %vm1089_vm6, %v1091_v1, %v1087_v43 }
 0xa2a   :  { %v1111_v31 = vmul.f32 %v1092_v19, %v3213_v9 }
 0xa5c   :  { %v1218_v27 = vpop.permute.xlu2 %1217 }
 0xa5d   :  { %v1220_v56 = vmul.f32 %v1218_v27, %v1214_v61 }
 0xa5f   :  { %1222 = vrot.lane.b32.xlu1 %v1220_v56, %s2735_s12 }
 0xa67   :  { %1278 = vperm.xlu1 %2169, %v2114_v0  }
 0xa6a   :  { %v1096_v24 = vpop.permute.xlu0 %1095 }
 0xa6b   :  { %v1098_v62 = vmul.f32 %v1096_v24, %v1092_v19 }
 0xa6d   :  { %1100 = vrot.lane.b32.xlu2 %v1098_v62, %s2735_s12 }
 0xa75   :  { %1298 = vperm.xlu2 %2170, %v1295_v4  }
 0xac7   :  { %v1101_v45 = vpop.permute.xlu2 %1100 }
 0xac8   :  { %v1103_v15 = vadd.f32 %v1101_v45, %v1073_v28  ;;  %v1105_v28 = vsub.f32 1.0, %v1092_v19 }
 0xacf   :  { %v3241_v50 = vpop.permute.xlu2 %1298 }
 0xad0   :  { %v1301_v54 = vmul.f32 %v3241_v50, %v3202_v3  ;;  %v1140_v3 = vmul.f32 %v3192_v11, %v3213_v9 }
 0xad1   :  { %v1223_v5 = vpop.permute.xlu1 %1222 }
 0xad2   :  { %v1225_v6 = vadd.f32 %v1223_v5, %v1195_v53 }
 0xad4   :  { %2228 = vtanh.f32 %v1225_v6 }
 0xad5   :  { %2230 = vtanh.f32 %v1103_v15 }
 0xad9   :  { %v3243_v53 = vpop.permute.xlu1 %1278 }
 0xada   :  { %v2229_v32 = vpop.eup %2228 }
 0xadb   :  { %1229 = vrot.lane.b32.xlu0 %v2229_v32, %s2738_s28  ;;  %v2231_v40 = vpop.eup %2230 }
 0xae3   :  { %1107 = vrot.lane.b32.xlu0 %v2231_v40, %s2738_s28 }
 0xaeb   :  { %445 = vrot.lane.b32.xlu0 %v3117_v10, %s2736_s9 }
 0xb4d   :  { %v1230_v16 = vpop.permute.xlu0 %1229 }
 0xb4e   :  { %v1232_v17 = vmul.f32 %v1230_v16, %v1227_v55 }
 0xb50   :  { %v1234_v51 = vadd.f32 %v1233_v63, %v1232_v17 }
 0xb52   :  { %v3248_v22 = vmul.f32 %v3243_v53, %v1234_v51 }
 0xb54   :  { %v3251_v29 = vadd.f32 %v1301_v54, %v3248_v22 }
 0xb55   :  { %v1108_v10 = vpop.permute.xlu0 %1107 }
 0xb56   :  { %v1110_v33 = vmul.f32 %v1108_v10, %v1105_v28  ;;  %1308 = vrot.lane.b32.xlu1 %v3251_v29, %s2738_s28  ;;  %v2119_v10 = vld [vmem:[%s3528_s27 + $0xa] sm:$0x3] }
 0xb58   :  { %v1112_v34 = vadd.f32 %v1111_v31, %v1110_v33  ;;  %v1458_v31 = vsub.f32 1.0, %v2119_v10 }
 0xb5a   :  { %v3257_v35 = vmul.f32 %v3194_v60, %v1112_v34 }
 0xb5c   :  { %v3262_v37 = vadd.f32 %v1140_v3, %v3257_v35 }
 0xb5d   :  { %v446_v60 = vpop.permute.xlu0 %445 }
 0xb5e   :  { %1170 = vrot.lane.b32.xlu2 %v3262_v37, %s2738_s28  ;;  %447 = vrot.lane.b32.xlu1 %v3119_v12, %s2736_s9 }
 0xbb8   :  { %v1171_v23 = vpop.permute.xlu2 %1170 }
 0xbb9   :  { %2116 = vmatmul.msk.f32.vlgmr.msra.gmra.mxu1 %vm461_vm10, %v1171_v23 }
 0xbc8   :  { %v1309_v30 = vpop.permute.xlu1 %1308 }
 0xbc9   :  { %2120 = vmatmul.msk.f32.vlgmr.msrb.gmra.mxu2 %vm461_vm10, %v1309_v30 }
 0xbd0   :  { %v448_v44 = vpop.permute.xlu1 %447 }
 0xbd1   :  { %v466_v20 = vsel %vm461_vm10, %v446_v60, %v448_v44 }
 0xbd2   :  { %482 = vst.msk [vmem:[#allocation3 + $0x8] sm:$0x3] %vm373_vm1, %v466_v20 }
 0xbd9   :  { %v1236_v41 = vld [vmem:[#allocation3 + $0x8] sm:$0x3] }
 0xc36   :  { %v1191_v11 = vpop.f32.mrf.mxu1 }
 0xc37   :  { %v1192_v9 = vadd.f32 %v3021_v7, %v1191_v11 }
 0xc39   :  { %1258 = vrot.lane.b32.xlu0 %v1192_v9, %s2735_s12  ;;  %v1237_v25 = vadd.f32 %v1236_v41, %v1192_v9 }
 0xc3b   :  { %v2118_v38 = vmul.f32 -1.442695, %v1237_v25 }
 0xc4c   :  { %v1329_v21 = vpop.f32.mrf.mxu2 }
 0xc4d   :  { %v1330_v12 = vadd.f32 %v3274_v46, %v1329_v21 }
 0xc4f   :  { %1380 = vrot.lane.b32.xlu2 %v1330_v12, %s2735_s12  ;;  %v1359_v49 = vadd.f32 %v1358_v48, %v1330_v12 }
 0xc51   :  { %v2122_v36 = vmul.f32 -1.442695, %v1359_v49 }
 0xc53   :  { %2232 = vpow2.f32 %v2122_v36 }
 0xc54   :  { %2234 = vpow2.f32 %v2118_v38 }
 0xc59   :  { %v2233_v27 = vpop.eup %2232 }
 0xc5a   :  { %v2235_v61 = vpop.eup %2234  ;;  %v1363_v7 = vadd.f32 1.0, %v2233_v27 }
 0xc5b   :  { %v1241_v56 = vadd.f32 1.0, %v2235_v61 }
 0xc5c   :  { %2236 = vrcp.f32 %v1363_v7  ;;  %v1375_v62 = vand.u32 2147483648, %v1363_v7  ;;  %vm1369_vm8 = vweird.f32 %v1363_v7  ;;  %v1373_v4 = vand.u32 2147483647, %v1363_v7 }
 0xc5d   :  { %2238 = vrcp.f32 %v1241_v56  ;;  %v1253_v6 = vand.u32 2147483648, %v1241_v56  ;;  %vm1247_vm4 = vweird.f32 %v1241_v56  ;;  %v1251_v15 = vand.u32 2147483647, %v1241_v56 }
 0xc5e   :  { %v1376_v32 = vor.u32 1.1754944e-38, %v1375_v62  ;;  %vm1374_vm9 = vcmp.eq.f32.partialorder %v1373_v4, 8.507059e+37 }
 0xc5f   :  { %v1254_v63 = vor.u32 1.1754944e-38, %v1253_v6  ;;  %vm1252_vm11 = vcmp.eq.f32.partialorder %v1251_v15, 8.507059e+37 }
 0xc62   :  { %v2237_v57 = vpop.eup %2236 }
 0xc63   :  { %v2239_v58 = vpop.eup %2238  ;;  %v1365_v0 = vmul.f32 %v2237_v57, %v1363_v7  ;;  %vm1370_vm7 = vweird.f32 %v2237_v57 }
 0xc64   :  { %v1243_v2 = vmul.f32 %v2239_v58, %v1241_v56  ;;  %vm1248_vm2 = vweird.f32 %v2239_v58  ;;  %vm1371_vm3 = vmor %vm1369_vm8, %vm1370_vm7 }
 0xc65   :  { %v1366_v59 = vsub.f32 1.0, %v1365_v0  ;;  %vm1249_vm5 = vmor %vm1247_vm4, %vm1248_vm2 }
 0xc66   :  { %v1244_v43 = vsub.f32 1.0, %v1243_v2 }
 0xc67   :  { %v1367_v1 = vmul.f32 %v2237_v57, %v1366_v59 }
 0xc68   :  { %v1245_v24 = vmul.f32 %v2239_v58, %v1244_v43 }
 0xc69   :  { %v1368_v19 = vadd.f32 %v2237_v57, %v1367_v1  ;;  %v1521_v1 = vld [vmem:[#allocation2 + $0xc] sm:$0x3] }
 0xc6a   :  { %v1246_v5 = vadd.f32 %v2239_v58, %v1245_v24 }
 0xc6b   :  { %v1372_v45 = vsel %vm1371_vm3, %v2237_v57, %v1368_v19 }
 0xc6c   :  { %v1250_v40 = vsel %vm1249_vm5, %v2239_v58, %v1246_v5  ;;  %v1377_v16 = vsel %vm1374_vm9, %v1376_v32, %v1372_v45 }
 0xc6d   :  { %v1255_v54 = vsel %vm1252_vm11, %v1254_v63, %v1250_v40  ;;  %v1390_v44 = vsub.f32 1.0, %v1377_v16  ;;  %v1396_v11 = vmul.f32 %v1377_v16, %v3251_v29 }
 0xc6e   :  { %v1268_v25 = vsub.f32 1.0, %v1255_v54  ;;  %v1274_v38 = vmul.f32 %v1255_v54, %v3262_v37 }
 0xca9   :  { %v1381_v55 = vpop.permute.xlu2 %1380 }
 0xcaa   :  { %v1383_v17 = vmul.f32 %v1381_v55, %v1377_v16 }
 0xcab   :  { %v1259_v51 = vpop.permute.xlu0 %1258 }
 0xcac   :  { %v1261_v28 = vmul.f32 %v1259_v51, %v1255_v54  ;;  %1385 = vrot.lane.b32.xlu1 %v1383_v17, %s2735_s12 }
 0xcae   :  { %1263 = vrot.lane.b32.xlu2 %v1261_v28, %s2735_s12 }
 0xcb4   :  { %1441 = vperm.xlu1 %2169, %v2119_v10  }
 0xcb6   :  { %1461 = vperm.xlu2 %2170, %v1458_v31  }
 0xd08   :  { %v1264_v3 = vpop.permute.xlu2 %1263 }
 0xd09   :  { %v1266_v23 = vadd.f32 %v1264_v3, %v1236_v41 }
 0xd10   :  { %v3288_v21 = vpop.permute.xlu2 %1461 }
 0xd11   :  { %v1464_v49 = vmul.f32 %v3288_v21, %v3251_v29  ;;  %v1303_v29 = vmul.f32 %v3241_v50, %v3262_v37  ;;  %v3319_v37 = vld [vmem:[#allocation15] ss:$0 sm:$0xff] }
 0xd1e   :  { %v1386_v33 = vpop.permute.xlu1 %1385 }
 0xd1f   :  { %v1388_v34 = vadd.f32 %v1386_v33, %v1358_v48 }
 0xd21   :  { %2240 = vtanh.f32 %v1388_v34 }
 0xd22   :  { %2242 = vtanh.f32 %v1266_v23 }
 0xd26   :  { %v3290_v48 = vpop.permute.xlu1 %1441 }
 0xd27   :  { %v2241_v30 = vpop.eup %2240 }
 0xd28   :  { %1392 = vrot.lane.b32.xlu0 %v2241_v30, %s2738_s28  ;;  %v2243_v60 = vpop.eup %2242 }
 0xd30   :  { %1270 = vrot.lane.b32.xlu0 %v2243_v60, %s2738_s28 }
 0xd38   :  { %449 = vrot.lane.b32.xlu0 %v3121_v13, %s2736_s9 }
 0xd9a   :  { %v1393_v20 = vpop.permute.xlu0 %1392 }
 0xd9b   :  { %v1395_v9 = vmul.f32 %v1393_v20, %v1390_v44  ;;  %v2124_v20 = vld [vmem:[%s3528_s27 + $0xc] sm:$0x3] }
 0xd9d   :  { %v1397_v12 = vadd.f32 %v1396_v11, %v1395_v9 }
 0xd9f   :  { %v3295_v41 = vmul.f32 %v3290_v48, %v1397_v12 }
 0xda1   :  { %v3298_v36 = vadd.f32 %v1464_v49, %v3295_v41 }
 0xda2   :  { %v1271_v13 = vpop.permute.xlu0 %1270 }
 0xda3   :  { %v1273_v27 = vmul.f32 %v1271_v13, %v1268_v25  ;;  %1471 = vrot.lane.b32.xlu1 %v3298_v36, %s2738_s28 }
 0xda5   :  { %v1275_v61 = vadd.f32 %v1274_v38, %v1273_v27  ;;  %v1621_v27 = vsub.f32 1.0, %v2124_v20 }
 0xda7   :  { %v3304_v7 = vmul.f32 %v3243_v53, %v1275_v61 }
 0xda9   :  { %v3309_v56 = vadd.f32 %v1303_v29, %v3304_v7 }
 0xdaa   :  { %v450_v53 = vpop.permute.xlu0 %449 }
 0xdab   :  { %1333 = vrot.lane.b32.xlu2 %v3309_v56, %s2738_s28  ;;  %451 = vrot.lane.b32.xlu1 %v3123_v14, %s2736_s9 }
 0xe05   :  { %v1334_v57 = vpop.permute.xlu2 %1333 }
 0xe06   :  { %2121 = vmatmul.msk.f32.vlgmr.msrb.gmra.mxu3 %vm461_vm10, %v1334_v57 }
 0xe15   :  { %v1472_v58 = vpop.permute.xlu1 %1471 }
 0xe16   :  { %2125 = vmatmul.msk.f32.vlgmr.msrb.gmra.mxu0 %vm461_vm10, %v1472_v58 }
 0xe1d   :  { %v452_v0 = vpop.permute.xlu1 %451 }
 0xe1e   :  { %v467_v2 = vsel %vm461_vm10, %v450_v53, %v452_v0 }
 0xe1f   :  { %483 = vst.msk [vmem:[#allocation3 + $0xa] sm:$0x3] %vm373_vm1, %v467_v2  ;;  %v424_v2 = vld.sshfl [vmem:[#allocation1] sm:$0xff pattern:$0x73625140] }
 0xe26   :  { %v1399_v62 = vld [vmem:[#allocation3 + $0xa] sm:$0x3] }
 0xe89   :  { %v1354_v50 = vpop.f32.mrf.mxu3 }
 0xe8a   :  { %v1355_v59 = vadd.f32 %v3319_v37, %v1354_v50 }
 0xe8c   :  { %1421 = vrot.lane.b32.xlu0 %v1355_v59, %s2735_s12  ;;  %v1400_v5 = vadd.f32 %v1399_v62, %v1355_v59 }
 0xe8e   :  { %v2123_v45 = vmul.f32 -1.442695, %v1400_v5 }
 0xe93   :  { %v1492_v14 = vpop.f32.mrf.mxu0 }
 0xe94   :  { %v1493_v43 = vadd.f32 %v3274_v46, %v1492_v14 }
 0xe96   :  { %1543 = vrot.lane.b32.xlu2 %v1493_v43, %s2735_s12  ;;  %v1522_v24 = vadd.f32 %v1521_v1, %v1493_v43 }
 0xe98   :  { %v2127_v19 = vmul.f32 -1.442695, %v1522_v24 }
 0xe9a   :  { %2244 = vpow2.f32 %v2127_v19 }
 0xea0   :  { %v2245_v4 = vpop.eup %2244 }
 0xea1   :  { %v1526_v6 = vadd.f32 1.0, %v2245_v4 }
 0xea3   :  { %2246 = vrcp.f32 %v1526_v6  ;;  %v1538_v54 = vand.u32 2147483648, %v1526_v6  ;;  %vm1532_vm13 = vweird.f32 %v1526_v6  ;;  %v1536_v28 = vand.u32 2147483647, %v1526_v6 }
 0xea4   :  { %2248 = vpow2.f32 %v2123_v45 }
 0xea5   :  { %v1539_v33 = vor.u32 1.1754944e-38, %v1538_v54  ;;  %vm1537_vm15 = vcmp.eq.f32.partialorder %v1536_v28, 8.507059e+37 }
 0xea9   :  { %v2247_v15 = vpop.eup %2246 }
 0xeaa   :  { %v2249_v32 = vpop.eup %2248  ;;  %v1528_v40 = vmul.f32 %v2247_v15, %v1526_v6  ;;  %vm1533_vm12 = vweird.f32 %v2247_v15 }
 0xeab   :  { %v1404_v55 = vadd.f32 1.0, %v2249_v32  ;;  %vm1534_vm14 = vmor %vm1532_vm13, %vm1533_vm12 }
 0xeac   :  { %v1529_v16 = vsub.f32 1.0, %v1528_v40 }
 0xead   :  { %2250 = vrcp.f32 %v1404_v55  ;;  %v1416_v11 = vand.u32 2147483648, %v1404_v55  ;;  %vm1410_vm7 = vweird.f32 %v1404_v55  ;;  %v1414_v9 = vand.u32 2147483647, %v1404_v55 }
 0xeae   :  { %v1530_v63 = vmul.f32 %v2247_v15, %v1529_v16 }
 0xeaf   :  { %v1417_v49 = vor.u32 1.1754944e-38, %v1416_v11  ;;  %vm1415_vm2 = vcmp.eq.f32.partialorder %v1414_v9, 8.507059e+37 }
 0xeb0   :  { %v1531_v51 = vadd.f32 %v2247_v15, %v1530_v63  ;;  %v425_v63 = vld.sshfl [vmem:[#allocation1 + $0x8] sm:$0xff pattern:$0x73625140] }
 0xeb2   :  { %v1535_v31 = vsel %vm1534_vm14, %v2247_v15, %v1531_v51 }
 0xeb3   :  { %v2251_v17 = vpop.eup %2250  ;;  %v1540_v23 = vsel %vm1537_vm15, %v1539_v33, %v1535_v31  ;;  %v1684_v33 = vld [vmem:[#allocation2 + $0xe] sm:$0x3]  ;;  %vm636_vm15 = vcmask 254976  }
 0xeb4   :  { %v1406_v10 = vmul.f32 %v2251_v17, %v1404_v55  ;;  %vm1411_vm6 = vweird.f32 %v2251_v17  ;;  %v1553_v50 = vsub.f32 1.0, %v1540_v23  ;;  %v1559_v14 = vmul.f32 %v1540_v23, %v3298_v36 }
 0xeb5   :  { %vm1412_vm8 = vmor %vm1410_vm7, %vm1411_vm6 }
 0xeb6   :  { %v1407_v34 = vsub.f32 1.0, %v1406_v10 }
 0xeb8   :  { %v1408_v60 = vmul.f32 %v2251_v17, %v1407_v34 }
 0xeba   :  { %v1409_v44 = vadd.f32 %v2251_v17, %v1408_v60 }
 0xebc   :  { %v1413_v12 = vsel %vm1412_vm8, %v2251_v17, %v1409_v44 }
 0xebd   :  { %v1418_v13 = vsel %vm1415_vm2, %v1417_v49, %v1413_v12 }
 0xebe   :  { %v1431_v5 = vsub.f32 1.0, %v1418_v13  ;;  %v1437_v15 = vmul.f32 %v1418_v13, %v3309_v56 }
 0xef0   :  { %v1544_v3 = vpop.permute.xlu2 %1543 }
 0xef1   :  { %v1546_v30 = vmul.f32 %v1544_v3, %v1540_v23 }
 0xef3   :  { %1548 = vrot.lane.b32.xlu1 %v1546_v30, %s2735_s12 }
 0xefb   :  { %1604 = vperm.xlu1 %2169, %v2124_v20  }
 0xefe   :  { %v1422_v25 = vpop.permute.xlu0 %1421 }
 0xeff   :  { %v1424_v38 = vmul.f32 %v1422_v25, %v1418_v13 }
 0xf01   :  { %1426 = vrot.lane.b32.xlu2 %v1424_v38, %s2735_s12 }
 0xf09   :  { %1624 = vperm.xlu2 %2170, %v1621_v27  }
 0xf5b   :  { %v1427_v57 = vpop.permute.xlu2 %1426 }
 0xf5c   :  { %v1429_v58 = vadd.f32 %v1427_v57, %v1399_v62 }
 0xf63   :  { %v3334_v24 = vpop.permute.xlu2 %1624 }
 0xf64   :  { %v1627_v62 = vmul.f32 %v3334_v24, %v3298_v36  ;;  %v1466_v36 = vmul.f32 %v3288_v21, %v3309_v56 }
 0xf65   :  { %v1549_v61 = vpop.permute.xlu1 %1548 }
 0xf66   :  { %v1551_v29 = vadd.f32 %v1549_v61, %v1521_v1 }
 0xf68   :  { %2252 = vtanh.f32 %v1551_v29 }
 0xf69   :  { %2254 = vtanh.f32 %v1429_v58 }
 0xf6d   :  { %v3336_v19 = vpop.permute.xlu1 %1604 }
 0xf6e   :  { %v2253_v53 = vpop.eup %2252 }
 0xf6f   :  { %1555 = vrot.lane.b32.xlu0 %v2253_v53, %s2738_s28  ;;  %v2255_v0 = vpop.eup %2254 }
 0xf77   :  { %1433 = vrot.lane.b32.xlu0 %v2255_v0, %s2738_s28 }
 0xf7f   :  { %453 = vrot.lane.b32.xlu0 %v424_v2, %s2736_s9 }
 0xfe1   :  { %v1556_v59 = vpop.permute.xlu0 %1555 }
 0xfe2   :  { %v1558_v43 = vmul.f32 %v1556_v59, %v1553_v50 }
 0xfe4   :  { %v1560_v1 = vadd.f32 %v1559_v14, %v1558_v43 }
 0xfe6   :  { %v3341_v4 = vmul.f32 %v3336_v19, %v1560_v1 }
 0xfe8   :  { %v3344_v6 = vadd.f32 %v1627_v62, %v3341_v4 }
 0xfe9   :  { %v1434_v45 = vpop.permute.xlu0 %1433 }
 0xfea   :  { %v1436_v32 = vmul.f32 %v1434_v45, %v1431_v5  ;;  %1634 = vrot.lane.b32.xlu1 %v3344_v6, %s2738_s28 }
 0xfec   :  { %v1438_v40 = vadd.f32 %v1437_v15, %v1436_v32 }
 0xfee   :  { %v3350_v55 = vmul.f32 %v3290_v48, %v1438_v40  ;;  %v2129_v40 = vld [vmem:[%s3528_s27 + $0xe] sm:$0x3]  ;;  %s2049_s27 = sshll.u32 %s2741_s17, 4  ;;  %s2050_s27 = int_to_ptr.vmem [resolvable:$true] %s2049_s27 }
 0xff0   :  { %v3355_v16 = vadd.f32 %v1466_v36, %v3350_v55 }
 0xff1   :  { %v454_v48 = vpop.permute.xlu0 %453 }
 0xff2   :  { %1496 = vrot.lane.b32.xlu2 %v3355_v16, %s2738_s28  ;;  %455 = vrot.lane.b32.xlu1 %v425_v63, %s2736_s9 }
0x104c   :  { %v1497_v17 = vpop.permute.xlu2 %1496 }
0x104d   :  { %2126 = vmatmul.msk.f32.vlgmr.msrb.gmra.mxu1 %vm461_vm10, %v1497_v17 }
0x105c   :  { %v1635_v51 = vpop.permute.xlu1 %1634 }
0x105d   :  { %2130 = vmatmul.msk.f32.vlgmr.msra.gmra.mxu2 %vm461_vm10, %v1635_v51 }
0x1064   :  { %v456_v54 = vpop.permute.xlu1 %455 }
0x1065   :  { %v468_v28 = vsel %vm461_vm10, %v454_v48, %v456_v54 }
0x1066   :  { %484 = vst.msk [vmem:[#allocation3 + $0xc] sm:$0x3] %vm373_vm1, %v468_v28 }
0x106d   :  { %v1562_v3 = vld [vmem:[#allocation3 + $0xc] sm:$0x3] }
0x10ca   :  { %v1517_v21 = vpop.f32.mrf.mxu1 }
0x10cb   :  { %v1518_v56 = vadd.f32 %v3319_v37, %v1517_v21 }
0x10cd   :  { %1584 = vrot.lane.b32.xlu0 %v1518_v56, %s2735_s12  ;;  %v1563_v23 = vadd.f32 %v1562_v3, %v1518_v56  ;;  %v428_v56 = vld.sshfl [vmem:[#allocation1 + $0x28] sm:$0xff pattern:$0x73625140] }
0x10cf   :  { %v2128_v60 = vmul.f32 -1.442695, %v1563_v23 }
0x10e0   :  { %v1655_v10 = vpop.f32.mrf.mxu2 }
0x10e1   :  { %v1656_v31 = vadd.f32 %v3274_v46, %v1655_v10 }
0x10e3   :  { %1706 = vrot.lane.b32.xlu2 %v1656_v31, %s2735_s12  ;;  %v1685_v34 = vadd.f32 %v1684_v33, %v1656_v31 }
0x10e5   :  { %v2132_v30 = vmul.f32 -1.442695, %v1685_v34 }
0x10e7   :  { %2256 = vpow2.f32 %v2132_v30 }
0x10e8   :  { %2258 = vpow2.f32 %v2128_v60 }
0x10ed   :  { %v2257_v44 = vpop.eup %2256 }
0x10ee   :  { %v2259_v20 = vpop.eup %2258  ;;  %v1689_v11 = vadd.f32 1.0, %v2257_v44 }
0x10ef   :  { %v1567_v9 = vadd.f32 1.0, %v2259_v20 }
0x10f0   :  { %2260 = vrcp.f32 %v1689_v11  ;;  %v1701_v57 = vand.u32 2147483648, %v1689_v11  ;;  %vm1695_vm4 = vweird.f32 %v1689_v11  ;;  %v1699_v58 = vand.u32 2147483647, %v1689_v11 }
0x10f1   :  { %2262 = vrcp.f32 %v1567_v9  ;;  %v1579_v0 = vand.u32 2147483648, %v1567_v9  ;;  %vm1573_vm11 = vweird.f32 %v1567_v9  ;;  %v1577_v50 = vand.u32 2147483647, %v1567_v9 }
0x10f2   :  { %v1702_v59 = vor.u32 1.1754944e-38, %v1701_v57  ;;  %vm1700_vm13 = vcmp.eq.f32.partialorder %v1699_v58, 8.507059e+37 }
0x10f3   :  { %v1580_v62 = vor.u32 1.1754944e-38, %v1579_v0  ;;  %vm1578_vm14 = vcmp.eq.f32.partialorder %v1577_v50, 8.507059e+37 }
0x10f6   :  { %v2261_v12 = vpop.eup %2260 }
0x10f7   :  { %v2263_v49 = vpop.eup %2262  ;;  %v1691_v25 = vmul.f32 %v2261_v12, %v1689_v11  ;;  %vm1696_vm3 = vweird.f32 %v2261_v12 }
0x10f8   :  { %v1569_v46 = vmul.f32 %v2263_v49, %v1567_v9  ;;  %vm1574_vm5 = vweird.f32 %v2263_v49  ;;  %vm1697_vm9 = vmor %vm1695_vm4, %vm1696_vm3 }
0x10f9   :  { %v1692_v13 = vsub.f32 1.0, %v1691_v25  ;;  %vm1575_vm12 = vmor %vm1573_vm11, %vm1574_vm5 }
0x10fa   :  { %v1570_v38 = vsub.f32 1.0, %v1569_v46 }
0x10fb   :  { %v1693_v27 = vmul.f32 %v2261_v12, %v1692_v13 }
0x10fc   :  { %v1571_v61 = vmul.f32 %v2263_v49, %v1570_v38 }
0x10fd   :  { %v1694_v29 = vadd.f32 %v2261_v12, %v1693_v27 }
0x10fe   :  { %v1572_v53 = vadd.f32 %v2263_v49, %v1571_v61 }
0x10ff   :  { %v1698_v2 = vsel %vm1697_vm9, %v2261_v12, %v1694_v29  ;;  %v1793_v12 = vld [vmem:[#allocation17 + $0x8] sm:$0xff] }
0x1100   :  { %v1576_v14 = vsel %vm1575_vm12, %v2263_v49, %v1572_v53  ;;  %v3368_v1 = vsel %vm1700_vm13, %v1702_v59, %v1698_v2  ;;  %v1792_v49 = vld [vmem:[#allocation17] sm:$0xff] }
0x1101   :  { %v1581_v15 = vsel %vm1578_vm14, %v1580_v62, %v1576_v14  ;;  %v1716_v20 = vsub.f32 1.0, %v3368_v1  ;;  %v1722_v11 = vmul.f32 %v3368_v1, %v3344_v6  ;;  %v1857_v14 = vld [vmem:[#allocation20 + $0x18] sm:$0xff]  ;;  %v1854_v62 = vld [vmem:[#allocation20] sm:$0xff] }
0x1102   :  { %v1594_v10 = vsub.f32 1.0, %v1581_v15  ;;  %1880 = vmatpush.msra.mxu1 %v1857_v14 }
0x113d   :  { %v1707_v43 = vpop.permute.xlu2 %1706 }
0x113e   :  { %v1709_v5 = vmul.f32 %v1707_v43, %v3368_v1  ;;  %v1856_v43 = vld [vmem:[#allocation20 + $0x10] sm:$0xff]  ;;  %v1855_v1 = vld [vmem:[#allocation20 + $0x8] sm:$0xff] }
0x113f   :  { %v1585_v45 = vpop.permute.xlu0 %1584  ;;  %1881 = vmatpush.msra.mxu1 %v1856_v43  ;;  %v1969_v43 = vld [vmem:[#allocation26 + $0x18] sm:$0xff] }
0x1140   :  { %v1587_v32 = vmul.f32 %v1585_v45, %v1581_v15  ;;  %1711 = vrot.lane.b32.xlu1 %v1709_v5, %s2735_s12  ;;  %v2174_v45 = vld [vmem:[#allocation18] ss:$0 sm:$0xff]  ;;  %2015 = vmatpush.msrb.mxu3 %v1969_v43 }
0x1141   :  { %1882 = vmatpush.msra.mxu1 %v1855_v1 }
0x1142   :  { %1589 = vrot.lane.b32.xlu2 %v1587_v32, %s2735_s12 }
0x1143   :  { %1883 = vmatpush.msra.mxu1 %v1854_v62  ;;  %v1968_v62 = vld [vmem:[#allocation26 + $0x10] sm:$0xff] }
0x1144   :  { %2016 = vmatpush.msrb.mxu3 %v1968_v62 }
0x1148   :  { %1767 = vperm.xlu1 %2169, %v2129_v40  }
0x1150   :  { %794 = vrot.lane.b32.xlu1 %v3067_v39, %s2738_s28 }
0x1158   :  { %1283 = vrot.lane.b32.xlu1 %v3248_v22, %s2738_s28 }
0x119c   :  { %v1590_v36 = vpop.permute.xlu2 %1589 }
0x119d   :  { %v1592_v63 = vadd.f32 %v1590_v36, %v1562_v3 }
0x119f   :  { %2264 = vtanh.f32 %v1592_v63 }
0x11a5   :  { %v2265_v17 = vpop.eup %2264 }
0x11a6   :  { %1596 = vrot.lane.b32.xlu2 %v2265_v17, %s2738_s28  ;;  %v1897_v17 = vld [vmem:[%s3515_s16] sm:$0xff] }
0x11ae   :  { %957 = vrot.lane.b32.xlu2 %v3146_v42, %s2738_s28 }
0x11b2   :  { %v1712_v51 = vpop.permute.xlu1 %1711 }
0x11b3   :  { %v1714_v48 = vadd.f32 %v1712_v51, %v1684_v33 }
0x11b5   :  { %2266 = vtanh.f32 %v1714_v48 }
0x11b6   :  { %1446 = vrot.lane.b32.xlu2 %v3295_v41, %s2738_s28  ;;  %v427_v41 = vld.sshfl [vmem:[#allocation1 + $0x20] sm:$0xff pattern:$0x73625140] }
0x11ba   :  { %v3385_v54 = vpop.permute.xlu1 %1767 }
0x11bb   :  { %v2267_v39 = vpop.eup %2266 }
0x11bc   :  { %1718 = vrot.lane.b32.xlu0 %v2267_v39, %s2738_s28 }
0x11c2   :  { %v795_v22 = vpop.permute.xlu1 %794 }
0x11c3   :  { %798 = vst.msk [vmem:[#allocation4 + $0x2] sm:$0x3] %vm636_vm15, %v795_v22 }
0x11c4   :  { %633 = vrot.lane.b32.xlu0 %v3033_v26, %s2738_s28  ;;  %v1600_v26 = vmul.f32 %v1581_v15, %v3355_v16 }
0x11ca   :  { %v1785_v28 = vld [vmem:[#allocation4 + $0x2] sm:$0x3]  ;;  %v1284_v42 = vpop.permute.xlu1 %1283 }
0x11cb   :  { %1810 = vst [vmem:[#allocation1 + $0x1] ss:$4 sm:$0xff] %v1785_v28 }
0x11cc   :  { %1287 = vst.msk [vmem:[#allocation4 + $0x8] sm:$0x3] %vm636_vm15, %v1284_v42  ;;  %1120 = vrot.lane.b32.xlu0 %v3199_v18, %s2738_s28  ;;  %v1629_v18 = vmul.f32 %v3334_v24, %v3355_v16  ;;  %v1794_v16 = vld [vmem:[#allocation17 + $0x10] sm:$0xff] }
0x11d3   :  { %v1788_v21 = vld [vmem:[#allocation4 + $0x8] sm:$0x3] }
0x11d4   :  { %1609 = vrot.lane.b32.xlu0 %v3341_v4, %s2738_s28  ;;  %1816 = vst [vmem:[#allocation1 + $0x20] ss:$4 sm:$0xff] %v1788_v21 }
0x11dc   :  { %457 = vrot.lane.b32.xlu0 %v427_v41, %s2736_s9 }
0x1200   :  { %v1597_v31 = vpop.permute.xlu2 %1596 }
0x1201   :  { %v1599_v33 = vmul.f32 %v1597_v31, %v1594_v10 }
0x1203   :  { %v1601_v34 = vadd.f32 %v1600_v26, %v1599_v33 }
0x1205   :  { %v3399_v3 = vmul.f32 %v3336_v19, %v1601_v34  ;;  %v1795_v19 = vld [vmem:[#allocation17 + $0x18] sm:$0xff] }
0x1206   :  { %1841 = vmatpush.msra.mxu0 %v1795_v19  ;;  %v2175_v19 = vld [vmem:[#allocation21] ss:$0 sm:$0xff] }
0x1207   :  { %v3404_v23 = vadd.f32 %v1629_v18, %v3399_v3 }
0x1208   :  { %v958_v30 = vpop.permute.xlu2 %957  ;;  %1842 = vmatpush.msra.mxu0 %v1794_v16 }
0x1209   :  { %961 = vst.msk [vmem:[#allocation4 + $0x4] sm:$0x3] %vm636_vm15, %v958_v30  ;;  %1659 = vrot.lane.b32.xlu2 %v3404_v23, %s2738_s28 }
0x120a   :  { %1843 = vmatpush.msra.mxu0 %v1793_v12 }
0x120c   :  { %1844 = vmatpush.msra.mxu0 %v1792_v49 }
0x1210   :  { %v1786_v4 = vld [vmem:[#allocation4 + $0x4] sm:$0x3]  ;;  %v1447_v60 = vpop.permute.xlu2 %1446 }
0x1211   :  { %1812 = vst [vmem:[#allocation1 + $0x2] ss:$4 sm:$0xff] %v1786_v4 }
0x1212   :  { %1450 = vst.msk [vmem:[#allocation4 + $0xa] sm:$0x3] %vm636_vm15, %v1447_v60 }
0x1219   :  { %v1789_v44 = vld [vmem:[#allocation4 + $0xa] sm:$0x3] }
0x121a   :  { %1818 = vst [vmem:[#allocation1 + $0x21] ss:$4 sm:$0xff] %v1789_v44  ;;  %v1898_v44 = vld [vmem:[%s3515_s16 + $0x8] sm:$0xff]  ;;  %s2739_s16 = smov 112  }
0x122e   :  { %v1719_v24 = vpop.permute.xlu0 %1718 }
0x122f   :  { %v1721_v9 = vmul.f32 %v1719_v24, %v1716_v20 }
0x1231   :  { %v1723_v25 = vadd.f32 %v1722_v11, %v1721_v9 }
0x1233   :  { %v1770_v46 = vmul.f32 %v3385_v54, %v1723_v25 }
0x1235   :  { %1772 = vrot.lane.b32.xlu1 %v1770_v46, %s2738_s28 }
0x1236   :  { %v634_v13 = vpop.permute.xlu0 %633 }
0x1237   :  { %637 = vst.msk [vmem:[#allocation4] sm:$0x3] %vm636_vm15, %v634_v13 }
0x123d   :  { %459 = vrot.lane.b32.xlu1 %v428_v56, %s2736_s9 }
0x123e   :  { %v1784_v38 = vld [vmem:[#allocation4] sm:$0x3]  ;;  %v1121_v27 = vpop.permute.xlu0 %1120 }
0x123f   :  { %1808 = vst [vmem:[#allocation1] ss:$4 sm:$0xff] %v1784_v38 }
0x1240   :  { %1124 = vst.msk [vmem:[#allocation4 + $0x6] sm:$0x3] %vm636_vm15, %v1121_v27  ;;  %v1919_v27 = vld [vmem:[#allocation23] sm:$0xff] }
0x1246   :  { %v1610_v6 = vpop.permute.xlu0 %1609 }
0x1247   :  { %v1787_v61 = vld [vmem:[#allocation4 + $0x6] sm:$0x3]  ;;  %1613 = vst.msk [vmem:[#allocation4 + $0xc] sm:$0x3] %vm636_vm15, %v1610_v6 }
0x1248   :  { %1814 = vst [vmem:[#allocation1 + $0x3] ss:$4 sm:$0xff] %v1787_v61 }
0x124e   :  { %v1790_v29 = vld [vmem:[#allocation4 + $0xc] sm:$0x3]  ;;  %v458_v0 = vpop.permute.xlu0 %457 }
0x124f   :  { %1820 = vst [vmem:[#allocation1 + $0x22] ss:$4 sm:$0xff] %v1790_v29  ;;  %v1823_v57 = vld.sshfl [vmem:[#allocation1] sm:$0xff pattern:$0x73625140] }
0x1250   :  { %2134 = vmatmul.msk.f32.vlgmr.msra.gmra.mxu0 %vm461_vm10, %v1823_v57 }
0x1263   :  { %v1660_v58 = vpop.permute.xlu2 %1659 }
0x1264   :  { %2131 = vmatmul.msk.f32.vlgmr.msra.gmra.mxu3 %vm461_vm10, %v1660_v58 }
0x12a7   :  { %v1773_v53 = vpop.permute.xlu1 %1772 }
0x12a8   :  { %1776 = vst.msk [vmem:[#allocation4 + $0xe] sm:$0x3] %vm636_vm15, %v1773_v53 }
0x12af   :  { %v1791_v2 = vld [vmem:[#allocation4 + $0xe] sm:$0x3]  ;;  %v460_v50 = vpop.permute.xlu1 %459 }
0x12b0   :  { %1822 = vst [vmem:[#allocation1 + $0x23] ss:$4 sm:$0xff] %v1791_v2  ;;  %v469_v59 = vsel %vm461_vm10, %v458_v0, %v460_v50 }
0x12b1   :  { %485 = vst.msk [vmem:[#allocation3 + $0xe] sm:$0x3] %vm373_vm1, %v469_v59 }
0x12b7   :  { %v1824_v5 = vld.sshfl [vmem:[#allocation1 + $0x20] sm:$0xff pattern:$0x73625140] }
0x12b8   :  { %2135 = vmatmul.msk.f32.gmra.mxu0 %vm461_vm10, %v1824_v5  ;;  %v1725_v51 = vld [vmem:[#allocation3 + $0xe] sm:$0x3] }
0x12cd   :  { %v1846_v15 = vpop.f32.mrf.mxu0 }
0x12ce   :  { %v1847_v32 = vadd.f32 %v2174_v45, %v1846_v15  ;;  %v1967_v15 = vld [vmem:[#allocation26 + $0x8] sm:$0xff] }
0x12cf   :  { %2017 = vmatpush.msrb.mxu3 %v1967_v15 }
0x12d0   :  { %2268 = vtanh.f32 %v1847_v32  ;;  %v1966_v32 = vld [vmem:[#allocation26] sm:$0xff] }
0x12d1   :  { %2018 = vmatpush.msrb.mxu3 %v1966_v32 }
0x12d6   :  { %v2269_v40 = vpop.eup %2268 }
0x12d7   :  { %2136 = vmatmul.msk.f32.vlgmr.msra.gmra.mxu1 %vm461_vm10, %v2269_v40 }
0x12e7   :  { %v1680_v36 = vpop.f32.mrf.mxu3 }
0x12e8   :  { %v1681_v63 = vadd.f32 %v3319_v37, %v1680_v36 }
0x12ea   :  { %1747 = vrot.lane.b32.xlu2 %v1681_v63, %s2735_s12  ;;  %v1726_v48 = vadd.f32 %v1725_v51, %v1681_v63 }
0x12ec   :  { %v2133_v39 = vmul.f32 -1.442695, %v1726_v48 }
0x12ee   :  { %2270 = vpow2.f32 %v2133_v39 }
0x12f2   :  { %1901 = vrot.lane.b32.xlu2 %v1897_v17, %s2724_s22 }
0x12f4   :  { %v2271_v22 = vpop.eup %2270 }
0x12f5   :  { %v1730_v37 = vadd.f32 1.0, %v2271_v22 }
0x12f7   :  { %2272 = vrcp.f32 %v1730_v37  ;;  %v1742_v26 = vand.u32 2147483648, %v1730_v37  ;;  %vm1736_vm6 = vweird.f32 %v1730_v37 }
0x12f9   :  { %v1743_v34 = vor.u32 1.1754944e-38, %v1742_v26 }
0x12fa   :  { %801 = vrot.lane.b32.xlu2 %v3155_v52, %s2738_s28 }
0x12fd   :  { %v2273_v28 = vpop.eup %2272 }
0x12fe   :  { %v1732_v42 = vmul.f32 %v2273_v28, %v1730_v37  ;;  %vm1737_vm1 = vweird.f32 %v2273_v28 }
0x12ff   :  { %vm1738_vm7 = vmor %vm1736_vm6, %vm1737_vm1 }
0x1300   :  { %v1733_v21 = vsub.f32 1.0, %v1732_v42 }
0x1302   :  { %1290 = vrot.lane.b32.xlu2 %v3304_v7, %s2738_s28  ;;  %v1734_v10 = vmul.f32 %v2273_v28, %v1733_v21  ;;  %v1740_v7 = vand.u32 2147483647, %v1730_v37  ;;  %v2176_v37 = vld [vmem:[#allocation24] ss:$0 sm:$0xff] }
0x1304   :  { %v1735_v31 = vadd.f32 %v2273_v28, %v1734_v10  ;;  %vm1741_vm8 = vcmp.eq.f32.partialorder %v1740_v7, 8.507059e+37 }
0x1306   :  { %v1739_v33 = vsel %vm1738_vm7, %v2273_v28, %v1735_v31  ;;  %v2177_v31 = vld [vmem:[#allocation27] ss:$0 sm:$0xff] }
0x1307   :  { %v3437_v30 = vsel %vm1741_vm8, %v1743_v34, %v1739_v33 }
0x1308   :  { %v1757_v1 = vsub.f32 1.0, %v3437_v30  ;;  %v1763_v5 = vmul.f32 %v3437_v30, %v3404_v23 }
0x1335   :  { %v1849_v41 = vpop.f32.mrf.mxu0 }
0x1336   :  { %v1850_v56 = vadd.f32 %v2174_v45, %v1849_v41 }
0x1338   :  { %2274 = vtanh.f32 %v1850_v56 }
0x133e   :  { %v2275_v52 = vpop.eup %2274 }
0x133f   :  { %2137 = vmatmul.msk.f32.gmra.mxu1 %vm461_vm10, %v2275_v52 }
0x1344   :  { %v1748_v18 = vpop.permute.xlu2 %1747 }
0x1345   :  { %v1750_v4 = vmul.f32 %v1748_v18, %v3437_v30 }
0x1347   :  { %1752 = vrot.lane.b32.xlu0 %v1750_v4, %s2735_s12 }
0x134c   :  { %v1902_v60 = vpop.permute.xlu2 %1901 }
0x134f   :  { %1903 = vrot.lane.b32.xlu0 %v1898_v44, %s2724_s22  ;;  %s2740_s22 = smov [#allocation29]  }
0x1350   :  { %s2036_s12 = sshll.u32 %s2740_s22, 4  ;;  %s2037_s12 = int_to_ptr.vmem [resolvable:$true] %s2036_s12 }
0x1354   :  { %v1885_v20 = vpop.f32.mrf.mxu1  ;;  %v802_v24 = vpop.permute.xlu2 %801 }
0x1355   :  { %v1886_v16 = vadd.f32 %v2175_v19, %v1885_v20  ;;  %805 = vst.msk [vmem:[#allocation5 + $0x2] sm:$0x3] %vm636_vm15, %v802_v24 }
0x1357   :  { %1891 = vst.msk [vmem:[#allocation29] sm:$0xff] %vm461_vm10, %v1886_v16  ;;  %964 = vrot.lane.b32.xlu0 %v3208_v8, %s2738_s28  ;;  %v1893_v11 = vmul.f32 1.442695, %v1886_v16  ;;  %v1920_v8 = vld [vmem:[#allocation23 + $0x8] sm:$0xff] }
0x1358   :  { %1945 = vmatpush.msrb.mxu2 %v1920_v8 }
0x1359   :  { %2276 = vpow2.f32 %v1893_v11 }
0x135a   :  { %1946 = vmatpush.msrb.mxu2 %v1919_v27 }
0x135c   :  { %v1959_v9 = vld [vmem:[#allocation5 + $0x2] sm:$0x3]  ;;  %v1291_v12 = vpop.permute.xlu2 %1290 }
0x135d   :  { %1984 = vst [vmem:[#allocation1 + $0x1] ss:$4 sm:$0xff] %v1959_v9 }
0x135e   :  { %1294 = vst.msk [vmem:[#allocation5 + $0x8] sm:$0x3] %vm636_vm15, %v1291_v12 }
0x135f   :  { %1453 = vrot.lane.b32.xlu0 %v3350_v55, %s2738_s28  ;;  %v2277_v49 = vpop.eup %2276 }
0x1360   :  { %v1907_v46 = vmul.f32 %v2277_v49, %v1902_v60 }
0x1365   :  { %v1962_v25 = vld [vmem:[#allocation5 + $0x8] sm:$0x3] }
0x1366   :  { %1990 = vst [vmem:[#allocation1 + $0x20] ss:$4 sm:$0xff] %v1962_v25 }
0x1367   :  { %1911 = vrot.lane.b32.xlu0 %v1907_v46, %s2739_s16 }
0x13b9   :  { %v1753_v13 = vpop.permute.xlu0 %1752 }
0x13ba   :  { %v1755_v38 = vadd.f32 %v1753_v13, %v1725_v51 }
0x13bc   :  { %2278 = vtanh.f32 %v1755_v38  ;;  %v1888_v6 = vpop.f32.mrf.mxu1 }
0x13bd   :  { %v1889_v61 = vadd.f32 %v2175_v19, %v1888_v6 }
0x13bf   :  { %1892 = vst.msk [vmem:[#allocation29 + $0x8] sm:$0xff] %vm461_vm10, %v1889_v61  ;;  %v1895_v0 = vmul.f32 1.442695, %v1889_v61 }
0x13c0   :  { %2044 = dma.vmem_to_hbm [thread:$0]  %s2037_s12, 256, %s2039_s26, [#allocation8], %s2726_s7, %s2726_s7, %s2727_s24  }
0x13c1   :  { %v1904_v29 = vpop.permute.xlu0 %1903  ;;  %2280 = vpow2.f32 %v1895_v0 }
0x13c2   :  { %v2279_v55 = vpop.eup %2278 }
0x13c3   :  { %1759 = vrot.lane.b32.xlu1 %v2279_v55, %s2738_s28 }
0x13c9   :  { %v965_v57 = vpop.permute.xlu0 %964 }
0x13ca   :  { %968 = vst.msk [vmem:[#allocation5 + $0x4] sm:$0x3] %vm636_vm15, %v965_v57 }
0x13cb   :  { %640 = vrot.lane.b32.xlu1 %v3075_v47, %s2738_s28  ;;  %v2281_v47 = vpop.eup %2280 }
0x13cc   :  { %v1908_v14 = vmul.f32 %v2281_v47, %v1904_v29 }
0x13d1   :  { %v1960_v58 = vld [vmem:[#allocation5 + $0x4] sm:$0x3]  ;;  %v1454_v53 = vpop.permute.xlu0 %1453 }
0x13d2   :  { %1986 = vst [vmem:[#allocation1 + $0x2] ss:$4 sm:$0xff] %v1960_v58 }
0x13d3   :  { %1457 = vst.msk [vmem:[#allocation5 + $0xa] sm:$0x3] %vm636_vm15, %v1454_v53  ;;  %1127 = vrot.lane.b32.xlu1 %v3257_v35, %s2738_s28 }
0x13d9   :  { %v1912_v2 = vpop.permute.xlu0 %1911 }
0x13da   :  { %v1963_v50 = vld [vmem:[#allocation5 + $0xa] sm:$0x3]  ;;  %v1917_v59 = vadd.f32 %v1912_v2, %v1886_v16 }
0x13db   :  { %1992 = vst [vmem:[#allocation1 + $0x21] ss:$4 sm:$0xff] %v1963_v50  ;;  %1616 = vrot.lane.b32.xlu1 %v3399_v3, %s2738_s28 }
0x13dc   :  { %2138 = vmatmul.msk.f32.vlgmr.msrb.gmra.mxu2 %vm308_vm0, %v1917_v59 }
0x13e3   :  { %1913 = vrot.lane.b32.xlu1 %v1908_v14, %s2739_s16 }
0x1435   :  { %v1760_v35 = vpop.permute.xlu1 %1759 }
0x1436   :  { %v1762_v45 = vmul.f32 %v1760_v35, %v1757_v1 }
0x1438   :  { %v1764_v3 = vadd.f32 %v1763_v5, %v1762_v45 }
0x143a   :  { %v1777_v40 = vmul.f32 %v3385_v54, %v1764_v3 }
0x143c   :  { %1779 = vrot.lane.b32.xlu2 %v1777_v40, %s2738_s28 }
0x143d   :  { %v641_v36 = vpop.permute.xlu1 %640 }
0x143e   :  { %643 = vst.msk [vmem:[#allocation5] sm:$0x3] %vm636_vm15, %v641_v36 }
0x1445   :  { %v1958_v63 = vld [vmem:[#allocation5] sm:$0x3]  ;;  %v1128_v17 = vpop.permute.xlu1 %1127 }
0x1446   :  { %1982 = vst [vmem:[#allocation1] ss:$4 sm:$0xff] %v1958_v63 }
0x1447   :  { %1131 = vst.msk [vmem:[#allocation5 + $0x6] sm:$0x3] %vm636_vm15, %v1128_v17 }
0x144d   :  { %v1617_v23 = vpop.permute.xlu1 %1616 }
0x144e   :  { %v1961_v51 = vld [vmem:[#allocation5 + $0x6] sm:$0x3]  ;;  %1620 = vst.msk [vmem:[#allocation5 + $0xc] sm:$0x3] %vm636_vm15, %v1617_v23 }
0x144f   :  { %1988 = vst [vmem:[#allocation1 + $0x3] ss:$4 sm:$0xff] %v1961_v51 }
0x1455   :  { %v1964_v48 = vld [vmem:[#allocation5 + $0xc] sm:$0x3]  ;;  %v1914_v39 = vpop.permute.xlu1 %1913 }
0x1456   :  { %1994 = vst [vmem:[#allocation1 + $0x22] ss:$4 sm:$0xff] %v1964_v48  ;;  %v1918_v54 = vadd.f32 %v1914_v39, %v1889_v61  ;;  %v1997_v22 = vld.sshfl [vmem:[#allocation1] sm:$0xff pattern:$0x73625140] }
0x1457   :  { %2140 = vmatmul.msk.f32.vlgmr.msrb.gmra.mxu3 %vm461_vm10, %v1997_v22 }
0x1458   :  { %2139 = vmatmul.msk.f32.gmra.mxu2 %vm308_vm0, %v1918_v54 }
0x145f   :  { %v1948_v28 = vpop.f32.mrf.mxu2 }
0x1460   :  { %v1949_v42 = vadd.f32 %v2176_v37, %v1948_v28 }
0x1462   :  { %2282 = vtanh.f32 %v1949_v42 }
0x1468   :  { %v2283_v41 = vpop.eup %2282 }
0x1469   :  { %1956 = vst.msk [vmem:[#allocation32] sm:$0xff] %vm461_vm10, %v2283_v41 }
0x1496   :  { %v1780_v21 = vpop.permute.xlu2 %1779 }
0x1497   :  { %1783 = vst.msk [vmem:[#allocation5 + $0xe] sm:$0x3] %vm636_vm15, %v1780_v21 }
0x149e   :  { %v1965_v56 = vld [vmem:[#allocation5 + $0xe] sm:$0x3] }
0x149f   :  { %1996 = vst [vmem:[#allocation1 + $0x23] ss:$4 sm:$0xff] %v1965_v56 }
0x14a6   :  { %v1998_v10 = vld.sshfl [vmem:[#allocation1 + $0x20] sm:$0xff pattern:$0x73625140] }
0x14a7   :  { %2141 = vmatmul.msk.f32.gmra.mxu3 %vm461_vm10, %v1998_v10 }
0x14da   :  { %v2020_v52 = vpop.f32.mrf.mxu3 }
0x14db   :  { %v2021_v26 = vadd.f32 %v2177_v31, %v2020_v52  ;;  %v1951_v7 = vpop.f32.mrf.mxu2 }
0x14dc   :  { %v1952_v33 = vadd.f32 %v2176_v37, %v1951_v7 }
0x14dd   :  { %vm2026_vm0 = vcmp.gt.f32.partialorder %v2021_v26, 0.001 }
0x14de   :  { %v2028_v34 = vsel %vm2026_vm0, %v2021_v26, 0.001  ;;  %2284 = vtanh.f32 %v1952_v33 }
0x14df   :  { %2030 = vst.msk [vmem:[#allocation30] sm:$0xff] %vm461_vm10, %v2028_v34 }
0x14e4   :  { %v2285_v18 = vpop.eup %2284 }
0x14e5   :  { %1957 = vst.msk [vmem:[#allocation32 + $0x8] sm:$0xff] %vm461_vm10, %v2285_v18 }
0x152a   :  { %v2023_v30 = vpop.f32.mrf.mxu3 }
0x152b   :  { %v2024_v4 = vadd.f32 %v2177_v31, %v2023_v30 }
0x152d   :  { %vm2027_vm2 = vcmp.gt.f32.partialorder %v2024_v4, 0.001 }
0x152e   :  { %v2029_v60 = vsel %vm2027_vm2, %v2024_v4, 0.001 }
0x152f   :  { %2031 = vst.msk [vmem:[#allocation30 + $0x8] sm:$0xff] %vm461_vm10, %v2029_v60 }
0x1530   :  { %2057 = dma.vmem_to_hbm [thread:$0]  %s2050_s27, 256, %s2052_s15, [#allocation31], %s2726_s7, %s2726_s7, %s2727_s24  }
0x1531   :  { %2070 = dma.vmem_to_hbm [thread:$0]  %s2063_s0, 256, %s2065_s30, [#allocation31], %s2726_s7, %s2726_s7, %s2727_s24  }
0x1532   :  { %2712 = dma.done.wait [#allocation8], 256  }
0x1533   :  { %2713 = vsyncadd [#allocation8], 4294967040 }
0x1534   :  { %2714 = dma.done.wait [#allocation31], 512  }
0x1535   :  { %2715 = vsyncadd [#allocation31], 4294966784 }
0x1536   :  { %2083 = vsyncpa [#allocation7], 1 }
0x1537   :  { %2084 = vsyncpa [#allocation10], 1 }
0x1538   :  { %2085 = vsyncpa [#allocation13], 1 }
0x1539   :  { %2086 = vsyncpa [#allocation16], 1 }
0x153a   :  { %2087 = vsyncpa [#allocation19], 1 }
0x153b   :  { %2088 = vsyncpa [#allocation22], 1 }
0x153c   :  { %2089 = vsyncpa [#allocation25], 1 }
0x153d   :  { %2090 = vsyncpa [#allocation28], 1 }
0x153e   :  { %2091 = vsyncpa [#allocation8], 1 }
0x153f   :  { %2092 = vsyncpa [#allocation31], 1 }

</bundles_post_ra>
